<compile_context>
chip_gen: v5e
topology: v5e:2x2
jax: 0.10.0
libtpu: 0.0.40
codegen_flags: <defaults>
</compile_context>

<pallas_src>
import math
from functools import partial

import jax
import jax.numpy as jnp
import numpy as np
from jax.experimental import pallas as pl
from jax.experimental.pallas import tpu as pltpu

EPS = 1e-5


def _layernorm(x, g, b, eps):
    mu = jnp.mean(x, axis=-1, keepdims=True)
    var = jnp.mean(jnp.square(x - mu), axis=-1, keepdims=True)
    return (x - mu) * jax.lax.rsqrt(var + eps) * g + b


def _mapper_kernel(
    x_src_ref, x_dst_ref,
    ln_ref, bias_ref, b_mlp1_ref,
    w_emb_src_ref, w_emb_dst_ref,
    w_q_ref, w_k_ref, w_v_ref, w_proj_ref,
    w_mlp1_ref, w_mlp2_ref,
    out_ref,
    *, num_heads, batch_per_block, s_src, s_dst, eps,
):
    f32 = jnp.float32
    bf16 = jnp.bfloat16

    # --- node embeddings (emb_nodes_src / emb_nodes_dst), all rows at once ---
    e_src = jnp.dot(x_src_ref[...].astype(bf16), w_emb_src_ref[...],
                    preferred_element_type=f32) + bias_ref[0]
    e_dst = jnp.dot(x_dst_ref[...].astype(bf16), w_emb_dst_ref[...],
                    preferred_element_type=f32) + bias_ref[1]

    # --- TransformerMapperBlock ---
    ln_src = _layernorm(e_src, ln_ref[0], ln_ref[1], eps).astype(bf16)
    ln_dst = _layernorm(e_dst, ln_ref[2], ln_ref[3], eps).astype(bf16)

    hidden = e_dst.shape[-1]
    head_dim = hidden // num_heads
    b = batch_per_block
    r_dst = b * s_dst

    # Per-head attention. Weights are head-stacked slabs, so q_h/k_h/v_h are
    # produced in native (rows, head_dim) layout (no lane extraction), and the
    # 1/sqrt(head_dim) scale is already folded into w_q. The head concat is
    # folded into the output projection via w_proj_ref[h].
    proj = jnp.zeros((r_dst, hidden), f32)
    for h in range(num_heads):                       # static unroll over heads
        q_h = jnp.dot(ln_dst, w_q_ref[h], preferred_element_type=f32)
        k_h = jnp.dot(ln_src, w_k_ref[h], preferred_element_type=f32)
        v_h = jnp.dot(ln_src, w_v_ref[h], preferred_element_type=f32)

        # Batched per-element attention (sublane-only reshapes; s_* % 8 == 0),
        # so no block-diagonal mask is needed.
        q3 = q_h.reshape(b, s_dst, head_dim).astype(bf16)
        k3 = k_h.reshape(b, s_src, head_dim).astype(bf16)
        v3 = v_h.reshape(b, s_src, head_dim).astype(bf16)

        s = jnp.einsum("bqd,bkd->bqk", q3, k3, preferred_element_type=f32)
        s = s - jnp.max(s, axis=-1, keepdims=True)
        p = jnp.exp(s)
        p = p * pl.reciprocal(jnp.sum(p, axis=-1, keepdims=True), approx=True)
        o3 = jnp.einsum("bqk,bkd->bqd", p.astype(bf16), v3,
                        preferred_element_type=f32)

        o_h = o3.reshape(r_dst, head_dim).astype(bf16)
        proj = proj + jnp.dot(o_h, w_proj_ref[h], preferred_element_type=f32)

    x1 = e_dst + proj + bias_ref[2]

    ln_m = _layernorm(x1, ln_ref[4], ln_ref[5], eps).astype(bf16)
    h1 = jnp.dot(ln_m, w_mlp1_ref[...],
                 preferred_element_type=f32) + b_mlp1_ref[0]
    # TODO(synk): torch.nn.GELU default is exact (erf); tanh-approx GELU used
    # for Mosaic-safe lowering (reference below uses the same approximation).
    h1 = jax.nn.gelu(h1, approximate=True).astype(bf16)
    mlp = jnp.dot(h1, w_mlp2_ref[...],
                  preferred_element_type=f32) + bias_ref[3]

    out_ref[...] = (x1 + mlp).astype(out_ref.dtype)


def prepare_params(params, num_heads):
    """One-time restructuring of the torch-layout parameters for the kernel.

    * splits w_kv into separate K/V slabs (no mid-vreg lane split in-kernel)
    * folds 1/sqrt(head_dim) into W_q
    * head-stacks W_q/W_k/W_v -> (H, hidden, head_dim), W_proj -> (H, head_dim, hidden)
    * packs LN gammas/betas and hidden-width biases into two slabs
    * stores matmul weights in bf16
    """
    hidden = params["w_emb_src"].shape[1]
    head_dim = hidden // num_heads
    scale = 1.0 / math.sqrt(head_dim)
    bf16 = jnp.bfloat16

    def head_stack(w):
        # (hidden_in, num_heads*head_dim) -> (num_heads, hidden_in, head_dim)
        return jnp.transpose(w.reshape(hidden, num_heads, head_dim), (1, 0, 2))

    w_q = (params["w_q"].astype(jnp.float32) * scale).astype(bf16)
    w_k = params["w_kv"][:, :hidden]
    w_v = params["w_kv"][:, hidden:]

    return {
        "ln_pack": jnp.concatenate(
            [params[n] for n in ("g_ln_src", "b_ln_src", "g_ln_dst",
                                 "b_ln_dst", "g_ln_mlp", "b_ln_mlp")],
            axis=0).astype(jnp.float32),                       # (6, hidden)
        "bias_pack": jnp.concatenate(
            [params[n] for n in ("b_emb_src", "b_emb_dst", "b_proj", "b_mlp2")],
            axis=0).astype(jnp.float32),                       # (4, hidden)
        "b_mlp1": params["b_mlp1"].astype(jnp.float32),        # (1, 4*hidden)
        "w_emb_src": params["w_emb_src"].astype(bf16),
        "w_emb_dst": params["w_emb_dst"].astype(bf16),
        "w_q3": head_stack(w_q).astype(bf16),
        "w_k3": head_stack(w_k).astype(bf16),
        "w_v3": head_stack(w_v).astype(bf16),
        "w_proj3": params["w_proj"].astype(bf16).reshape(num_heads, head_dim,
                                                         hidden),
        "w_mlp1": params["w_mlp1"].astype(bf16),
        "w_mlp2": params["w_mlp2"].astype(bf16),
    }


def _padded_vmem_bytes(shape, dtype):
    """Bytes of one VMEM tile of `shape`, padded to (sublane, 128) tiles."""
    itemsize = jnp.dtype(dtype).itemsize
    shape = tuple(int(d) for d in shape)
    if len(shape) == 1:
        shape = (1,) + shape
    *lead, r, c = shape
    sub = 8 * max(1, 4 // itemsize)          # 8 rows f32, 16 rows bf16
    r_pad = -(-r // sub) * sub
    c_pad = -(-c // 128) * 128
    lead_n = 1
    for d in lead:
        lead_n *= d
    return lead_n * r_pad * c_pad * itemsize


def transformer_forward_mapper(x_src, x_dst, prepared, batch_size, num_heads,
                               eps=EPS, num_blocks=1):
    """Returns (x_src_original, x_dst_processed) like the PyTorch module.

    prepared: output of prepare_params (one-time weight restructuring).
    num_blocks: grid steps the batch is split over. Keep 1 on single-
    TensorCore chips (v5e/v6e); use 2 on v7x so the "parallel" grid axis
    shards whole batch elements across both TensorCores.
    """
    assert batch_size % num_blocks == 0
    bpb = batch_size // num_blocks
    c_src = x_src.shape[-1]
    c_dst = x_dst.shape[-1]
    hidden = prepared["w_emb_src"].shape[1]
    s_src = x_src.shape[0] // batch_size
    s_dst = x_dst.shape[0] // batch_size
    row_src = bpb * s_src
    row_dst = bpb * s_dst

    ln_pack = prepared["ln_pack"]
    bias_pack = prepared["bias_pack"]
    b_mlp1 = prepared["b_mlp1"]
    weights = [prepared[n] for n in ("w_emb_src", "w_emb_dst", "w_q3", "w_k3",
                                     "w_v3", "w_proj3", "w_mlp1", "w_mlp2")]

    def const_spec(arr):
        # Grid-invariant operand: full-shape block, constant index_map.
        # TODO(synk): at production weight sizes, add pipeline_mode=
        # pl.Buffered(1) so these are single-buffered on v7x (64 MiB VMEM).
        if arr.ndim == 2:
            return pl.BlockSpec(arr.shape, lambda i: (0, 0))
        return pl.BlockSpec(arr.shape, lambda i: (0, 0, 0))

    in_specs = [
        pl.BlockSpec((row_src, c_src), lambda i: (i, 0)),
        pl.BlockSpec((row_dst, c_dst), lambda i: (i, 0)),
        const_spec(ln_pack), const_spec(bias_pack), const_spec(b_mlp1),
    ] + [const_spec(w) for w in weights]

    out_specs = pl.BlockSpec((row_dst, hidden), lambda i: (i, 0))

    # Explicit VMEM budget: padded block tiles, x2 for double buffering,
    # plus generous headroom for in-kernel f32 intermediates.
    operands = [x_src, x_dst, ln_pack, bias_pack, b_mlp1] + weights
    block_shapes = ([(row_src, c_src), (row_dst, c_dst), ln_pack.shape,
                     bias_pack.shape, b_mlp1.shape] + [w.shape for w in weights])
    io_bytes = sum(_padded_vmem_bytes(s, a.dtype)
                   for s, a in zip(block_shapes, operands))
    io_bytes += _padded_vmem_bytes((row_dst, hidden), jnp.float32)
    vmem_limit = int(min(max(2 * io_bytes + (24 << 20), 32 << 20), 96 << 20))

    kernel = partial(_mapper_kernel, num_heads=num_heads,
                     batch_per_block=bpb, s_src=s_src, s_dst=s_dst, eps=eps)

    out = pl.pallas_call(
        kernel,
        out_shape=jax.ShapeDtypeStruct((batch_size * s_dst, hidden),
                                       jnp.float32),
        grid=(num_blocks,),
        in_specs=in_specs,
        out_specs=out_specs,
        compiler_params=pltpu.CompilerParams(
            dimension_semantics=("parallel",),
            vmem_limit_bytes=vmem_limit),
    )(*operands)

    return x_src, out


def reference(x_src, x_dst, params, batch_size, num_heads, eps=EPS):
    """Pure-JAX (f32 math) reference of the same forward pass."""
    hidden = params["w_emb_src"].shape[1]
    xs = x_src.reshape(batch_size, -1, x_src.shape[-1])
    xd = x_dst.reshape(batch_size, -1, x_dst.shape[-1])

    def ln(x, g, b):
        mu = x.mean(-1, keepdims=True)
        var = ((x - mu) ** 2).mean(-1, keepdims=True)
        return (x - mu) / jnp.sqrt(var + eps) * g + b

    def w32(name):
        return params[name].astype(jnp.float32)

    e_src = xs @ w32("w_emb_src") + params["b_emb_src"]
    e_dst = xd @ w32("w_emb_dst") + params["b_emb_dst"]
    ln_src = ln(e_src, params["g_ln_src"], params["b_ln_src"])
    ln_dst = ln(e_dst, params["g_ln_dst"], params["b_ln_dst"])

    q = ln_dst @ w32("w_q")
    kv = ln_src @ w32("w_kv")
    k_, v_ = kv[..., :hidden], kv[..., hidden:]
    hd = hidden // num_heads

    def split(t):
        return t.reshape(batch_size, -1, num_heads, hd).transpose(0, 2, 1, 3)

    qh, kh, vh = split(q), split(k_), split(v_)
    s = jnp.einsum("bhqd,bhkd->bhqk", qh, kh) / math.sqrt(hd)
    p = jax.nn.softmax(s, axis=-1)
    o = jnp.einsum("bhqk,bhkd->bhqd", p, vh)
    o = o.transpose(0, 2, 1, 3).reshape(batch_size, -1, hidden)

    x1 = e_dst + (o @ w32("w_proj") + params["b_proj"])
    lnm = ln(x1, params["g_ln_mlp"], params["b_ln_mlp"])
    h1 = jax.nn.gelu(lnm @ w32("w_mlp1") + params["b_mlp1"], approximate=True)
    out = x1 + (h1 @ w32("w_mlp2") + params["b_mlp2"])
    return out.reshape(-1, hidden)


def init_params(key, c_src, c_dst, hidden, mlp_ratio):
    """torch-style init. Matmul weights stored bfloat16 (MXU-native mixed
    precision); biases / LayerNorm params stay float32. The f32 reference
    above uses the same (bf16-valued) weights upcast to f32."""
    mlp_hidden = mlp_ratio * hidden
    ks = jax.random.split(key, 12)

    def lin_w(k, fan_in, fan_out):
        bound = 1.0 / math.sqrt(fan_in)
        w = jax.random.uniform(k, (fan_in, fan_out), jnp.float32, -bound, bound)
        return w.astype(jnp.bfloat16)

    def lin_b(k, fan_in, fan_out):
        bound = 1.0 / math.sqrt(fan_in)
        return jax.random.uniform(k, (1, fan_out), jnp.float32, -bound, bound)

    p = {
        # emb_nodes_src / emb_nodes_dst
        "w_emb_src": lin_w(ks[0], c_src, hidden),
        "b_emb_src": lin_b(ks[1], c_src, hidden),
        "w_emb_dst": lin_w(ks[2], c_dst, hidden),
        "b_emb_dst": lin_b(ks[3], c_dst, hidden),
        # attention layer norms (torch default init: gamma=1, beta=0)
        "g_ln_src": jnp.ones((1, hidden), jnp.float32),
        "b_ln_src": jnp.zeros((1, hidden), jnp.float32),
        "g_ln_dst": jnp.ones((1, hidden), jnp.float32),
        "b_ln_dst": jnp.zeros((1, hidden), jnp.float32),
        # cross attention: lin_q / lin_kv (no bias), projection (bias)
        "w_q": lin_w(ks[4], hidden, hidden),
        "w_kv": lin_w(ks[5], hidden, 2 * hidden),
        "w_proj": lin_w(ks[6], hidden, hidden),
        "b_proj": lin_b(ks[7], hidden, hidden),
        # MLP branch
        "g_ln_mlp": jnp.ones((1, hidden), jnp.float32),
        "b_ln_mlp": jnp.zeros((1, hidden), jnp.float32),
        "w_mlp1": lin_w(ks[8], hidden, mlp_hidden),
        "b_mlp1": lin_b(ks[9], hidden, mlp_hidden),
        "w_mlp2": lin_w(ks[10], mlp_hidden, hidden),
        "b_mlp2": lin_b(ks[11], mlp_hidden, hidden),
    }
    return p


if __name__ == "__main__":
    B = 2
    S_SRC, S_DST = 48, 32          # grid points per batch element (src / dst)
    C_SRC, C_DST = 10, 6           # in_channels_src / in_channels_dst
    HIDDEN = 64                    # hidden_dim
    HEADS = 4                      # num_heads
    MLP_RATIO = 4                  # mlp_hidden_ratio

    key = jax.random.PRNGKey(0)
    k1, k2, k3 = jax.random.split(key, 3)
    x_src = jax.random.normal(k1, (B * S_SRC, C_SRC), jnp.float32)
    x_dst = jax.random.normal(k2, (B * S_DST, C_DST), jnp.float32)
    params = init_params(k3, C_SRC, C_DST, HIDDEN, MLP_RATIO)
    prepared = prepare_params(params, HEADS)   # one-time weight restructuring

    out_src, out_dst = transformer_forward_mapper(x_src, x_dst, prepared, B,
                                                  HEADS, num_blocks=1)
    jax.block_until_ready(out_dst)

    # bf16 activation operands + approx softmax reciprocal in the kernel vs an
    # all-f32 reference on the same (bf16-valued) weights -> ~2e-2 tolerance.
    ref_dst = reference(x_src, x_dst, params, B, HEADS)
    np.testing.assert_allclose(np.asarray(out_dst), np.asarray(ref_dst),
                               rtol=2e-2, atol=2e-2)
    assert out_src.shape == x_src.shape
    assert out_dst.shape == (B * S_DST, HIDDEN)
    print("KERNEL_OK")
</pallas_src>

<mosaic_0001>
module attributes {stable_mosaic.version = 11 : i64} {
  func.func @_mapper_kernel(%arg0: i32, %arg1: memref<96x10xf32, #tpu.memory_space<vmem>>, %arg2: memref<64x6xf32, #tpu.memory_space<vmem>>, %arg3: memref<6x64xf32, #tpu.memory_space<vmem>>, %arg4: memref<4x64xf32, #tpu.memory_space<vmem>>, %arg5: memref<1x256xf32, #tpu.memory_space<vmem>>, %arg6: memref<10x64xbf16, #tpu.memory_space<vmem>>, %arg7: memref<6x64xbf16, #tpu.memory_space<vmem>>, %arg8: memref<4x64x16xbf16, #tpu.memory_space<vmem>>, %arg9: memref<4x64x16xbf16, #tpu.memory_space<vmem>>, %arg10: memref<4x64x16xbf16, #tpu.memory_space<vmem>>, %arg11: memref<4x16x64xbf16, #tpu.memory_space<vmem>>, %arg12: memref<64x256xbf16, #tpu.memory_space<vmem>>, %arg13: memref<256x64xbf16, #tpu.memory_space<vmem>>, %arg14: memref<64x64xf32, #tpu.memory_space<vmem>>) attributes {dimension_semantics = [#tpu.dimension_semantics<parallel>], iteration_bounds = array<i64: 1>, scalar_prefetch = 0 : i64, scratch_operands = 0 : i64, tpu.core_type = #tpu.core_type<tc>, window_params = [{transform_indices = @transform_0, window_bounds = array<i64: 96, 10>}, {transform_indices = @transform_1, window_bounds = array<i64: 64, 6>}, {pipeline_mode = #tpu.pipeline_mode<synchronous>, transform_indices = @transform_2, window_bounds = array<i64: 6, 64>}, {pipeline_mode = #tpu.pipeline_mode<synchronous>, transform_indices = @transform_3, window_bounds = array<i64: 4, 64>}, {pipeline_mode = #tpu.pipeline_mode<synchronous>, transform_indices = @transform_4, window_bounds = array<i64: 1, 256>}, {pipeline_mode = #tpu.pipeline_mode<synchronous>, transform_indices = @transform_5, window_bounds = array<i64: 10, 64>}, {pipeline_mode = #tpu.pipeline_mode<synchronous>, transform_indices = @transform_6, window_bounds = array<i64: 6, 64>}, {pipeline_mode = #tpu.pipeline_mode<synchronous>, transform_indices = @transform_7, window_bounds = array<i64: 4, 64, 16>}, {pipeline_mode = #tpu.pipeline_mode<synchronous>, transform_indices = @transform_8, window_bounds = array<i64: 4, 64, 16>}, {pipeline_mode = #tpu.pipeline_mode<synchronous>, transform_indices = @transform_9, window_bounds = array<i64: 4, 64, 16>}, {pipeline_mode = #tpu.pipeline_mode<synchronous>, transform_indices = @transform_10, window_bounds = array<i64: 4, 16, 64>}, {pipeline_mode = #tpu.pipeline_mode<synchronous>, transform_indices = @transform_11, window_bounds = array<i64: 64, 256>}, {pipeline_mode = #tpu.pipeline_mode<synchronous>, transform_indices = @transform_12, window_bounds = array<i64: 256, 64>}, {transform_indices = @transform_13, window_bounds = array<i64: 64, 64>}]} {
    %c0 = arith.constant 0 : index
    %c0_0 = arith.constant 0 : index
    %0 = vector.load %arg1[%c0, %c0_0] : memref<96x10xf32, #tpu.memory_space<vmem>>, vector<96x10xf32>
    %1 = arith.truncf %0 : vector<96x10xf32> to vector<96x10xbf16>
    %c0_1 = arith.constant 0 : index
    %c0_2 = arith.constant 0 : index
    %2 = vector.load %arg6[%c0_1, %c0_2] : memref<10x64xbf16, #tpu.memory_space<vmem>>, vector<10x64xbf16>
    %cst = arith.constant dense<0.000000e+00> : vector<96x64xf32>
    %3 = tpu.matmul %1, %2, %cst {dimension_numbers = #tpu.dot_dimension_numbers<[1], [0], [0], [1], [0, 0, 1, 1], [], []>} : vector<96x10xbf16>, vector<10x64xbf16>, vector<96x64xf32> -> vector<96x64xf32>
    %c0_3 = arith.constant 0 : index
    %c0_4 = arith.constant 0 : index
    %4 = vector.load %arg4[%c0_3, %c0_4] : memref<4x64xf32, #tpu.memory_space<vmem>>, vector<1x64xf32>
    %5 = vector.shape_cast %4 : vector<1x64xf32> to vector<64xf32>
    %6 = vector.shape_cast %5 : vector<64xf32> to vector<1x64xf32>
    %7 = vector.broadcast %6 : vector<1x64xf32> to vector<96x64xf32>
    %8 = arith.addf %3, %7 : vector<96x64xf32>
    %c0_5 = arith.constant 0 : index
    %c0_6 = arith.constant 0 : index
    %9 = vector.load %arg2[%c0_5, %c0_6] : memref<64x6xf32, #tpu.memory_space<vmem>>, vector<64x6xf32>
    %10 = arith.truncf %9 : vector<64x6xf32> to vector<64x6xbf16>
    %c0_7 = arith.constant 0 : index
    %c0_8 = arith.constant 0 : index
    %11 = vector.load %arg7[%c0_7, %c0_8] : memref<6x64xbf16, #tpu.memory_space<vmem>>, vector<6x64xbf16>
    %cst_9 = arith.constant dense<0.000000e+00> : vector<64x64xf32>
    %12 = tpu.matmul %10, %11, %cst_9 {dimension_numbers = #tpu.dot_dimension_numbers<[1], [0], [0], [1], [0, 0, 1, 1], [], []>} : vector<64x6xbf16>, vector<6x64xbf16>, vector<64x64xf32> -> vector<64x64xf32>
    %c1 = arith.constant 1 : index
    %c0_10 = arith.constant 0 : index
    %13 = vector.load %arg4[%c1, %c0_10] : memref<4x64xf32, #tpu.memory_space<vmem>>, vector<1x64xf32>
    %14 = vector.shape_cast %13 : vector<1x64xf32> to vector<64xf32>
    %15 = vector.shape_cast %14 : vector<64xf32> to vector<1x64xf32>
    %16 = vector.broadcast %15 : vector<1x64xf32> to vector<64x64xf32>
    %17 = arith.addf %12, %16 : vector<64x64xf32>
    %c0_11 = arith.constant 0 : index
    %c0_12 = arith.constant 0 : index
    %18 = vector.load %arg3[%c0_11, %c0_12] : memref<6x64xf32, #tpu.memory_space<vmem>>, vector<1x64xf32>
    %19 = vector.shape_cast %18 : vector<1x64xf32> to vector<64xf32>
    %c1_13 = arith.constant 1 : index
    %c0_14 = arith.constant 0 : index
    %20 = vector.load %arg3[%c1_13, %c0_14] : memref<6x64xf32, #tpu.memory_space<vmem>>, vector<1x64xf32>
    %21 = vector.shape_cast %20 : vector<1x64xf32> to vector<64xf32>
    %cst_15 = arith.constant dense<0.000000e+00> : vector<96xf32>
    %22 = vector.multi_reduction <add>, %8, %cst_15 [1] : vector<96x64xf32> to vector<96xf32>
    %23 = vector.shape_cast %22 : vector<96xf32> to vector<96x1xf32>
    %cst_16 = arith.constant 6.400000e+01 : f32
    %24 = vector.broadcast %cst_16 : f32 to vector<96x1xf32>
    %25 = arith.divf %23, %24 : vector<96x1xf32>
    %26 = vector.broadcast %25 : vector<96x1xf32> to vector<96x64xf32>
    %27 = arith.subf %8, %26 : vector<96x64xf32>
    %28 = arith.mulf %27, %27 : vector<96x64xf32>
    %cst_17 = arith.constant dense<0.000000e+00> : vector<96xf32>
    %29 = vector.multi_reduction <add>, %28, %cst_17 [1] : vector<96x64xf32> to vector<96xf32>
    %30 = vector.shape_cast %29 : vector<96xf32> to vector<96x1xf32>
    %cst_18 = arith.constant 6.400000e+01 : f32
    %31 = vector.broadcast %cst_18 : f32 to vector<96x1xf32>
    %32 = arith.divf %30, %31 : vector<96x1xf32>
    %33 = vector.broadcast %25 : vector<96x1xf32> to vector<96x64xf32>
    %34 = arith.subf %8, %33 : vector<96x64xf32>
    %cst_19 = arith.constant 9.99999974E-6 : f32
    %35 = vector.broadcast %cst_19 : f32 to vector<96x1xf32>
    %36 = arith.addf %32, %35 : vector<96x1xf32>
    %37 = math.rsqrt %36 : vector<96x1xf32>
    %38 = vector.broadcast %37 : vector<96x1xf32> to vector<96x64xf32>
    %39 = arith.mulf %34, %38 : vector<96x64xf32>
    %40 = vector.shape_cast %19 : vector<64xf32> to vector<1x64xf32>
    %41 = vector.broadcast %40 : vector<1x64xf32> to vector<96x64xf32>
    %42 = arith.mulf %39, %41 : vector<96x64xf32>
    %43 = vector.shape_cast %21 : vector<64xf32> to vector<1x64xf32>
    %44 = vector.broadcast %43 : vector<1x64xf32> to vector<96x64xf32>
    %45 = arith.addf %42, %44 : vector<96x64xf32>
    %46 = arith.truncf %45 : vector<96x64xf32> to vector<96x64xbf16>
    %c2 = arith.constant 2 : index
    %c0_20 = arith.constant 0 : index
    %47 = vector.load %arg3[%c2, %c0_20] : memref<6x64xf32, #tpu.memory_space<vmem>>, vector<1x64xf32>
    %48 = vector.shape_cast %47 : vector<1x64xf32> to vector<64xf32>
    %c3 = arith.constant 3 : index
    %c0_21 = arith.constant 0 : index
    %49 = vector.load %arg3[%c3, %c0_21] : memref<6x64xf32, #tpu.memory_space<vmem>>, vector<1x64xf32>
    %50 = vector.shape_cast %49 : vector<1x64xf32> to vector<64xf32>
    %cst_22 = arith.constant dense<0.000000e+00> : vector<64xf32>
    %51 = vector.multi_reduction <add>, %17, %cst_22 [1] : vector<64x64xf32> to vector<64xf32>
    %52 = vector.shape_cast %51 : vector<64xf32> to vector<64x1xf32>
    %cst_23 = arith.constant 6.400000e+01 : f32
    %53 = vector.broadcast %cst_23 : f32 to vector<64x1xf32>
    %54 = arith.divf %52, %53 : vector<64x1xf32>
    %55 = vector.broadcast %54 : vector<64x1xf32> to vector<64x64xf32>
    %56 = arith.subf %17, %55 : vector<64x64xf32>
    %57 = arith.mulf %56, %56 : vector<64x64xf32>
    %cst_24 = arith.constant dense<0.000000e+00> : vector<64xf32>
    %58 = vector.multi_reduction <add>, %57, %cst_24 [1] : vector<64x64xf32> to vector<64xf32>
    %59 = vector.shape_cast %58 : vector<64xf32> to vector<64x1xf32>
    %cst_25 = arith.constant 6.400000e+01 : f32
    %60 = vector.broadcast %cst_25 : f32 to vector<64x1xf32>
    %61 = arith.divf %59, %60 : vector<64x1xf32>
    %62 = vector.broadcast %54 : vector<64x1xf32> to vector<64x64xf32>
    %63 = arith.subf %17, %62 : vector<64x64xf32>
    %cst_26 = arith.constant 9.99999974E-6 : f32
    %64 = vector.broadcast %cst_26 : f32 to vector<64x1xf32>
    %65 = arith.addf %61, %64 : vector<64x1xf32>
    %66 = math.rsqrt %65 : vector<64x1xf32>
    %67 = vector.broadcast %66 : vector<64x1xf32> to vector<64x64xf32>
    %68 = arith.mulf %63, %67 : vector<64x64xf32>
    %69 = vector.shape_cast %48 : vector<64xf32> to vector<1x64xf32>
    %70 = vector.broadcast %69 : vector<1x64xf32> to vector<64x64xf32>
    %71 = arith.mulf %68, %70 : vector<64x64xf32>
    %72 = vector.shape_cast %50 : vector<64xf32> to vector<1x64xf32>
    %73 = vector.broadcast %72 : vector<1x64xf32> to vector<64x64xf32>
    %74 = arith.addf %71, %73 : vector<64x64xf32>
    %75 = arith.truncf %74 : vector<64x64xf32> to vector<64x64xbf16>
    %cst_27 = arith.constant 0.000000e+00 : f32
    %76 = vector.broadcast %cst_27 : f32 to vector<64x64xf32>
    %c0_28 = arith.constant 0 : index
    %c0_29 = arith.constant 0 : index
    %c0_30 = arith.constant 0 : index
    %77 = vector.load %arg8[%c0_28, %c0_29, %c0_30] : memref<4x64x16xbf16, #tpu.memory_space<vmem>>, vector<1x64x16xbf16>
    %78 = vector.shape_cast %77 : vector<1x64x16xbf16> to vector<64x16xbf16>
    %cst_31 = arith.constant dense<0.000000e+00> : vector<64x16xf32>
    %79 = tpu.matmul %75, %78, %cst_31 {dimension_numbers = #tpu.dot_dimension_numbers<[1], [0], [0], [1], [0, 0, 1, 1], [], []>} : vector<64x64xbf16>, vector<64x16xbf16>, vector<64x16xf32> -> vector<64x16xf32>
    %c0_32 = arith.constant 0 : index
    %c0_33 = arith.constant 0 : index
    %c0_34 = arith.constant 0 : index
    %80 = vector.load %arg9[%c0_32, %c0_33, %c0_34] : memref<4x64x16xbf16, #tpu.memory_space<vmem>>, vector<1x64x16xbf16>
    %81 = vector.shape_cast %80 : vector<1x64x16xbf16> to vector<64x16xbf16>
    %cst_35 = arith.constant dense<0.000000e+00> : vector<96x16xf32>
    %82 = tpu.matmul %46, %81, %cst_35 {dimension_numbers = #tpu.dot_dimension_numbers<[1], [0], [0], [1], [0, 0, 1, 1], [], []>} : vector<96x64xbf16>, vector<64x16xbf16>, vector<96x16xf32> -> vector<96x16xf32>
    %c0_36 = arith.constant 0 : index
    %c0_37 = arith.constant 0 : index
    %c0_38 = arith.constant 0 : index
    %83 = vector.load %arg10[%c0_36, %c0_37, %c0_38] : memref<4x64x16xbf16, #tpu.memory_space<vmem>>, vector<1x64x16xbf16>
    %84 = vector.shape_cast %83 : vector<1x64x16xbf16> to vector<64x16xbf16>
    %cst_39 = arith.constant dense<0.000000e+00> : vector<96x16xf32>
    %85 = tpu.matmul %46, %84, %cst_39 {dimension_numbers = #tpu.dot_dimension_numbers<[1], [0], [0], [1], [0, 0, 1, 1], [], []>} : vector<96x64xbf16>, vector<64x16xbf16>, vector<96x16xf32> -> vector<96x16xf32>
    %86 = vector.shape_cast %79 : vector<64x16xf32> to vector<2x32x16xf32>
    %87 = arith.truncf %86 : vector<2x32x16xf32> to vector<2x32x16xbf16>
    %88 = vector.shape_cast %82 : vector<96x16xf32> to vector<2x48x16xf32>
    %89 = arith.truncf %88 : vector<2x48x16xf32> to vector<2x48x16xbf16>
    %90 = vector.shape_cast %85 : vector<96x16xf32> to vector<2x48x16xf32>
    %91 = arith.truncf %90 : vector<2x48x16xf32> to vector<2x48x16xbf16>
    "tpu.trace_start"() <{level = 10 : i32, message = "bqd,bkd->bqk"}> : () -> ()
    %cst_40 = arith.constant dense<0.000000e+00> : vector<2x32x48xf32>
    %92 = tpu.matmul %87, %89, %cst_40 {dimension_numbers = #tpu.dot_dimension_numbers<[2], [2], [1], [1], [0, 0, 0, 1, 1, 1], [0], [0]>} : vector<2x32x16xbf16>, vector<2x48x16xbf16>, vector<2x32x48xf32> -> vector<2x32x48xf32>
    "tpu.trace_stop"() : () -> ()
    %cst_41 = arith.constant dense<0xFF800000> : vector<2x32xf32>
    %93 = vector.multi_reduction <maximumf>, %92, %cst_41 [2] : vector<2x32x48xf32> to vector<2x32xf32>
    %94 = vector.shape_cast %93 : vector<2x32xf32> to vector<2x32x1xf32>
    %95 = vector.broadcast %94 : vector<2x32x1xf32> to vector<2x32x48xf32>
    %96 = arith.subf %92, %95 : vector<2x32x48xf32>
    %97 = math.exp %96 : vector<2x32x48xf32>
    %cst_42 = arith.constant dense<0.000000e+00> : vector<2x32xf32>
    %98 = vector.multi_reduction <add>, %97, %cst_42 [2] : vector<2x32x48xf32> to vector<2x32xf32>
    %99 = vector.shape_cast %98 : vector<2x32xf32> to vector<2x32x1xf32>
    %100 = tpu.reciprocal %99 {approx = true} : vector<2x32x1xf32> -> vector<2x32x1xf32>
    %101 = vector.broadcast %100 : vector<2x32x1xf32> to vector<2x32x48xf32>
    %102 = arith.mulf %97, %101 : vector<2x32x48xf32>
    %103 = arith.truncf %102 : vector<2x32x48xf32> to vector<2x32x48xbf16>
    "tpu.trace_start"() <{level = 10 : i32, message = "bqk,bkd->bqd"}> : () -> ()
    %cst_43 = arith.constant dense<0.000000e+00> : vector<2x32x16xf32>
    %104 = tpu.matmul %103, %91, %cst_43 {dimension_numbers = #tpu.dot_dimension_numbers<[2], [1], [1], [2], [0, 0, 0, 1, 1, 2], [0], [0]>} : vector<2x32x48xbf16>, vector<2x48x16xbf16>, vector<2x32x16xf32> -> vector<2x32x16xf32>
    "tpu.trace_stop"() : () -> ()
    %105 = vector.shape_cast %104 : vector<2x32x16xf32> to vector<64x16xf32>
    %106 = arith.truncf %105 : vector<64x16xf32> to vector<64x16xbf16>
    %c0_44 = arith.constant 0 : index
    %c0_45 = arith.constant 0 : index
    %c0_46 = arith.constant 0 : index
    %107 = vector.load %arg11[%c0_44, %c0_45, %c0_46] : memref<4x16x64xbf16, #tpu.memory_space<vmem>>, vector<1x16x64xbf16>
    %108 = vector.shape_cast %107 : vector<1x16x64xbf16> to vector<16x64xbf16>
    %cst_47 = arith.constant dense<0.000000e+00> : vector<64x64xf32>
    %109 = tpu.matmul %106, %108, %cst_47 {dimension_numbers = #tpu.dot_dimension_numbers<[1], [0], [0], [1], [0, 0, 1, 1], [], []>} : vector<64x16xbf16>, vector<16x64xbf16>, vector<64x64xf32> -> vector<64x64xf32>
    %110 = arith.addf %76, %109 : vector<64x64xf32>
    %c1_48 = arith.constant 1 : index
    %c0_49 = arith.constant 0 : index
    %c0_50 = arith.constant 0 : index
    %111 = vector.load %arg8[%c1_48, %c0_49, %c0_50] : memref<4x64x16xbf16, #tpu.memory_space<vmem>>, vector<1x64x16xbf16>
    %112 = vector.shape_cast %111 : vector<1x64x16xbf16> to vector<64x16xbf16>
    %cst_51 = arith.constant dense<0.000000e+00> : vector<64x16xf32>
    %113 = tpu.matmul %75, %112, %cst_51 {dimension_numbers = #tpu.dot_dimension_numbers<[1], [0], [0], [1], [0, 0, 1, 1], [], []>} : vector<64x64xbf16>, vector<64x16xbf16>, vector<64x16xf32> -> vector<64x16xf32>
    %c1_52 = arith.constant 1 : index
    %c0_53 = arith.constant 0 : index
    %c0_54 = arith.constant 0 : index
    %114 = vector.load %arg9[%c1_52, %c0_53, %c0_54] : memref<4x64x16xbf16, #tpu.memory_space<vmem>>, vector<1x64x16xbf16>
    %115 = vector.shape_cast %114 : vector<1x64x16xbf16> to vector<64x16xbf16>
    %cst_55 = arith.constant dense<0.000000e+00> : vector<96x16xf32>
    %116 = tpu.matmul %46, %115, %cst_55 {dimension_numbers = #tpu.dot_dimension_numbers<[1], [0], [0], [1], [0, 0, 1, 1], [], []>} : vector<96x64xbf16>, vector<64x16xbf16>, vector<96x16xf32> -> vector<96x16xf32>
    %c1_56 = arith.constant 1 : index
    %c0_57 = arith.constant 0 : index
    %c0_58 = arith.constant 0 : index
    %117 = vector.load %arg10[%c1_56, %c0_57, %c0_58] : memref<4x64x16xbf16, #tpu.memory_space<vmem>>, vector<1x64x16xbf16>
    %118 = vector.shape_cast %117 : vector<1x64x16xbf16> to vector<64x16xbf16>
    %cst_59 = arith.constant dense<0.000000e+00> : vector<96x16xf32>
    %119 = tpu.matmul %46, %118, %cst_59 {dimension_numbers = #tpu.dot_dimension_numbers<[1], [0], [0], [1], [0, 0, 1, 1], [], []>} : vector<96x64xbf16>, vector<64x16xbf16>, vector<96x16xf32> -> vector<96x16xf32>
    %120 = vector.shape_cast %113 : vector<64x16xf32> to vector<2x32x16xf32>
    %121 = arith.truncf %120 : vector<2x32x16xf32> to vector<2x32x16xbf16>
    %122 = vector.shape_cast %116 : vector<96x16xf32> to vector<2x48x16xf32>
    %123 = arith.truncf %122 : vector<2x48x16xf32> to vector<2x48x16xbf16>
    %124 = vector.shape_cast %119 : vector<96x16xf32> to vector<2x48x16xf32>
    %125 = arith.truncf %124 : vector<2x48x16xf32> to vector<2x48x16xbf16>
    "tpu.trace_start"() <{level = 10 : i32, message = "bqd,bkd->bqk"}> : () -> ()
    %cst_60 = arith.constant dense<0.000000e+00> : vector<2x32x48xf32>
    %126 = tpu.matmul %121, %123, %cst_60 {dimension_numbers = #tpu.dot_dimension_numbers<[2], [2], [1], [1], [0, 0, 0, 1, 1, 1], [0], [0]>} : vector<2x32x16xbf16>, vector<2x48x16xbf16>, vector<2x32x48xf32> -> vector<2x32x48xf32>
    "tpu.trace_stop"() : () -> ()
    %cst_61 = arith.constant dense<0xFF800000> : vector<2x32xf32>
    %127 = vector.multi_reduction <maximumf>, %126, %cst_61 [2] : vector<2x32x48xf32> to vector<2x32xf32>
    %128 = vector.shape_cast %127 : vector<2x32xf32> to vector<2x32x1xf32>
    %129 = vector.broadcast %128 : vector<2x32x1xf32> to vector<2x32x48xf32>
    %130 = arith.subf %126, %129 : vector<2x32x48xf32>
    %131 = math.exp %130 : vector<2x32x48xf32>
    %cst_62 = arith.constant dense<0.000000e+00> : vector<2x32xf32>
    %132 = vector.multi_reduction <add>, %131, %cst_62 [2] : vector<2x32x48xf32> to vector<2x32xf32>
    %133 = vector.shape_cast %132 : vector<2x32xf32> to vector<2x32x1xf32>
    %134 = tpu.reciprocal %133 {approx = true} : vector<2x32x1xf32> -> vector<2x32x1xf32>
    %135 = vector.broadcast %134 : vector<2x32x1xf32> to vector<2x32x48xf32>
    %136 = arith.mulf %131, %135 : vector<2x32x48xf32>
    %137 = arith.truncf %136 : vector<2x32x48xf32> to vector<2x32x48xbf16>
    "tpu.trace_start"() <{level = 10 : i32, message = "bqk,bkd->bqd"}> : () -> ()
    %cst_63 = arith.constant dense<0.000000e+00> : vector<2x32x16xf32>
    %138 = tpu.matmul %137, %125, %cst_63 {dimension_numbers = #tpu.dot_dimension_numbers<[2], [1], [1], [2], [0, 0, 0, 1, 1, 2], [0], [0]>} : vector<2x32x48xbf16>, vector<2x48x16xbf16>, vector<2x32x16xf32> -> vector<2x32x16xf32>
    "tpu.trace_stop"() : () -> ()
    %139 = vector.shape_cast %138 : vector<2x32x16xf32> to vector<64x16xf32>
    %140 = arith.truncf %139 : vector<64x16xf32> to vector<64x16xbf16>
    %c1_64 = arith.constant 1 : index
    %c0_65 = arith.constant 0 : index
    %c0_66 = arith.constant 0 : index
    %141 = vector.load %arg11[%c1_64, %c0_65, %c0_66] : memref<4x16x64xbf16, #tpu.memory_space<vmem>>, vector<1x16x64xbf16>
    %142 = vector.shape_cast %141 : vector<1x16x64xbf16> to vector<16x64xbf16>
    %cst_67 = arith.constant dense<0.000000e+00> : vector<64x64xf32>
    %143 = tpu.matmul %140, %142, %cst_67 {dimension_numbers = #tpu.dot_dimension_numbers<[1], [0], [0], [1], [0, 0, 1, 1], [], []>} : vector<64x16xbf16>, vector<16x64xbf16>, vector<64x64xf32> -> vector<64x64xf32>
    %144 = arith.addf %110, %143 : vector<64x64xf32>
    %c2_68 = arith.constant 2 : index
    %c0_69 = arith.constant 0 : index
    %c0_70 = arith.constant 0 : index
    %145 = vector.load %arg8[%c2_68, %c0_69, %c0_70] : memref<4x64x16xbf16, #tpu.memory_space<vmem>>, vector<1x64x16xbf16>
    %146 = vector.shape_cast %145 : vector<1x64x16xbf16> to vector<64x16xbf16>
    %cst_71 = arith.constant dense<0.000000e+00> : vector<64x16xf32>
    %147 = tpu.matmul %75, %146, %cst_71 {dimension_numbers = #tpu.dot_dimension_numbers<[1], [0], [0], [1], [0, 0, 1, 1], [], []>} : vector<64x64xbf16>, vector<64x16xbf16>, vector<64x16xf32> -> vector<64x16xf32>
    %c2_72 = arith.constant 2 : index
    %c0_73 = arith.constant 0 : index
    %c0_74 = arith.constant 0 : index
    %148 = vector.load %arg9[%c2_72, %c0_73, %c0_74] : memref<4x64x16xbf16, #tpu.memory_space<vmem>>, vector<1x64x16xbf16>
    %149 = vector.shape_cast %148 : vector<1x64x16xbf16> to vector<64x16xbf16>
    %cst_75 = arith.constant dense<0.000000e+00> : vector<96x16xf32>
    %150 = tpu.matmul %46, %149, %cst_75 {dimension_numbers = #tpu.dot_dimension_numbers<[1], [0], [0], [1], [0, 0, 1, 1], [], []>} : vector<96x64xbf16>, vector<64x16xbf16>, vector<96x16xf32> -> vector<96x16xf32>
    %c2_76 = arith.constant 2 : index
    %c0_77 = arith.constant 0 : index
    %c0_78 = arith.constant 0 : index
    %151 = vector.load %arg10[%c2_76, %c0_77, %c0_78] : memref<4x64x16xbf16, #tpu.memory_space<vmem>>, vector<1x64x16xbf16>
    %152 = vector.shape_cast %151 : vector<1x64x16xbf16> to vector<64x16xbf16>
    %cst_79 = arith.constant dense<0.000000e+00> : vector<96x16xf32>
    %153 = tpu.matmul %46, %152, %cst_79 {dimension_numbers = #tpu.dot_dimension_numbers<[1], [0], [0], [1], [0, 0, 1, 1], [], []>} : vector<96x64xbf16>, vector<64x16xbf16>, vector<96x16xf32> -> vector<96x16xf32>
    %154 = vector.shape_cast %147 : vector<64x16xf32> to vector<2x32x16xf32>
    %155 = arith.truncf %154 : vector<2x32x16xf32> to vector<2x32x16xbf16>
    %156 = vector.shape_cast %150 : vector<96x16xf32> to vector<2x48x16xf32>
    %157 = arith.truncf %156 : vector<2x48x16xf32> to vector<2x48x16xbf16>
    %158 = vector.shape_cast %153 : vector<96x16xf32> to vector<2x48x16xf32>
    %159 = arith.truncf %158 : vector<2x48x16xf32> to vector<2x48x16xbf16>
    "tpu.trace_start"() <{level = 10 : i32, message = "bqd,bkd->bqk"}> : () -> ()
    %cst_80 = arith.constant dense<0.000000e+00> : vector<2x32x48xf32>
    %160 = tpu.matmul %155, %157, %cst_80 {dimension_numbers = #tpu.dot_dimension_numbers<[2], [2], [1], [1], [0, 0, 0, 1, 1, 1], [0], [0]>} : vector<2x32x16xbf16>, vector<2x48x16xbf16>, vector<2x32x48xf32> -> vector<2x32x48xf32>
    "tpu.trace_stop"() : () -> ()
    %cst_81 = arith.constant dense<0xFF800000> : vector<2x32xf32>
    %161 = vector.multi_reduction <maximumf>, %160, %cst_81 [2] : vector<2x32x48xf32> to vector<2x32xf32>
    %162 = vector.shape_cast %161 : vector<2x32xf32> to vector<2x32x1xf32>
    %163 = vector.broadcast %162 : vector<2x32x1xf32> to vector<2x32x48xf32>
    %164 = arith.subf %160, %163 : vector<2x32x48xf32>
    %165 = math.exp %164 : vector<2x32x48xf32>
    %cst_82 = arith.constant dense<0.000000e+00> : vector<2x32xf32>
    %166 = vector.multi_reduction <add>, %165, %cst_82 [2] : vector<2x32x48xf32> to vector<2x32xf32>
    %167 = vector.shape_cast %166 : vector<2x32xf32> to vector<2x32x1xf32>
    %168 = tpu.reciprocal %167 {approx = true} : vector<2x32x1xf32> -> vector<2x32x1xf32>
    %169 = vector.broadcast %168 : vector<2x32x1xf32> to vector<2x32x48xf32>
    %170 = arith.mulf %165, %169 : vector<2x32x48xf32>
    %171 = arith.truncf %170 : vector<2x32x48xf32> to vector<2x32x48xbf16>
    "tpu.trace_start"() <{level = 10 : i32, message = "bqk,bkd->bqd"}> : () -> ()
    %cst_83 = arith.constant dense<0.000000e+00> : vector<2x32x16xf32>
    %172 = tpu.matmul %171, %159, %cst_83 {dimension_numbers = #tpu.dot_dimension_numbers<[2], [1], [1], [2], [0, 0, 0, 1, 1, 2], [0], [0]>} : vector<2x32x48xbf16>, vector<2x48x16xbf16>, vector<2x32x16xf32> -> vector<2x32x16xf32>
    "tpu.trace_stop"() : () -> ()
    %173 = vector.shape_cast %172 : vector<2x32x16xf32> to vector<64x16xf32>
    %174 = arith.truncf %173 : vector<64x16xf32> to vector<64x16xbf16>
    %c2_84 = arith.constant 2 : index
    %c0_85 = arith.constant 0 : index
    %c0_86 = arith.constant 0 : index
    %175 = vector.load %arg11[%c2_84, %c0_85, %c0_86] : memref<4x16x64xbf16, #tpu.memory_space<vmem>>, vector<1x16x64xbf16>
    %176 = vector.shape_cast %175 : vector<1x16x64xbf16> to vector<16x64xbf16>
    %cst_87 = arith.constant dense<0.000000e+00> : vector<64x64xf32>
    %177 = tpu.matmul %174, %176, %cst_87 {dimension_numbers = #tpu.dot_dimension_numbers<[1], [0], [0], [1], [0, 0, 1, 1], [], []>} : vector<64x16xbf16>, vector<16x64xbf16>, vector<64x64xf32> -> vector<64x64xf32>
    %178 = arith.addf %144, %177 : vector<64x64xf32>
    %c3_88 = arith.constant 3 : index
    %c0_89 = arith.constant 0 : index
    %c0_90 = arith.constant 0 : index
    %179 = vector.load %arg8[%c3_88, %c0_89, %c0_90] : memref<4x64x16xbf16, #tpu.memory_space<vmem>>, vector<1x64x16xbf16>
    %180 = vector.shape_cast %179 : vector<1x64x16xbf16> to vector<64x16xbf16>
    %cst_91 = arith.constant dense<0.000000e+00> : vector<64x16xf32>
    %181 = tpu.matmul %75, %180, %cst_91 {dimension_numbers = #tpu.dot_dimension_numbers<[1], [0], [0], [1], [0, 0, 1, 1], [], []>} : vector<64x64xbf16>, vector<64x16xbf16>, vector<64x16xf32> -> vector<64x16xf32>
    %c3_92 = arith.constant 3 : index
    %c0_93 = arith.constant 0 : index
    %c0_94 = arith.constant 0 : index
    %182 = vector.load %arg9[%c3_92, %c0_93, %c0_94] : memref<4x64x16xbf16, #tpu.memory_space<vmem>>, vector<1x64x16xbf16>
    %183 = vector.shape_cast %182 : vector<1x64x16xbf16> to vector<64x16xbf16>
    %cst_95 = arith.constant dense<0.000000e+00> : vector<96x16xf32>
    %184 = tpu.matmul %46, %183, %cst_95 {dimension_numbers = #tpu.dot_dimension_numbers<[1], [0], [0], [1], [0, 0, 1, 1], [], []>} : vector<96x64xbf16>, vector<64x16xbf16>, vector<96x16xf32> -> vector<96x16xf32>
    %c3_96 = arith.constant 3 : index
    %c0_97 = arith.constant 0 : index
    %c0_98 = arith.constant 0 : index
    %185 = vector.load %arg10[%c3_96, %c0_97, %c0_98] : memref<4x64x16xbf16, #tpu.memory_space<vmem>>, vector<1x64x16xbf16>
    %186 = vector.shape_cast %185 : vector<1x64x16xbf16> to vector<64x16xbf16>
    %cst_99 = arith.constant dense<0.000000e+00> : vector<96x16xf32>
    %187 = tpu.matmul %46, %186, %cst_99 {dimension_numbers = #tpu.dot_dimension_numbers<[1], [0], [0], [1], [0, 0, 1, 1], [], []>} : vector<96x64xbf16>, vector<64x16xbf16>, vector<96x16xf32> -> vector<96x16xf32>
    %188 = vector.shape_cast %181 : vector<64x16xf32> to vector<2x32x16xf32>
    %189 = arith.truncf %188 : vector<2x32x16xf32> to vector<2x32x16xbf16>
    %190 = vector.shape_cast %184 : vector<96x16xf32> to vector<2x48x16xf32>
    %191 = arith.truncf %190 : vector<2x48x16xf32> to vector<2x48x16xbf16>
    %192 = vector.shape_cast %187 : vector<96x16xf32> to vector<2x48x16xf32>
    %193 = arith.truncf %192 : vector<2x48x16xf32> to vector<2x48x16xbf16>
    "tpu.trace_start"() <{level = 10 : i32, message = "bqd,bkd->bqk"}> : () -> ()
    %cst_100 = arith.constant dense<0.000000e+00> : vector<2x32x48xf32>
    %194 = tpu.matmul %189, %191, %cst_100 {dimension_numbers = #tpu.dot_dimension_numbers<[2], [2], [1], [1], [0, 0, 0, 1, 1, 1], [0], [0]>} : vector<2x32x16xbf16>, vector<2x48x16xbf16>, vector<2x32x48xf32> -> vector<2x32x48xf32>
    "tpu.trace_stop"() : () -> ()
    %cst_101 = arith.constant dense<0xFF800000> : vector<2x32xf32>
    %195 = vector.multi_reduction <maximumf>, %194, %cst_101 [2] : vector<2x32x48xf32> to vector<2x32xf32>
    %196 = vector.shape_cast %195 : vector<2x32xf32> to vector<2x32x1xf32>
    %197 = vector.broadcast %196 : vector<2x32x1xf32> to vector<2x32x48xf32>
    %198 = arith.subf %194, %197 : vector<2x32x48xf32>
    %199 = math.exp %198 : vector<2x32x48xf32>
    %cst_102 = arith.constant dense<0.000000e+00> : vector<2x32xf32>
    %200 = vector.multi_reduction <add>, %199, %cst_102 [2] : vector<2x32x48xf32> to vector<2x32xf32>
    %201 = vector.shape_cast %200 : vector<2x32xf32> to vector<2x32x1xf32>
    %202 = tpu.reciprocal %201 {approx = true} : vector<2x32x1xf32> -> vector<2x32x1xf32>
    %203 = vector.broadcast %202 : vector<2x32x1xf32> to vector<2x32x48xf32>
    %204 = arith.mulf %199, %203 : vector<2x32x48xf32>
    %205 = arith.truncf %204 : vector<2x32x48xf32> to vector<2x32x48xbf16>
    "tpu.trace_start"() <{level = 10 : i32, message = "bqk,bkd->bqd"}> : () -> ()
    %cst_103 = arith.constant dense<0.000000e+00> : vector<2x32x16xf32>
    %206 = tpu.matmul %205, %193, %cst_103 {dimension_numbers = #tpu.dot_dimension_numbers<[2], [1], [1], [2], [0, 0, 0, 1, 1, 2], [0], [0]>} : vector<2x32x48xbf16>, vector<2x48x16xbf16>, vector<2x32x16xf32> -> vector<2x32x16xf32>
    "tpu.trace_stop"() : () -> ()
    %207 = vector.shape_cast %206 : vector<2x32x16xf32> to vector<64x16xf32>
    %208 = arith.truncf %207 : vector<64x16xf32> to vector<64x16xbf16>
    %c3_104 = arith.constant 3 : index
    %c0_105 = arith.constant 0 : index
    %c0_106 = arith.constant 0 : index
    %209 = vector.load %arg11[%c3_104, %c0_105, %c0_106] : memref<4x16x64xbf16, #tpu.memory_space<vmem>>, vector<1x16x64xbf16>
    %210 = vector.shape_cast %209 : vector<1x16x64xbf16> to vector<16x64xbf16>
    %cst_107 = arith.constant dense<0.000000e+00> : vector<64x64xf32>
    %211 = tpu.matmul %208, %210, %cst_107 {dimension_numbers = #tpu.dot_dimension_numbers<[1], [0], [0], [1], [0, 0, 1, 1], [], []>} : vector<64x16xbf16>, vector<16x64xbf16>, vector<64x64xf32> -> vector<64x64xf32>
    %212 = arith.addf %178, %211 : vector<64x64xf32>
    %213 = arith.addf %17, %212 : vector<64x64xf32>
    %c2_108 = arith.constant 2 : index
    %c0_109 = arith.constant 0 : index
    %214 = vector.load %arg4[%c2_108, %c0_109] : memref<4x64xf32, #tpu.memory_space<vmem>>, vector<1x64xf32>
    %215 = vector.shape_cast %214 : vector<1x64xf32> to vector<64xf32>
    %216 = vector.shape_cast %215 : vector<64xf32> to vector<1x64xf32>
    %217 = vector.broadcast %216 : vector<1x64xf32> to vector<64x64xf32>
    %218 = arith.addf %213, %217 : vector<64x64xf32>
    %c4 = arith.constant 4 : index
    %c0_110 = arith.constant 0 : index
    %219 = vector.load %arg3[%c4, %c0_110] : memref<6x64xf32, #tpu.memory_space<vmem>>, vector<1x64xf32>
    %220 = vector.shape_cast %219 : vector<1x64xf32> to vector<64xf32>
    %c5 = arith.constant 5 : index
    %c0_111 = arith.constant 0 : index
    %221 = vector.load %arg3[%c5, %c0_111] : memref<6x64xf32, #tpu.memory_space<vmem>>, vector<1x64xf32>
    %222 = vector.shape_cast %221 : vector<1x64xf32> to vector<64xf32>
    %cst_112 = arith.constant dense<0.000000e+00> : vector<64xf32>
    %223 = vector.multi_reduction <add>, %218, %cst_112 [1] : vector<64x64xf32> to vector<64xf32>
    %224 = vector.shape_cast %223 : vector<64xf32> to vector<64x1xf32>
    %cst_113 = arith.constant 6.400000e+01 : f32
    %225 = vector.broadcast %cst_113 : f32 to vector<64x1xf32>
    %226 = arith.divf %224, %225 : vector<64x1xf32>
    %227 = vector.broadcast %226 : vector<64x1xf32> to vector<64x64xf32>
    %228 = arith.subf %218, %227 : vector<64x64xf32>
    %229 = arith.mulf %228, %228 : vector<64x64xf32>
    %cst_114 = arith.constant dense<0.000000e+00> : vector<64xf32>
    %230 = vector.multi_reduction <add>, %229, %cst_114 [1] : vector<64x64xf32> to vector<64xf32>
    %231 = vector.shape_cast %230 : vector<64xf32> to vector<64x1xf32>
    %cst_115 = arith.constant 6.400000e+01 : f32
    %232 = vector.broadcast %cst_115 : f32 to vector<64x1xf32>
    %233 = arith.divf %231, %232 : vector<64x1xf32>
    %234 = vector.broadcast %226 : vector<64x1xf32> to vector<64x64xf32>
    %235 = arith.subf %218, %234 : vector<64x64xf32>
    %cst_116 = arith.constant 9.99999974E-6 : f32
    %236 = vector.broadcast %cst_116 : f32 to vector<64x1xf32>
    %237 = arith.addf %233, %236 : vector<64x1xf32>
    %238 = math.rsqrt %237 : vector<64x1xf32>
    %239 = vector.broadcast %238 : vector<64x1xf32> to vector<64x64xf32>
    %240 = arith.mulf %235, %239 : vector<64x64xf32>
    %241 = vector.shape_cast %220 : vector<64xf32> to vector<1x64xf32>
    %242 = vector.broadcast %241 : vector<1x64xf32> to vector<64x64xf32>
    %243 = arith.mulf %240, %242 : vector<64x64xf32>
    %244 = vector.shape_cast %222 : vector<64xf32> to vector<1x64xf32>
    %245 = vector.broadcast %244 : vector<1x64xf32> to vector<64x64xf32>
    %246 = arith.addf %243, %245 : vector<64x64xf32>
    %247 = arith.truncf %246 : vector<64x64xf32> to vector<64x64xbf16>
    %c0_117 = arith.constant 0 : index
    %c0_118 = arith.constant 0 : index
    %248 = vector.load %arg12[%c0_117, %c0_118] : memref<64x256xbf16, #tpu.memory_space<vmem>>, vector<64x256xbf16>
    %cst_119 = arith.constant dense<0.000000e+00> : vector<64x256xf32>
    %249 = tpu.matmul %247, %248, %cst_119 {dimension_numbers = #tpu.dot_dimension_numbers<[1], [0], [0], [1], [0, 0, 1, 1], [], []>} : vector<64x64xbf16>, vector<64x256xbf16>, vector<64x256xf32> -> vector<64x256xf32>
    %c0_120 = arith.constant 0 : index
    %c0_121 = arith.constant 0 : index
    %250 = vector.load %arg5[%c0_120, %c0_121] : memref<1x256xf32, #tpu.memory_space<vmem>>, vector<1x256xf32>
    %251 = vector.shape_cast %250 : vector<1x256xf32> to vector<256xf32>
    %252 = vector.shape_cast %251 : vector<256xf32> to vector<1x256xf32>
    %253 = vector.broadcast %252 : vector<1x256xf32> to vector<64x256xf32>
    %254 = arith.addf %249, %253 : vector<64x256xf32>
    %255 = arith.mulf %254, %254 : vector<64x256xf32>
    %256 = arith.mulf %254, %255 : vector<64x256xf32>
    %cst_122 = arith.constant 4.471500e-02 : f32
    %257 = vector.broadcast %cst_122 : f32 to vector<64x256xf32>
    %258 = arith.mulf %257, %256 : vector<64x256xf32>
    %259 = arith.addf %254, %258 : vector<64x256xf32>
    %cst_123 = arith.constant 0.797884583 : f32
    %260 = vector.broadcast %cst_123 : f32 to vector<64x256xf32>
    %261 = arith.mulf %260, %259 : vector<64x256xf32>
    %262 = math.tanh %261 : vector<64x256xf32>
    %cst_124 = arith.constant 1.000000e+00 : f32
    %263 = vector.broadcast %cst_124 : f32 to vector<64x256xf32>
    %264 = arith.addf %263, %262 : vector<64x256xf32>
    %cst_125 = arith.constant 5.000000e-01 : f32
    %265 = vector.broadcast %cst_125 : f32 to vector<64x256xf32>
    %266 = arith.mulf %265, %264 : vector<64x256xf32>
    %267 = arith.mulf %254, %266 : vector<64x256xf32>
    %268 = arith.truncf %267 : vector<64x256xf32> to vector<64x256xbf16>
    %c0_126 = arith.constant 0 : index
    %c0_127 = arith.constant 0 : index
    %269 = vector.load %arg13[%c0_126, %c0_127] : memref<256x64xbf16, #tpu.memory_space<vmem>>, vector<256x64xbf16>
    %cst_128 = arith.constant dense<0.000000e+00> : vector<64x64xf32>
    %270 = tpu.matmul %268, %269, %cst_128 {dimension_numbers = #tpu.dot_dimension_numbers<[1], [0], [0], [1], [0, 0, 1, 1], [], []>} : vector<64x256xbf16>, vector<256x64xbf16>, vector<64x64xf32> -> vector<64x64xf32>
    %c3_129 = arith.constant 3 : index
    %c0_130 = arith.constant 0 : index
    %271 = vector.load %arg4[%c3_129, %c0_130] : memref<4x64xf32, #tpu.memory_space<vmem>>, vector<1x64xf32>
    %272 = vector.shape_cast %271 : vector<1x64xf32> to vector<64xf32>
    %273 = vector.shape_cast %272 : vector<64xf32> to vector<1x64xf32>
    %274 = vector.broadcast %273 : vector<1x64xf32> to vector<64x64xf32>
    %275 = arith.addf %270, %274 : vector<64x64xf32>
    %276 = arith.addf %218, %275 : vector<64x64xf32>
    %c0_131 = arith.constant 0 : index
    %c0_132 = arith.constant 0 : index
    %277 = vector.load %arg14[%c0_131, %c0_132] : memref<64x64xf32, #tpu.memory_space<vmem>>, vector<64x64xf32>
    tpu.vector_store %arg14[%c0_131, %c0_132], %276 {strides = array<i32>} : memref<64x64xf32, #tpu.memory_space<vmem>>, vector<64x64xf32>,
    return
  }
  func.func @transform_0(%arg0: i32) -> (i32, i32) {
    %c0_i32 = arith.constant 0 : i32
    %c0_i32_0 = arith.constant 0 : i32
    return %arg0, %c0_i32 : i32, i32
  }
  func.func @transform_1(%arg0: i32) -> (i32, i32) {
    %c0_i32 = arith.constant 0 : i32
    %c0_i32_0 = arith.constant 0 : i32
    return %arg0, %c0_i32 : i32, i32
  }
  func.func @transform_2(%arg0: i32) -> (i32, i32) {
    %c0_i32 = arith.constant 0 : i32
    %c0_i32_0 = arith.constant 0 : i32
    %c0_i32_1 = arith.constant 0 : i32
    return %c0_i32, %c0_i32_0 : i32, i32
  }
  func.func @transform_3(%arg0: i32) -> (i32, i32) {
    %c0_i32 = arith.constant 0 : i32
    %c0_i32_0 = arith.constant 0 : i32
    %c0_i32_1 = arith.constant 0 : i32
    return %c0_i32, %c0_i32_0 : i32, i32
  }
  func.func @transform_4(%arg0: i32) -> (i32, i32) {
    %c0_i32 = arith.constant 0 : i32
    %c0_i32_0 = arith.constant 0 : i32
    %c0_i32_1 = arith.constant 0 : i32
    return %c0_i32, %c0_i32_0 : i32, i32
  }
  func.func @transform_5(%arg0: i32) -> (i32, i32) {
    %c0_i32 = arith.constant 0 : i32
    %c0_i32_0 = arith.constant 0 : i32
    %c0_i32_1 = arith.constant 0 : i32
    return %c0_i32, %c0_i32_0 : i32, i32
  }
  func.func @transform_6(%arg0: i32) -> (i32, i32) {
    %c0_i32 = arith.constant 0 : i32
    %c0_i32_0 = arith.constant 0 : i32
    %c0_i32_1 = arith.constant 0 : i32
    return %c0_i32, %c0_i32_0 : i32, i32
  }
  func.func @transform_7(%arg0: i32) -> (i32, i32, i32) {
    %c0_i32 = arith.constant 0 : i32
    %c0_i32_0 = arith.constant 0 : i32
    %c0_i32_1 = arith.constant 0 : i32
    %c0_i32_2 = arith.constant 0 : i32
    return %c0_i32, %c0_i32_0, %c0_i32_1 : i32, i32, i32
  }
  func.func @transform_8(%arg0: i32) -> (i32, i32, i32) {
    %c0_i32 = arith.constant 0 : i32
    %c0_i32_0 = arith.constant 0 : i32
    %c0_i32_1 = arith.constant 0 : i32
    %c0_i32_2 = arith.constant 0 : i32
    return %c0_i32, %c0_i32_0, %c0_i32_1 : i32, i32, i32
  }
  func.func @transform_9(%arg0: i32) -> (i32, i32, i32) {
    %c0_i32 = arith.constant 0 : i32
    %c0_i32_0 = arith.constant 0 : i32
    %c0_i32_1 = arith.constant 0 : i32
    %c0_i32_2 = arith.constant 0 : i32
    return %c0_i32, %c0_i32_0, %c0_i32_1 : i32, i32, i32
  }
  func.func @transform_10(%arg0: i32) -> (i32, i32, i32) {
    %c0_i32 = arith.constant 0 : i32
    %c0_i32_0 = arith.constant 0 : i32
    %c0_i32_1 = arith.constant 0 : i32
    %c0_i32_2 = arith.constant 0 : i32
    return %c0_i32, %c0_i32_0, %c0_i32_1 : i32, i32, i32
  }
  func.func @transform_11(%arg0: i32) -> (i32, i32) {
    %c0_i32 = arith.constant 0 : i32
    %c0_i32_0 = arith.constant 0 : i32
    %c0_i32_1 = arith.constant 0 : i32
    return %c0_i32, %c0_i32_0 : i32, i32
  }
  func.func @transform_12(%arg0: i32) -> (i32, i32) {
    %c0_i32 = arith.constant 0 : i32
    %c0_i32_0 = arith.constant 0 : i32
    %c0_i32_1 = arith.constant 0 : i32
    return %c0_i32, %c0_i32_0 : i32, i32
  }
  func.func @transform_13(%arg0: i32) -> (i32, i32) {
    %c0_i32 = arith.constant 0 : i32
    %c0_i32_0 = arith.constant 0 : i32
    return %arg0, %c0_i32 : i32, i32
  }
}

</mosaic_0001>

<bundles_post_ra>
// kernel: tpu_custom_call.1
= control target key start
LH: loop header
LB: loop body
LE: loop exit
PB: predicated region body
PF: predicated region fallthrough
CT: control target
= control target key end

     0   :  { %vm92_vm0 = vcmask 1044480   ;;  %vm163_vm1 = vcmask 1042432   ;;  %vm73_vm2 = vcmask 80896   ;;  %vm150_vm3 = vcmask 48128   ;;  %s6358_s0 = inlined_call_operand.vmem [shape: f32[96,10], index: 0, kind: input, shape index: {}]   ;;  %s6359_s1 = inlined_call_operand.vmem [shape: f32[64,6], index: 1, kind: input, shape index: {}]   ;;  %s6360_s2 = inlined_call_operand.vmem [shape: f32[6,64], index: 2, kind: input, shape index: {}]   ;;  %s6361_s3 = inlined_call_operand.vmem [shape: f32[4,64], index: 3, kind: input, shape index: {}]   ;;  %s6362_s4 = inlined_call_operand.vmem [shape: f32[1,256], index: 4, kind: input, shape index: {}]   ;;  %s6363_s5 = inlined_call_operand.vmem [shape: bf16[10,64], index: 5, kind: input, shape index: {}]   ;;  %s6364_s6 = inlined_call_operand.vmem [shape: bf16[6,64], index: 6, kind: input, shape index: {}]   ;;  %s6365_s7 = inlined_call_operand.vmem [shape: bf16[4,64,16], index: 7, kind: input, shape index: {}]   ;;  %s6366_s8 = inlined_call_operand.vmem [shape: bf16[4,64,16], index: 8, kind: input, shape index: {}]   ;;  %s6367_s9 = inlined_call_operand.vmem [shape: bf16[4,64,16], index: 9, kind: input, shape index: {}]   ;;  %s6368_s10 = inlined_call_operand.vmem [shape: bf16[4,16,64], index: 10, kind: input, shape index: {}]   ;;  %s6369_s11 = inlined_call_operand.vmem [shape: bf16[64,256], index: 11, kind: input, shape index: {}]   ;;  %s6370_s12 = inlined_call_operand.vmem [shape: bf16[256,64], index: 12, kind: input, shape index: {}]   ;;  %s6371_s13 = inlined_call_operand.hbm [shape: f32[64,64], index: 13, kind: output, shape index: {}]  }
   0x1   :  { %v3912_v0 = vld [vmem:[%s6363_s5] sm:$0xf]  ;;  %v4426_v1 = vld [vmem:[%s6363_s5] sm:$0x10]  ;;  %v47_v4 = vld [vmem:[%s6358_s0 + $0x8] sm:$0xff] }
   0x2   :  { %v46_v2 = vld [vmem:[%s6358_s0] sm:$0xff]  ;;  %v3913_v3 = vor.u32 %v4426_v1, %v3912_v0  ;;  %v136_v10 = vld [vmem:[%s6359_s1 + $0x8] sm:$0xff] }
   0x3   :  { %v147_v5 = vld [vmem:[%s6364_s6] sm:$0x7]  ;;  %v58_v7 = vpack.c.bf16 %v47_v4, %v46_v2 }
   0x4   :  { %v94_v6 = vsel %vm92_vm0, %v3913_v3, 0  ;;  %v165_v8 = vsel %vm163_vm1, %v147_v5, 0  ;;  %v135_v9 = vld [vmem:[%s6359_s1] sm:$0xff] }
   0x5   :  { %103 = vmatpush.bf16.msra.mxu0 %v94_v6  ;;  %174 = vmatpush.bf16.msra.mxu1 %v165_v8  ;;  %v143_v11 = vpack.c.bf16 %v136_v10, %v135_v9 }
   0x8   :  { %3914 = vmatmul.msk.bf16.vlgmr.msra.gmra.mxu0 %vm73_vm2, %v58_v7  ;;  %3920 = vmatmul.msk.bf16.vlgmr.msra.gmra.mxu1 %vm150_vm3, %v143_v11 }
   0x9   :  { %18 = vsyncpa [#allocation3], 0  ;;  %v48_v12 = vld [vmem:[%s6358_s0 + $0x10] sm:$0xff]  ;;  %v49_v13 = vld [vmem:[%s6358_s0 + $0x18] sm:$0xff]  ;;  %vm198_vm4 = vcmask 523264   ;;  %v4768_v56 = vmov 64.0  }
   0xa   :  { %v137_v14 = vld [vmem:[%s6359_s1 + $0x10] sm:$0xff]  ;;  %v138_v15 = vld [vmem:[%s6359_s1 + $0x18] sm:$0xff]  ;;  %v59_v16 = vpack.c.bf16 %v49_v13, %v48_v12  ;;  %v50_v18 = vld [vmem:[%s6358_s0 + $0x20] sm:$0xff]  ;;  %4524 = vrcp.f32 %v4768_v56  ;;  %s4770_s18 = smov 128   ;;  %s4771_s19 = smov 8  }
   0xb   :  { %v144_v17 = vpack.c.bf16 %v138_v15, %v137_v14  ;;  %v51_v19 = vld [vmem:[%s6358_s0 + $0x28] sm:$0xff]  ;;  %v4889_v21 = vld [vmem:[%s6361_s3] ss:$0 sm:$0xff]  ;;  %v141_v34 = vld [vmem:[%s6359_s1 + $0x30] sm:$0xff] }
   0xc   :  { %v60_v20 = vpack.c.bf16 %v51_v19, %v50_v18  ;;  %v139_v25 = vld [vmem:[%s6359_s1 + $0x20] sm:$0xff]  ;;  %v140_v26 = vld [vmem:[%s6359_s1 + $0x28] sm:$0xff]  ;;  %v142_v35 = vld [vmem:[%s6359_s1 + $0x38] sm:$0xff] }
   0xd   :  { %v145_v27 = vpack.c.bf16 %v140_v26, %v139_v25  ;;  %v146_v36 = vpack.c.bf16 %v142_v35, %v141_v34  ;;  %v4921_v39 = vld [vmem:[%s6361_s3 + $0x1] ss:$0 sm:$0xff]  ;;  %v52_v60 = vld [vmem:[%s6358_s0 + $0x30] sm:$0xff]  ;;  %v53_v61 = vld [vmem:[%s6358_s0 + $0x38] sm:$0xff] }
   0xe   :  { %v61_v63 = vpack.c.bf16 %v53_v61, %v52_v60  ;;  %v54_v8 = vld [vmem:[%s6358_s0 + $0x40] sm:$0xff]  ;;  %v55_v9 = vld [vmem:[%s6358_s0 + $0x48] sm:$0xff]  ;;  %v56_v34 = vld [vmem:[%s6358_s0 + $0x50] sm:$0xff] }
   0xf   :  { %v62_v12 = vpack.c.bf16 %v55_v9, %v54_v8  ;;  %v57_v35 = vld [vmem:[%s6358_s0 + $0x58] sm:$0xff] }
  0x10   :  { %v4525_v57 = vpop.eup %4524  ;;  %v4434_v9 = vld [vmem:[%s6366_s8 + $0x18] sm:$0xff] }
  0x11   :  { %v236_v58 = vmul.f32 64.0, %v4525_v57  ;;  %vm240_vm5 = vweird.f32 %v4525_v57  ;;  %4503 = vmatpush.bf16.msra.mxu3 %v4434_v9  ;;  %829 = vmatpush.bf16.msrb.mxu0 %v4434_v9 }
  0x13   :  { %v237_v59 = vsub.f32 1.0, %v236_v58 }
  0x15   :  { %v238_v62 = vmul.f32 %v4525_v57, %v237_v59 }
  0x17   :  { %v239_v0 = vadd.f32 %v4525_v57, %v238_v62 }
  0x18   :  { %3915 = vmatmul.msk.bf16.gmra.mxu0 %vm73_vm2, %v59_v16  ;;  %3921 = vmatmul.msk.bf16.gmra.mxu1 %vm150_vm3, %v144_v17 }
  0x19   :  { %v4953_v1 = vsel %vm240_vm5, %v4525_v57, %v239_v0 }
  0x28   :  { %3916 = vmatmul.msk.bf16.gmra.mxu0 %vm73_vm2, %v60_v20  ;;  %3922 = vmatmul.msk.bf16.gmra.mxu1 %vm150_vm3, %v145_v27 }
  0x38   :  { %3923 = vmatmul.msk.bf16.gmra.mxu1 %vm150_vm3, %v146_v36  ;;  %3917 = vmatmul.msk.bf16.gmra.mxu0 %vm73_vm2, %v61_v63 }
  0x48   :  { %3918 = vmatmul.msk.bf16.gmra.mxu0 %vm73_vm2, %v62_v12 }
  0x85   :  { %v105_v22 = vpop.f32.mrf.mxu0  ;;  %v176_v40 = vpop.f32.mrf.mxu1 }
  0x86   :  { %v4892_v23 = vadd.f32 %v4889_v21, %v105_v22  ;;  %v4925_v42 = vadd.f32 %v4921_v39, %v176_v40 }
  0x88   :  { %v199_v24 = vsel %vm198_vm4, %v4892_v23, 0.0  ;;  %v504_v45 = vsel %vm198_vm4, %v4925_v42, 0.0 }
  0x89   :  { %200 = vadd.xlane.f32.xlu2 %v199_v24 }
  0x8d   :  { %v107_v28 = vpop.f32.mrf.mxu0  ;;  %v178_v48 = vpop.f32.mrf.mxu1 }
  0x8e   :  { %v4904_v29 = vadd.f32 %v4889_v21, %v107_v28  ;;  %v4937_v51 = vadd.f32 %v4921_v39, %v178_v48 }
  0x90   :  { %v202_v30 = vsel %vm198_vm4, %v4904_v29, 0.0  ;;  %v507_v52 = vsel %vm198_vm4, %v4937_v51, 0.0 }
  0x91   :  { %203 = vadd.xlane.f32.xlu2 %v202_v30 }
  0x95   :  { %v110_v31 = vpop.f32.mrf.mxu0  ;;  %v181_v53 = vpop.f32.mrf.mxu1 }
  0x96   :  { %v111_v32 = vadd.f32 %v4889_v21, %v110_v31  ;;  %v4942_v54 = vadd.f32 %v4921_v39, %v181_v53 }
  0x98   :  { %v205_v33 = vsel %vm198_vm4, %v111_v32, 0.0  ;;  %v510_v55 = vsel %vm198_vm4, %v4942_v54, 0.0 }
  0x99   :  { %206 = vadd.xlane.f32.xlu0 %v205_v33 }
  0x9d   :  { %v112_v37 = vpop.f32.mrf.mxu0  ;;  %v183_v10 = vpop.f32.mrf.mxu1 }
  0x9e   :  { %v113_v38 = vadd.f32 %v4889_v21, %v112_v37  ;;  %v4971_v15 = vadd.f32 %v4921_v39, %v183_v10  ;;  %v4433_v10 = vld [vmem:[%s6366_s8 + $0x10] sm:$0xff] }
  0x9f   :  { %4504 = vmatpush.bf16.msra.mxu3 %v4433_v10  ;;  %830 = vmatpush.bf16.msrb.mxu0 %v4433_v10  ;;  %v4428_v10 = vld [vmem:[%s6365_s7 + $0x8] sm:$0xff] }
  0xa0   :  { %v208_v41 = vsel %vm198_vm4, %v113_v38, 0.0  ;;  %v513_v22 = vsel %vm198_vm4, %v4971_v15, 0.0 }
  0xa1   :  { %209 = vadd.xlane.f32.xlu0 %v208_v41 }
  0xa5   :  { %v115_v43 = vpop.f32.mrf.mxu0  ;;  %v186_v25 = vpop.f32.mrf.mxu1 }
  0xa6   :  { %v116_v44 = vadd.f32 %v4889_v21, %v115_v43  ;;  %v5030_v60 = vadd.f32 %v4921_v39, %v186_v25  ;;  %v4438_v25 = vld [vmem:[%s6367_s9 + $0x18] sm:$0xff] }
  0xa7   :  { %900 = vmatpush.bf16.msrb.mxu1 %v4438_v25 }
  0xa8   :  { %v211_v46 = vsel %vm198_vm4, %v116_v44, 0.0  ;;  %v516_v63 = vsel %vm198_vm4, %v5030_v60, 0.0 }
  0xa9   :  { %212 = vadd.xlane.f32.xlu1 %v211_v46  ;;  %505 = vadd.xlane.f32.xlu0 %v504_v45 }
  0xad   :  { %v117_v47 = vpop.f32.mrf.mxu0  ;;  %v188_v40 = vpop.f32.mrf.mxu1 }
  0xae   :  { %v4932_v49 = vadd.f32 %v4889_v21, %v117_v47 }
  0xb0   :  { %v214_v50 = vsel %vm198_vm4, %v4932_v49, 0.0 }
  0xb1   :  { %215 = vadd.xlane.f32.xlu1 %v214_v50 }
  0xb9   :  { %508 = vadd.xlane.f32.xlu1 %v507_v52 }
  0xc1   :  { %511 = vadd.xlane.f32.xlu1 %v510_v55  ;;  %v5023_v55 = vpop.f32.mrf.mxu1 }
  0xfc   :  { %v201_v5 = vpop.xlane.xlu2 %200 }
  0xfd   :  { %v242_v14 = vmul.f32 %v4953_v1, %v201_v5  ;;  %v5042_v5 = vadd.f32 %v4921_v39, %v188_v40 }
  0xff   :  { %v4978_v18 = vsub.f32 %v4892_v23, %v242_v14  ;;  %v519_v8 = vsel %vm198_vm4, %v5042_v5, 0.0 }
 0x101   :  { %v266_v23 = vmul.f32 %v4978_v18, %v4978_v18 }
 0x103   :  { %v278_v33 = vsel %vm198_vm4, %v266_v23, 0.0 }
 0x104   :  { %v204_v19 = vpop.xlane.xlu2 %203 }
 0x105   :  { %v243_v27 = vmul.f32 %v4953_v1, %v204_v19 }
 0x107   :  { %v4992_v31 = vsub.f32 %v4904_v29, %v243_v27 }
 0x10c   :  { %v207_v2 = vpop.xlane.xlu0 %206 }
 0x10d   :  { %v244_v3 = vmul.f32 %v4953_v1, %v207_v2  ;;  %v193_v2 = vpop.f32.mrf.mxu1 }
 0x10f   :  { %v4956_v4 = vsub.f32 %v111_v32, %v244_v3 }
 0x111   :  { %v268_v6 = vmul.f32 %v4956_v4, %v4956_v4 }
 0x113   :  { %v284_v7 = vsel %vm198_vm4, %v268_v6, 0.0  ;;  %v5045_v6 = vadd.f32 %v4921_v39, %v193_v2 }
 0x114   :  { %v210_v11 = vpop.xlane.xlu0 %209  ;;  %285 = vadd.xlane.f32.xlu2 %v284_v7 }
 0x115   :  { %v245_v13 = vmul.f32 %v4953_v1, %v210_v11  ;;  %v525_v7 = vsel %vm198_vm4, %v5045_v6, 0.0  ;;  %v4432_v11 = vld [vmem:[%s6366_s8 + $0x8] sm:$0xff] }
 0x116   :  { %4505 = vmatpush.bf16.msra.mxu3 %v4432_v11  ;;  %831 = vmatpush.bf16.msrb.mxu0 %v4432_v11  ;;  %v5122_v11 = vld [vmem:[%s6360_s2] ss:$0 sm:$0xff] }
 0x117   :  { %v4973_v16 = vsub.f32 %v113_v38, %v245_v13  ;;  %v63_v38 = vpack.c.bf16 %v57_v35, %v56_v34  ;;  %v4437_v34 = vld [vmem:[%s6367_s9 + $0x10] sm:$0xff] }
 0x118   :  { %901 = vmatpush.bf16.msrb.mxu1 %v4437_v34 }
 0x119   :  { %v269_v17 = vmul.f32 %v4973_v16, %v4973_v16  ;;  %3919 = vmatmul.msk.bf16.gmra.mxu0 %vm73_vm2, %v63_v38 }
 0x11b   :  { %v287_v20 = vsel %vm198_vm4, %v269_v17, 0.0  ;;  %v4431_v17 = vld [vmem:[%s6366_s8] sm:$0xff] }
 0x11c   :  { %v213_v24 = vpop.xlane.xlu1 %212  ;;  %288 = vadd.xlane.f32.xlu0 %v287_v20  ;;  %514 = vadd.xlane.f32.xlu2 %v513_v22  ;;  %v506_v36 = vpop.xlane.xlu0 %505 }
 0x11d   :  { %v246_v26 = vmul.f32 %v4953_v1, %v213_v24  ;;  %v528_v41 = vmul.f32 %v506_v36, %v4953_v1  ;;  %4506 = vmatpush.bf16.msra.mxu3 %v4431_v17  ;;  %832 = vmatpush.bf16.msrb.mxu0 %v4431_v17 }
 0x11f   :  { %v4985_v28 = vsub.f32 %v116_v44, %v246_v26  ;;  %v267_v44 = vmul.f32 %v4992_v31, %v4992_v31  ;;  %v5013_v46 = vsub.f32 %v4925_v42, %v528_v41 }
 0x121   :  { %v270_v30 = vmul.f32 %v4985_v28, %v4985_v28  ;;  %v281_v48 = vsel %vm198_vm4, %v267_v44, 0.0  ;;  %v544_v53 = vmul.f32 %v5013_v46, %v5013_v46  ;;  %v4430_v44 = vld [vmem:[%s6365_s7 + $0x18] sm:$0xff] }
 0x122   :  { %750 = vmatpush.bf16.msra.mxu2 %v4430_v44 }
 0x123   :  { %v290_v32 = vsel %vm198_vm4, %v270_v30, 0.0  ;;  %v552_v57 = vsel %vm198_vm4, %v544_v53, 0.0 }
 0x124   :  { %v216_v37 = vpop.xlane.xlu1 %215  ;;  %291 = vadd.xlane.f32.xlu0 %v290_v32  ;;  %279 = vadd.xlane.f32.xlu2 %v278_v33  ;;  %v5074_v33 = vpop.f32.mrf.mxu0 }
 0x125   :  { %v247_v29 = vmul.f32 %v4953_v1, %v216_v37 }
 0x127   :  { %v5006_v43 = vsub.f32 %v4932_v49, %v247_v29 }
 0x129   :  { %v271_v45 = vmul.f32 %v5006_v43, %v5006_v43 }
 0x12b   :  { %v293_v47 = vsel %vm198_vm4, %v271_v45, 0.0  ;;  %v4436_v45 = vld [vmem:[%s6367_s9 + $0x8] sm:$0xff] }
 0x12c   :  { %294 = vadd.xlane.f32.xlu1 %v293_v47  ;;  %v509_v50 = vpop.xlane.xlu1 %508  ;;  %282 = vadd.xlane.f32.xlu0 %v281_v48 }
 0x12d   :  { %v529_v52 = vmul.f32 %v509_v50, %v4953_v1  ;;  %v5090_v50 = vadd.f32 %v4921_v39, %v5023_v55  ;;  %902 = vmatpush.bf16.msrb.mxu1 %v4436_v45  ;;  %v4435_v39 = vld [vmem:[%s6367_s9] sm:$0xff] }
 0x12f   :  { %v5019_v49 = vsub.f32 %v4937_v51, %v529_v52 }
 0x131   :  { %v545_v56 = vmul.f32 %v5019_v49, %v5019_v49  ;;  %903 = vmatpush.bf16.msrb.mxu1 %v4435_v39 }
 0x133   :  { %v555_v58 = vsel %vm198_vm4, %v545_v56, 0.0 }
 0x134   :  { %v512_v59 = vpop.xlane.xlu1 %511  ;;  %553 = vadd.xlane.f32.xlu1 %v552_v57  ;;  %556 = vadd.xlane.f32.xlu2 %v555_v58  ;;  %v4429_v58 = vld [vmem:[%s6365_s7 + $0x10] sm:$0xff] }
 0x135   :  { %v530_v61 = vmul.f32 %v512_v59, %v4953_v1  ;;  %751 = vmatpush.bf16.msra.mxu2 %v4429_v58 }
 0x137   :  { %v5034_v62 = vsub.f32 %v4942_v54, %v530_v61 }
 0x139   :  { %v546_v0 = vmul.f32 %v5034_v62, %v5034_v62  ;;  %752 = vmatpush.bf16.msra.mxu2 %v4428_v10 }
 0x13b   :  { %v558_v3 = vsel %vm198_vm4, %v546_v0, 0.0  ;;  %v5112_v0 = vpop.f32.mrf.mxu0 }
 0x13c   :  { %517 = vadd.xlane.f32.xlu2 %v516_v63  ;;  %559 = vadd.xlane.f32.xlu0 %v558_v3  ;;  %v522_v63 = vsel %vm198_vm4, %v5090_v50, 0.0 }
 0x144   :  { %526 = vadd.xlane.f32.xlu2 %v525_v7  ;;  %520 = vadd.xlane.f32.xlu0 %v519_v8 }
 0x187   :  { %v286_v12 = vpop.xlane.xlu2 %285 }
 0x188   :  { %v316_v13 = vmul.f32 %v286_v12, %v4953_v1 }
 0x18a   :  { %v328_v14 = vadd.f32 1e-05, %v316_v13 }
 0x18c   :  { %4526 = vrsqrt.f32 %v328_v14  ;;  %vm364_vm7 = vweird.f32 %v328_v14 }
 0x18f   :  { %v289_v19 = vpop.xlane.xlu0 %288  ;;  %v515_v20 = vpop.xlane.xlu2 %514 }
 0x190   :  { %v317_v22 = vmul.f32 %v289_v19, %v4953_v1  ;;  %v531_v24 = vmul.f32 %v515_v20, %v4953_v1 }
 0x192   :  { %v4527_v26 = vpop.eup %4526  ;;  %v329_v27 = vadd.f32 1e-05, %v317_v22  ;;  %v5070_v23 = vsub.f32 %v4971_v15, %v531_v24 }
 0x193   :  { %v359_v30 = vmul.f32 %v4527_v26, %v328_v14  ;;  %vm365_vm6 = vweird.f32 %v4527_v26 }
 0x194   :  { %4528 = vrsqrt.f32 %v329_v27  ;;  %v547_v32 = vmul.f32 %v5070_v23, %v5070_v23  ;;  %vm5103_vm8 = vmor %vm364_vm7, %vm365_vm6  ;;  %vm374_vm10 = vweird.f32 %v329_v27 }
 0x195   :  { %v360_v35 = vmul.f32 %v4527_v26, %v359_v30 }
 0x196   :  { %v561_v36 = vsel %vm198_vm4, %v547_v32, 0.0 }
 0x197   :  { %v361_v37 = vmul.f32 0.5, %v360_v35  ;;  %v292_v38 = vpop.xlane.xlu0 %291  ;;  %562 = vadd.xlane.f32.xlu1 %v561_v36  ;;  %v280_v29 = vpop.xlane.xlu2 %279 }
 0x198   :  { %v318_v40 = vmul.f32 %v292_v38, %v4953_v1  ;;  %v314_v41 = vmul.f32 %v280_v29, %v4953_v1 }
 0x199   :  { %v362_v47 = vsub.f32 1.5, %v361_v37 }
 0x19a   :  { %v4529_v48 = vpop.eup %4528  ;;  %v5092_v52 = vadd.f32 1e-05, %v318_v40  ;;  %v5094_v53 = vadd.f32 1e-05, %v314_v41 }
 0x19b   :  { %v363_v56 = vmul.f32 %v4527_v26, %v362_v47  ;;  %v369_v57 = vmul.f32 %v4529_v48, %v329_v27  ;;  %vm375_vm9 = vweird.f32 %v4529_v48 }
 0x19c   :  { %4530 = vrsqrt.f32 %v5092_v52  ;;  %vm376_vm11 = vmor %vm374_vm10, %vm375_vm9  ;;  %vm384_vm13 = vweird.f32 %v5092_v52  ;;  %vm344_vm0 = vweird.f32 %v5094_v53 }
 0x19d   :  { %v370_v59 = vmul.f32 %v4529_v48, %v369_v57  ;;  %4532 = vrsqrt.f32 %v5094_v53  ;;  %v367_v61 = vsel %vm5103_vm8, %v4527_v26, %v363_v56  ;;  %v5141_v26 = vld [vmem:[%s6360_s2 + $0x1] ss:$0 sm:$0xff] }
 0x19e   :  { %v460_v12 = vmul.f32 %v367_v61, %v4956_v4  ;;  %v4427_v4 = vld [vmem:[%s6365_s7] sm:$0xff] }
 0x19f   :  { %v371_v2 = vmul.f32 0.5, %v370_v59  ;;  %v295_v3 = vpop.xlane.xlu1 %294  ;;  %v283_v7 = vpop.xlane.xlu0 %282  ;;  %523 = vadd.xlane.f32.xlu1 %v522_v63  ;;  %753 = vmatpush.bf16.msra.mxu2 %v4427_v4 }
 0x1a0   :  { %v319_v8 = vmul.f32 %v295_v3, %v4953_v1  ;;  %v315_v9 = vmul.f32 %v283_v7, %v4953_v1  ;;  %v473_v30 = vmul.f32 %v5122_v11, %v460_v12 }
 0x1a1   :  { %v372_v13 = vsub.f32 1.5, %v371_v2 }
 0x1a2   :  { %v4531_v14 = vpop.eup %4530  ;;  %v5125_v17 = vadd.f32 1e-05, %v319_v8  ;;  %v5127_v19 = vadd.f32 1e-05, %v315_v9  ;;  %v486_v45 = vadd.f32 %v5141_v26, %v473_v30 }
 0x1a3   :  { %v5129_v20 = vpop.eup %4532  ;;  %v373_v22 = vmul.f32 %v4529_v48, %v372_v13  ;;  %v379_v24 = vmul.f32 %v4531_v14, %v5092_v52  ;;  %vm385_vm12 = vweird.f32 %v4531_v14 }
 0x1a4   :  { %v339_v25 = vmul.f32 %v5129_v20, %v5094_v53  ;;  %4534 = vrsqrt.f32 %v5125_v17  ;;  %vm345_vm14 = vweird.f32 %v5129_v20  ;;  %vm386_vm15 = vmor %vm384_vm13, %vm385_vm12  ;;  %vm394_vm5 = vweird.f32 %v5125_v17 }
 0x1a5   :  { %v377_v27 = vsel %vm376_vm11, %v4529_v48, %v373_v22  ;;  %v380_v32 = vmul.f32 %v4531_v14, %v379_v24  ;;  %4536 = vrsqrt.f32 %v5127_v19  ;;  %v5151_v48 = vpop.f32.mrf.mxu0  ;;  %vm346_vm1 = vmor %vm344_vm0, %vm345_vm14  ;;  %vm354_vm7 = vweird.f32 %v5127_v19 }
 0x1a6   :  { %v461_v34 = vmul.f32 %v377_v27, %v4973_v16  ;;  %v340_v35 = vmul.f32 %v5129_v20, %v339_v25 }
 0x1a7   :  { %v381_v36 = vmul.f32 0.5, %v380_v32  ;;  %v554_v37 = vpop.xlane.xlu1 %553  ;;  %v557_v38 = vpop.xlane.xlu2 %556 }
 0x1a8   :  { %v474_v29 = vmul.f32 %v5122_v11, %v461_v34  ;;  %v341_v40 = vmul.f32 0.5, %v340_v35  ;;  %v576_v41 = vmul.f32 %v554_v37, %v4953_v1  ;;  %v577_v44 = vmul.f32 %v557_v38, %v4953_v1 }
 0x1a9   :  { %v382_v47 = vsub.f32 1.5, %v381_v36 }
 0x1aa   :  { %v4535_v16 = vpop.eup %4534  ;;  %v487_v56 = vadd.f32 %v5141_v26, %v474_v29  ;;  %v342_v57 = vsub.f32 1.5, %v341_v40  ;;  %v5154_v58 = vadd.f32 1e-05, %v576_v41  ;;  %v5156_v39 = vadd.f32 1e-05, %v577_v44 }
 0x1ab   :  { %v4537_v55 = vpop.eup %4536  ;;  %v383_v59 = vmul.f32 %v4531_v14, %v382_v47  ;;  %v389_v61 = vmul.f32 %v4535_v16, %v5125_v17  ;;  %vm395_vm2 = vweird.f32 %v4535_v16 }
 0x1ac   :  { %v5160_v63 = vpack.c.bf16 %v487_v56, %v486_v45  ;;  %v343_v2 = vmul.f32 %v5129_v20, %v342_v57  ;;  %v349_v3 = vmul.f32 %v4537_v55, %v5127_v19  ;;  %4538 = vrsqrt.f32 %v5154_v58  ;;  %vm396_vm6 = vmor %vm394_vm5, %vm395_vm2 }
 0x1ad   :  { %v390_v7 = vmul.f32 %v4535_v16, %v389_v61  ;;  %v387_v8 = vsel %vm386_vm15, %v4531_v14, %v383_v59  ;;  %4540 = vrsqrt.f32 %v5156_v39  ;;  %vm355_vm3 = vweird.f32 %v4537_v55  ;;  %v5181_v34 = vpop.f32.mrf.mxu0 }
 0x1ae   :  { %v350_v9 = vmul.f32 %v4537_v55, %v349_v3  ;;  %3961 = vmatmul.msk.bf16.vlgmr.msra.gmra.mxu3 %vm198_vm4, %v5160_v63  ;;  %v347_v13 = vsel %vm346_vm1, %v5129_v20, %v343_v2  ;;  %v462_v14 = vmul.f32 %v387_v8, %v4985_v28  ;;  %vm356_vm8 = vmor %vm354_vm7, %vm355_vm3  ;;  %vm598_vm9 = vweird.f32 %v5154_v58 }
 0x1af   :  { %v391_v52 = vmul.f32 0.5, %v390_v7  ;;  %v5171_v10 = vpop.xlane.xlu0 %559  ;;  %v518_v12 = vpop.xlane.xlu2 %517  ;;  %v458_v27 = vmul.f32 %v347_v13, %v4978_v18  ;;  %vm608_vm13 = vweird.f32 %v5156_v39 }
 0x1b0   :  { %v351_v22 = vmul.f32 0.5, %v350_v9  ;;  %v532_v24 = vmul.f32 %v518_v12, %v4953_v1  ;;  %v475_v36 = vmul.f32 %v5122_v11, %v462_v14 }
 0x1b1   :  { %v392_v25 = vsub.f32 1.5, %v391_v52  ;;  %v471_v41 = vmul.f32 %v5122_v11, %v458_v27  ;;  %v5222_v27 = vld [vmem:[%s6360_s2 + $0x2] ss:$0 sm:$0xff] }
 0x1b2   :  { %v352_v53 = vsub.f32 1.5, %v351_v22  ;;  %v5177_v4 = vsub.f32 %v5030_v60, %v532_v24  ;;  %v4539_v30 = vpop.eup %4538 }
 0x1b3   :  { %v393_v32 = vmul.f32 %v4535_v16, %v392_v25  ;;  %v4541_v20 = vpop.eup %4540  ;;  %v593_v28 = vmul.f32 %v4539_v30, %v5154_v58  ;;  %vm599_vm10 = vweird.f32 %v4539_v30  ;;  %v484_v8 = vadd.f32 %v5141_v26, %v471_v41 }
 0x1b4   :  { %v353_v35 = vmul.f32 %v4537_v55, %v352_v53  ;;  %v603_v38 = vmul.f32 %v4541_v20, %v5156_v39  ;;  %v548_v17 = vmul.f32 %v5177_v4, %v5177_v4  ;;  %vm609_vm11 = vweird.f32 %v4541_v20  ;;  %vm600_vm12 = vmor %vm598_vm9, %vm599_vm10 }
 0x1b5   :  { %v397_v37 = vsel %vm396_vm6, %v4535_v16, %v393_v32  ;;  %v594_v40 = vmul.f32 %v4539_v30, %v593_v28  ;;  %v5217_v53 = vpop.f32.mrf.mxu0  ;;  %vm610_vm14 = vmor %vm608_vm13, %vm609_vm11 }
 0x1b6   :  { %v463_v18 = vmul.f32 %v397_v37, %v5006_v43  ;;  %v357_v29 = vsel %vm356_vm8, %v4537_v55, %v353_v35  ;;  %v604_v19 = vmul.f32 %v4541_v20, %v603_v38  ;;  %v564_v43 = vsel %vm198_vm4, %v548_v17, 0.0 }
 0x1b7   :  { %v459_v44 = vmul.f32 %v357_v29, %v4992_v31  ;;  %v521_v45 = vpop.xlane.xlu0 %520  ;;  %v527_v47 = vpop.xlane.xlu2 %526  ;;  %v595_v56 = vmul.f32 0.5, %v594_v40  ;;  %v488_v55 = vadd.f32 %v5141_v26, %v475_v36  ;;  %565 = vadd.xlane.f32.xlu0 %v564_v43  ;;  %v5248_v38 = vadd.f32 %v4889_v21, %v5151_v48 }
 0x1b8   :  { %v476_v16 = vmul.f32 %v5122_v11, %v463_v18  ;;  %v533_v57 = vmul.f32 %v521_v45, %v4953_v1  ;;  %v605_v61 = vmul.f32 0.5, %v604_v19  ;;  %v535_v31 = vmul.f32 %v527_v47, %v4953_v1 }
 0x1b9   :  { %v472_v59 = vmul.f32 %v5122_v11, %v459_v44  ;;  %v596_v3 = vsub.f32 1.5, %v595_v56  ;;  %v5263_v48 = vadd.f32 %v4889_v21, %v5181_v34  ;;  %v578_v34 = vmul.f32 %v5171_v10, %v4953_v1 }
 0x1ba   :  { %v489_v2 = vadd.f32 %v5141_v26, %v476_v16  ;;  %v5201_v7 = vsub.f32 %v5042_v5, %v533_v57  ;;  %v606_v52 = vsub.f32 1.5, %v605_v61  ;;  %v5208_v22 = vsub.f32 %v5045_v6, %v535_v31 }
 0x1bb   :  { %v485_v9 = vadd.f32 %v5141_v26, %v472_v59  ;;  %v597_v13 = vmul.f32 %v4539_v30, %v596_v3  ;;  %v226_v19 = vsel %vm198_vm4, %v5263_v48, 0.0  ;;  %v586_v47 = vadd.f32 1e-05, %v578_v34 }
 0x1bc   :  { %v5205_v12 = vpack.c.bf16 %v489_v2, %v488_v55  ;;  %v549_v24 = vmul.f32 %v5201_v7, %v5201_v7  ;;  %v607_v25 = vmul.f32 %v4541_v20, %v606_v52  ;;  %v551_v58 = vmul.f32 %v5208_v22, %v5208_v22 }
 0x1bd   :  { %v5212_v14 = vpack.c.bf16 %v485_v9, %v484_v8  ;;  %v601_v32 = vsel %vm600_vm12, %v4539_v30, %v597_v13  ;;  %v5237_v30 = vld [vmem:[%s6360_s2 + $0x3] ss:$0 sm:$0xff]  ;;  %v132_v41 = vpop.f32.mrf.mxu0  ;;  %4542 = vrsqrt.f32 %v586_v47  ;;  %vm618_vm0 = vweird.f32 %v586_v47 }
 0x1be   :  { %3962 = vmatmul.msk.bf16.gmra.mxu3 %vm198_vm4, %v5205_v12  ;;  %v567_v35 = vsel %vm198_vm4, %v549_v24, 0.0  ;;  %v672_v28 = vmul.f32 %v601_v32, %v5013_v46  ;;  %v611_v39 = vsel %vm610_vm14, %v4541_v20, %v607_v25  ;;  %v573_v37 = vsel %vm198_vm4, %v551_v58, 0.0 }
 0x1bf   :  { %3960 = vmatmul.msk.bf16.vlgmr.msrb.gmra.mxu0 %vm198_vm4, %v5212_v14  ;;  %3982 = vmatmul.msk.bf16.vlgmr.msrb.gmra.mxu1 %vm198_vm4, %v5212_v14  ;;  %v673_v36 = vmul.f32 %v611_v39, %v5019_v49  ;;  %v5243_v46 = vadd.f32 %v4889_v21, %v5074_v33  ;;  %v223_v33 = vsel %vm198_vm4, %v5248_v38, 0.0  ;;  %v5266_v44 = vadd.f32 %v4889_v21, %v132_v41 }
 0x1c0   :  { %568 = vadd.xlane.f32.xlu1 %v567_v35  ;;  %574 = vadd.xlane.f32.xlu0 %v573_v37  ;;  %v681_v20 = vmul.f32 %v5222_v27, %v672_v28  ;;  %v5288_v58 = vadd.f32 %v4889_v21, %v5112_v0  ;;  %v5297_v0 = vadd.f32 %v4889_v21, %v5217_v53  ;;  %vm992_vm12 = vcmask 130048  }
 0x1c1   :  { %v682_v18 = vmul.f32 %v5222_v27, %v673_v36  ;;  %v217_v40 = vsel %vm198_vm4, %v5243_v46, 0.0  ;;  %v232_v45 = vsel %vm198_vm4, %v5266_v44, 0.0 }
 0x1c2   :  { %v690_v29 = vadd.f32 %v5237_v30, %v681_v20  ;;  %v220_v37 = vsel %vm198_vm4, %v5288_v58, 0.0  ;;  %v229_v41 = vsel %vm198_vm4, %v5297_v0, 0.0 }
 0x1c3   :  { %v691_v49 = vadd.f32 %v5237_v30, %v682_v18  ;;  %v4543_v16 = vpop.eup %4542 }
 0x1c4   :  { %v613_v56 = vmul.f32 %v4543_v16, %v586_v47  ;;  %vm619_vm15 = vweird.f32 %v4543_v16 }
 0x1c5   :  { %v5255_v17 = vpack.c.bf16 %v691_v49, %v690_v29  ;;  %vm620_vm1 = vmor %vm618_vm0, %vm619_vm15 }
 0x1c6   :  { %v614_v57 = vmul.f32 %v4543_v16, %v613_v56 }
 0x1c7   :  { %3940 = vmatmul.msk.bf16.vlgmr.msra.gmra.mxu2 %vm198_vm4, %v5255_v17 }
 0x1c8   :  { %218 = vadd.xlane.f32.xlu1 %v217_v40  ;;  %224 = vadd.xlane.f32.xlu0 %v223_v33  ;;  %v615_v61 = vmul.f32 0.5, %v614_v57 }
 0x1ca   :  { %v616_v31 = vsub.f32 1.5, %v615_v61 }
 0x1cc   :  { %v617_v10 = vmul.f32 %v4543_v16, %v616_v31 }
 0x1ce   :  { %v621_v32 = vsel %vm620_vm1, %v4543_v16, %v617_v10 }
 0x1cf   :  { %3983 = vmatmul.msk.bf16.gmra.mxu1 %vm198_vm4, %v5160_v63  ;;  %v674_v39 = vmul.f32 %v621_v32, %v5034_v62 }
 0x1d0   :  { %227 = vadd.xlane.f32.xlu1 %v226_v19  ;;  %233 = vadd.xlane.f32.xlu0 %v232_v45 }
 0x1d1   :  { %v683_v29 = vmul.f32 %v5222_v27, %v674_v39 }
 0x1d3   :  { %v692_v62 = vadd.f32 %v5237_v30, %v683_v29 }
 0x1df   :  { %3984 = vmatmul.msk.bf16.gmra.mxu1 %vm198_vm4, %v5205_v12 }
 0x20a   :  { %v563_v43 = vpop.xlane.xlu1 %562 }
 0x20b   :  { %v579_v55 = vmul.f32 %v563_v43, %v4953_v1 }
 0x20d   :  { %v587_v59 = vadd.f32 1e-05, %v579_v55 }
 0x20f   :  { %4544 = vrsqrt.f32 %v587_v59  ;;  %vm628_vm3 = vweird.f32 %v587_v59 }
 0x212   :  { %v524_v2 = vpop.xlane.xlu1 %523 }
 0x213   :  { %v534_v3 = vmul.f32 %v524_v2, %v4953_v1 }
 0x215   :  { %v4545_v8 = vpop.eup %4544  ;;  %v5281_v9 = vsub.f32 %v5090_v50, %v534_v3 }
 0x216   :  { %v623_v52 = vmul.f32 %v4545_v8, %v587_v59  ;;  %vm629_vm2 = vweird.f32 %v4545_v8 }
 0x217   :  { %v550_v13 = vmul.f32 %v5281_v9, %v5281_v9  ;;  %vm630_vm5 = vmor %vm628_vm3, %vm629_vm2 }
 0x218   :  { %v624_v24 = vmul.f32 %v4545_v8, %v623_v52 }
 0x219   :  { %v570_v25 = vsel %vm198_vm4, %v550_v13, 0.0 }
 0x21a   :  { %v625_v35 = vmul.f32 0.5, %v624_v24  ;;  %571 = vadd.xlane.f32.xlu2 %v570_v25 }
 0x21c   :  { %v626_v28 = vsub.f32 1.5, %v625_v35 }
 0x21e   :  { %v627_v36 = vmul.f32 %v4545_v8, %v626_v28 }
 0x220   :  { %v631_v20 = vsel %vm630_vm5, %v4545_v8, %v627_v36 }
 0x221   :  { %v675_v18 = vmul.f32 %v631_v20, %v5070_v23 }
 0x222   :  { %221 = vadd.xlane.f32.xlu2 %v220_v37 }
 0x223   :  { %v684_v49 = vmul.f32 %v5222_v27, %v675_v18 }
 0x225   :  { %v693_v40 = vadd.f32 %v5237_v30, %v684_v49 }
 0x227   :  { %v5302_v33 = vpack.c.bf16 %v693_v40, %v692_v62 }
 0x229   :  { %3941 = vmatmul.msk.bf16.gmra.mxu2 %vm198_vm4, %v5302_v33 }
 0x22a   :  { %230 = vadd.xlane.f32.xlu2 %v229_v41  ;;  %v566_v23 = vpop.xlane.xlu0 %565 }
 0x22b   :  { %v580_v19 = vmul.f32 %v566_v23, %v4953_v1 }
 0x22d   :  { %v588_v21 = vadd.f32 1e-05, %v580_v19 }
 0x22f   :  { %4546 = vrsqrt.f32 %v588_v21  ;;  %vm638_vm7 = vweird.f32 %v588_v21 }
 0x231   :  { %v5309_v53 = vpop.f32.mrf.mxu3 }
 0x233   :  { %v569_v45 = vpop.xlane.xlu1 %568  ;;  %v5312_v47 = vpop.xlane.xlu0 %574 }
 0x234   :  { %v581_v34 = vmul.f32 %v569_v45, %v4953_v1 }
 0x235   :  { %v4547_v56 = vpop.eup %4546 }
 0x236   :  { %v589_v16 = vadd.f32 1e-05, %v581_v34  ;;  %v633_v57 = vmul.f32 %v4547_v56, %v588_v21  ;;  %vm639_vm6 = vweird.f32 %v4547_v56 }
 0x237   :  { %vm640_vm8 = vmor %vm638_vm7, %vm639_vm6 }
 0x238   :  { %4548 = vrsqrt.f32 %v589_v16  ;;  %v634_v55 = vmul.f32 %v4547_v56, %v633_v57  ;;  %vm648_vm10 = vweird.f32 %v589_v16 }
 0x239   :  { %v5314_v43 = vpop.f32.mrf.mxu3 }
 0x23a   :  { %v635_v61 = vmul.f32 0.5, %v634_v55 }
 0x23b   :  { %v219_v59 = vpop.xlane.xlu1 %218  ;;  %v225_v2 = vpop.xlane.xlu0 %224 }
 0x23c   :  { %v248_v31 = vmul.f32 %v4953_v1, %v219_v59  ;;  %v250_v3 = vmul.f32 %v4953_v1, %v225_v2  ;;  %v5318_v8 = vpop.f32.mrf.mxu1  ;;  %v636_v52 = vsub.f32 1.5, %v635_v61  ;;  %v834_v45 = vpop.f32.mrf.mxu0  ;;  %v946_v2 = vpack.c.bf16 %v5314_v43, %v5314_v43 }
 0x23e   :  { %v4549_v10 = vpop.eup %4548  ;;  %v5321_v13 = vsub.f32 %v5243_v46, %v248_v31  ;;  %v5324_v25 = vsub.f32 %v5248_v38, %v250_v3  ;;  %v637_v32 = vmul.f32 %v4547_v56, %v636_v52 }
 0x23f   :  { %v643_v24 = vmul.f32 %v4549_v10, %v589_v16  ;;  %vm649_vm9 = vweird.f32 %v4549_v10 }
 0x240   :  { %v272_v39 = vmul.f32 %v5321_v13, %v5321_v13  ;;  %v274_v36 = vmul.f32 %v5324_v25, %v5324_v25  ;;  %v641_v37 = vsel %vm640_vm8, %v4547_v56, %v637_v32  ;;  %vm650_vm11 = vmor %vm648_vm10, %vm649_vm9 }
 0x241   :  { %v644_v35 = vmul.f32 %v4549_v10, %v643_v24  ;;  %v844_v28 = vpop.f32.mrf.mxu3  ;;  %v676_v23 = vmul.f32 %v641_v37, %v5177_v4 }
 0x242   :  { %v296_v46 = vsel %vm198_vm4, %v272_v39, 0.0  ;;  %v302_v29 = vsel %vm198_vm4, %v274_v36, 0.0  ;;  %v947_v56 = vpack.c.bf16 %v844_v28, %v844_v28  ;;  %v986_v39 = vunpack.c.l.b16 %v946_v2 }
 0x243   :  { %v645_v20 = vmul.f32 0.5, %v644_v35  ;;  %v228_v18 = vpop.xlane.xlu1 %227  ;;  %297 = vadd.xlane.f32.xlu1 %v296_v46  ;;  %303 = vadd.xlane.f32.xlu0 %v302_v29  ;;  %v234_v49 = vpop.xlane.xlu0 %233  ;;  %v685_v16 = vmul.f32 %v5222_v27, %v676_v23  ;;  %v943_v29 = vpack.c.bf16 %v834_v45, %v834_v45 }
 0x244   :  { %v251_v38 = vmul.f32 %v4953_v1, %v228_v18  ;;  %v253_v40 = vmul.f32 %v4953_v1, %v234_v49  ;;  %v907_v41 = vpop.f32.mrf.mxu1  ;;  %v987_v3 = vunpack.c.l.b16 %v947_v56  ;;  %v836_v37 = vpop.f32.mrf.mxu0 }
 0x245   :  { %v646_v62 = vsub.f32 1.5, %v645_v20  ;;  %v694_v32 = vadd.f32 %v5237_v30, %v685_v16  ;;  %v944_v46 = vpack.c.bf16 %v836_v37, %v836_v37 }
 0x246   :  { %v5336_v19 = vsub.f32 %v5263_v48, %v251_v38  ;;  %v5339_v34 = vsub.f32 %v5266_v44, %v253_v40 }
 0x247   :  { %v647_v21 = vmul.f32 %v4549_v10, %v646_v62  ;;  %v984_v38 = vunpack.c.l.b16 %v944_v46  ;;  %v983_v62 = vunpack.c.l.b16 %v943_v29 }
 0x248   :  { %v275_v57 = vmul.f32 %v5336_v19, %v5336_v19  ;;  %v277_v61 = vmul.f32 %v5339_v34, %v5339_v34 }
 0x249   :  { %v651_v55 = vsel %vm650_vm11, %v4549_v10, %v647_v21  ;;  %v846_v59 = vpop.f32.mrf.mxu3  ;;  %v989_v40 = vpack.c.b16 %v984_v38, %v983_v62 }
 0x24a   :  { %v677_v4 = vmul.f32 %v651_v55, %v5201_v7  ;;  %v948_v48 = vpack.c.bf16 %v846_v59, %v846_v59  ;;  %v305_v31 = vsel %vm198_vm4, %v275_v57, 0.0  ;;  %v311_v44 = vsel %vm198_vm4, %v277_v61, 0.0 }
 0x24b   :  { %306 = vadd.xlane.f32.xlu1 %v305_v31  ;;  %312 = vadd.xlane.f32.xlu0 %v311_v44  ;;  %v945_v7 = vpack.c.bf16 %v5309_v53, %v5309_v53  ;;  %v1000_v21 = vsel %vm992_vm12, %v989_v40, 0  ;;  %v956_v31 = vpack.c.bf16 %v907_v41, %v907_v41  ;;  %v955_v44 = vpack.c.bf16 %v5318_v8, %v5318_v8 }
 0x24c   :  { %v988_v52 = vunpack.c.l.b16 %v948_v48  ;;  %v686_v10 = vmul.f32 %v5222_v27, %v677_v4  ;;  %v910_v24 = vpop.f32.mrf.mxu1 }
 0x24d   :  { %v985_v20 = vunpack.c.l.b16 %v945_v7  ;;  %v957_v61 = vpack.c.bf16 %v910_v24, %v910_v24 }
 0x24e   :  { %v695_v35 = vadd.f32 %v5237_v30, %v686_v10  ;;  %v991_v28 = vpack.c.b16 %v988_v52, %v987_v3  ;;  %v1200_v3 = vunpack.c.l.b16 %v956_v31  ;;  %v1199_v10 = vunpack.c.l.b16 %v955_v44 }
 0x24f   :  { %v990_v18 = vpack.c.b16 %v986_v39, %v985_v20  ;;  %v1201_v2 = vunpack.c.l.b16 %v957_v61 }
 0x250   :  { %v5356_v36 = vpack.c.bf16 %v695_v35, %v694_v32  ;;  %v1006_v43 = vsel %vm992_vm12, %v991_v28, 0  ;;  %v1205_v7 = vpack.c.b16 %v1200_v3, %v1199_v10  ;;  %v583_v32 = vmul.f32 %v5312_v47, %v4953_v1 }
 0x251   :  { %1013 = vmatpush.bf16.xpose.msrb.mxu2 %v1006_v43  ;;  %v1003_v49 = vsel %vm992_vm12, %v990_v18, 0 }
 0x252   :  { %3942 = vmatmul.msk.bf16.gmra.mxu2 %vm198_vm4, %v5356_v36  ;;  %v591_v24 = vadd.f32 1e-05, %v583_v32 }
 0x254   :  { %v912_v53 = vpop.f32.mrf.mxu1  ;;  %4550 = vrsqrt.f32 %v591_v24  ;;  %vm668_vm14 = vweird.f32 %v591_v24 }
 0x255   :  { %v958_v55 = vpack.c.bf16 %v912_v53, %v912_v53 }
 0x257   :  { %v1202_v16 = vunpack.c.l.b16 %v958_v55 }
 0x259   :  { %1014 = vmatpush.bf16.xpose.msrb.mxu2 %v1003_v49  ;;  %v1206_v52 = vpack.c.b16 %v1202_v16, %v1201_v2 }
 0x25a   :  { %v4551_v35 = vpop.eup %4550 }
 0x25b   :  { %v663_v41 = vmul.f32 %v4551_v35, %v591_v24  ;;  %vm669_vm13 = vweird.f32 %v4551_v35 }
 0x25c   :  { %v915_v23 = vpop.f32.mrf.mxu1  ;;  %vm670_vm15 = vmor %vm668_vm14, %vm669_vm13 }
 0x25d   :  { %v959_v56 = vpack.c.bf16 %v915_v23, %v915_v23  ;;  %v664_v28 = vmul.f32 %v4551_v35, %v663_v41 }
 0x25f   :  { %v1203_v4 = vunpack.c.l.b16 %v959_v56  ;;  %v665_v37 = vmul.f32 0.5, %v664_v28 }
 0x261   :  { %1015 = vmatpush.bf16.xpose.msrb.mxu2 %v1000_v21  ;;  %v666_v20 = vsub.f32 1.5, %v665_v37 }
 0x263   :  { %v667_v47 = vmul.f32 %v4551_v35, %v666_v20 }
 0x264   :  { %v917_v57 = vpop.f32.mrf.mxu1 }
 0x265   :  { %v960_v59 = vpack.c.bf16 %v917_v57, %v917_v57  ;;  %v671_v23 = vsel %vm670_vm15, %v4551_v35, %v667_v47 }
 0x267   :  { %v1204_v48 = vunpack.c.l.b16 %v960_v59 }
 0x269   :  { %v1207_v45 = vpack.c.b16 %v1204_v48, %v1203_v4  ;;  %v755_v48 = vpop.f32.mrf.mxu2 }
 0x26b   :  { %1222 = vmatpush.bf16.msra.mxu2 %v1207_v45 }
 0x26f   :  { %1223 = vmatpush.bf16.msra.mxu2 %v1206_v52 }
 0x271   :  { %v757_v52 = vpop.f32.mrf.mxu2 }
 0x272   :  { %v936_v10 = vpack.c.bf16 %v757_v52, %v757_v52 }
 0x273   :  { %1224 = vmatpush.bf16.msra.mxu2 %v1205_v7  ;;  %v935_v7 = vpack.c.bf16 %v755_v48, %v755_v48 }
 0x274   :  { %v972_v32 = vunpack.c.l.b16 %v936_v10 }
 0x275   :  { %v971_v24 = vunpack.c.l.b16 %v935_v7 }
 0x277   :  { %v975_v35 = vpack.c.b16 %v972_v32, %v971_v24 }
 0x28d   :  { %v572_v39 = vpop.xlane.xlu2 %571 }
 0x28e   :  { %v582_v43 = vmul.f32 %v572_v39, %v4953_v1 }
 0x290   :  { %v590_v8 = vadd.f32 1e-05, %v582_v43 }
 0x292   :  { %4552 = vrsqrt.f32 %v590_v8  ;;  %vm658_vm1 = vweird.f32 %v590_v8 }
 0x295   :  { %v222_v46 = vpop.xlane.xlu2 %221 }
 0x296   :  { %v249_v18 = vmul.f32 %v4953_v1, %v222_v46 }
 0x298   :  { %v4553_v53 = vpop.eup %4552  ;;  %v5370_v29 = vsub.f32 %v5288_v58, %v249_v18  ;;  %v679_v58 = vmul.f32 %v671_v23, %v5208_v22 }
 0x299   :  { %v653_v38 = vmul.f32 %v4553_v53, %v590_v8  ;;  %vm659_vm0 = vweird.f32 %v4553_v53 }
 0x29a   :  { %v273_v49 = vmul.f32 %v5370_v29, %v5370_v29  ;;  %vm660_vm2 = vmor %vm658_vm1, %vm659_vm0  ;;  %v688_v44 = vmul.f32 %v5222_v27, %v679_v58 }
 0x29b   :  { %v654_v62 = vmul.f32 %v4553_v53, %v653_v38 }
 0x29c   :  { %v299_v40 = vsel %vm198_vm4, %v273_v49, 0.0  ;;  %v697_v2 = vadd.f32 %v5237_v30, %v688_v44 }
 0x29d   :  { %v655_v21 = vmul.f32 0.5, %v654_v62  ;;  %300 = vadd.xlane.f32.xlu2 %v299_v40  ;;  %v231_v56 = vpop.xlane.xlu2 %230 }
 0x29e   :  { %v252_v57 = vmul.f32 %v4953_v1, %v231_v56 }
 0x29f   :  { %v656_v55 = vsub.f32 1.5, %v655_v21 }
 0x2a0   :  { %v5378_v59 = vsub.f32 %v5297_v0, %v252_v57 }
 0x2a1   :  { %v657_v61 = vmul.f32 %v4553_v53, %v656_v55 }
 0x2a2   :  { %v276_v4 = vmul.f32 %v5378_v59, %v5378_v59 }
 0x2a3   :  { %v661_v31 = vsel %vm660_vm2, %v4553_v53, %v657_v61 }
 0x2a4   :  { %v678_v16 = vmul.f32 %v661_v31, %v5281_v9  ;;  %v308_v45 = vsel %vm198_vm4, %v276_v4, 0.0 }
 0x2a5   :  { %309 = vadd.xlane.f32.xlu2 %v308_v45 }
 0x2a6   :  { %v687_v22 = vmul.f32 %v5222_v27, %v678_v16 }
 0x2a8   :  { %v696_v0 = vadd.f32 %v5237_v30, %v687_v22 }
 0x2aa   :  { %v5388_v3 = vpack.c.bf16 %v697_v2, %v696_v0 }
 0x2ac   :  { %3943 = vmatmul.msk.bf16.gmra.mxu2 %vm198_vm4, %v5388_v3  ;;  %v760_v9 = vpop.f32.mrf.mxu2 }
 0x2ad   :  { %v937_v28 = vpack.c.bf16 %v760_v9, %v760_v9 }
 0x2af   :  { %v973_v43 = vunpack.c.l.b16 %v937_v28 }
 0x2b4   :  { %v762_v41 = vpop.f32.mrf.mxu2 }
 0x2b5   :  { %v938_v27 = vpack.c.bf16 %v762_v41, %v762_v41 }
 0x2b6   :  { %v298_v8 = vpop.xlane.xlu1 %297  ;;  %v304_v18 = vpop.xlane.xlu0 %303 }
 0x2b7   :  { %v974_v39 = vunpack.c.l.b16 %v938_v27  ;;  %v320_v37 = vmul.f32 %v298_v8, %v4953_v1  ;;  %v322_v38 = vmul.f32 %v304_v18, %v4953_v1 }
 0x2b9   :  { %v976_v30 = vpack.c.b16 %v974_v39, %v973_v43  ;;  %v332_v20 = vadd.f32 1e-05, %v320_v37  ;;  %v334_v40 = vadd.f32 1e-05, %v322_v38 }
 0x2bb   :  { %4554 = vrsqrt.f32 %v332_v20  ;;  %vm404_vm3 = vweird.f32 %v332_v20  ;;  %vm424_vm13 = vweird.f32 %v334_v40 }
 0x2bc   :  { %3988 = vmatmul.msk.bf16.vlgmr.msrb.gmra.mxu2 %vm992_vm12, %v975_v35 }
 0x2be   :  { %v307_v46 = vpop.xlane.xlu1 %306  ;;  %v313_v4 = vpop.xlane.xlu0 %312 }
 0x2bf   :  { %v323_v47 = vmul.f32 %v307_v46, %v4953_v1  ;;  %v325_v22 = vmul.f32 %v313_v4, %v4953_v1 }
 0x2c1   :  { %v4555_v53 = vpop.eup %4554  ;;  %v335_v62 = vadd.f32 1e-05, %v323_v47  ;;  %v337_v24 = vadd.f32 1e-05, %v325_v22 }
 0x2c2   :  { %v399_v49 = vmul.f32 %v4555_v53, %v332_v20  ;;  %vm405_vm5 = vweird.f32 %v4555_v53 }
 0x2c3   :  { %4556 = vrsqrt.f32 %v335_v62  ;;  %vm406_vm6 = vmor %vm404_vm3, %vm405_vm5  ;;  %vm434_vm10 = vweird.f32 %v335_v62  ;;  %vm454_vm1 = vweird.f32 %v337_v24 }
 0x2c4   :  { %v400_v23 = vmul.f32 %v4555_v53, %v399_v49  ;;  %4558 = vrsqrt.f32 %v334_v40 }
 0x2c6   :  { %v401_v55 = vmul.f32 0.5, %v400_v23 }
 0x2c8   :  { %v402_v61 = vsub.f32 1.5, %v401_v55 }
 0x2c9   :  { %v5398_v58 = vpop.eup %4556 }
 0x2ca   :  { %v4559_v31 = vpop.eup %4558  ;;  %v429_v45 = vmul.f32 %v5398_v58, %v335_v62  ;;  %v403_v0 = vmul.f32 %v4555_v53, %v402_v61  ;;  %vm435_vm11 = vweird.f32 %v5398_v58 }
 0x2cb   :  { %v419_v2 = vmul.f32 %v4559_v31, %v334_v40  ;;  %vm425_vm14 = vweird.f32 %v4559_v31  ;;  %vm436_vm15 = vmor %vm434_vm10, %vm435_vm11 }
 0x2cc   :  { %3989 = vmatmul.msk.bf16.gmra.mxu2 %vm992_vm12, %v976_v30  ;;  %v430_v9 = vmul.f32 %v5398_v58, %v429_v45  ;;  %v407_v35 = vsel %vm406_vm6, %v4555_v53, %v403_v0  ;;  %vm426_vm0 = vmor %vm424_vm13, %vm425_vm14 }
 0x2cd   :  { %v420_v41 = vmul.f32 %v4559_v31, %v419_v2  ;;  %v464_v43 = vmul.f32 %v407_v35, %v5321_v13 }
 0x2ce   :  { %v431_v28 = vmul.f32 0.5, %v430_v9 }
 0x2cf   :  { %v421_v30 = vmul.f32 0.5, %v420_v41  ;;  %v477_v18 = vmul.f32 %v5122_v11, %v464_v43 }
 0x2d0   :  { %v432_v37 = vsub.f32 1.5, %v431_v28 }
 0x2d1   :  { %v422_v38 = vsub.f32 1.5, %v421_v30 }
 0x2d2   :  { %v433_v23 = vmul.f32 %v5398_v58, %v432_v37 }
 0x2d3   :  { %v423_v55 = vmul.f32 %v4559_v31, %v422_v38 }
 0x2d4   :  { %v437_v61 = vsel %vm436_vm15, %v5398_v58, %v433_v23 }
 0x2d5   :  { %v5403_v10 = vpop.f32.mrf.mxu2  ;;  %v427_v40 = vsel %vm426_vm0, %v4559_v31, %v423_v55  ;;  %v467_v45 = vmul.f32 %v437_v61, %v5336_v19 }
 0x2d6   :  { %v466_v22 = vmul.f32 %v427_v40, %v5324_v25 }
 0x2d7   :  { %v480_v2 = vmul.f32 %v5122_v11, %v467_v45 }
 0x2d9   :  { %v493_v35 = vadd.f32 %v5141_v26, %v480_v2 }
 0x2dd   :  { %v5411_v53 = vpop.f32.mrf.mxu2 }
 0x310   :  { %v301_v21 = vpop.xlane.xlu2 %300 }
 0x311   :  { %v321_v56 = vmul.f32 %v301_v21, %v4953_v1 }
 0x313   :  { %v333_v57 = vadd.f32 1e-05, %v321_v56  ;;  %v490_v56 = vadd.f32 %v5141_v26, %v477_v18 }
 0x315   :  { %4560 = vrsqrt.f32 %v333_v57  ;;  %vm414_vm8 = vweird.f32 %v333_v57 }
 0x318   :  { %v310_v48 = vpop.xlane.xlu2 %309 }
 0x319   :  { %v324_v16 = vmul.f32 %v310_v48, %v4953_v1 }
 0x31b   :  { %v4561_v44 = vpop.eup %4560  ;;  %v5405_v7 = vadd.f32 1e-05, %v324_v16 }
 0x31c   :  { %v409_v52 = vmul.f32 %v4561_v44, %v333_v57  ;;  %vm415_vm7 = vweird.f32 %v4561_v44 }
 0x31d   :  { %4562 = vrsqrt.f32 %v5405_v7  ;;  %vm416_vm9 = vmor %vm414_vm8, %vm415_vm7  ;;  %vm444_vm6 = vweird.f32 %v5405_v7  ;;  %vm1086_vm8 = vcmask 392192  }
 0x31e   :  { %v410_v32 = vmul.f32 %v4561_v44, %v409_v52  ;;  %4564 = vrsqrt.f32 %v337_v24  ;;  %v479_v52 = vmul.f32 %v5122_v11, %v466_v22 }
 0x320   :  { %v411_v27 = vmul.f32 0.5, %v410_v32  ;;  %v492_v19 = vadd.f32 %v5141_v26, %v479_v52 }
 0x322   :  { %v412_v39 = vsub.f32 1.5, %v411_v27  ;;  %v5438_v25 = vpack.c.bf16 %v493_v35, %v492_v19 }
 0x323   :  { %v4563_v46 = vpop.eup %4562 }
 0x324   :  { %v413_v8 = vmul.f32 %v4561_v44, %v412_v39  ;;  %v4565_v49 = vpop.eup %4564  ;;  %v439_v21 = vmul.f32 %v4563_v46, %v5405_v7  ;;  %vm445_vm3 = vweird.f32 %v4563_v46 }
 0x325   :  { %vm455_vm2 = vweird.f32 %v4565_v49  ;;  %vm446_vm7 = vmor %vm444_vm6, %vm445_vm3 }
 0x326   :  { %v417_v20 = vsel %vm416_vm9, %v4561_v44, %v413_v8  ;;  %v440_v4 = vmul.f32 %v4563_v46, %v439_v21  ;;  %vm456_vm5 = vmor %vm454_vm1, %vm455_vm2 }
 0x327   :  { %v465_v47 = vmul.f32 %v417_v20, %v5370_v29  ;;  %v449_v29 = vmul.f32 %v4565_v49, %v337_v24 }
 0x328   :  { %v441_v44 = vmul.f32 0.5, %v440_v4 }
 0x329   :  { %v478_v13 = vmul.f32 %v5122_v11, %v465_v47  ;;  %v450_v16 = vmul.f32 %v4565_v49, %v449_v29 }
 0x32a   :  { %v442_v58 = vsub.f32 1.5, %v441_v44 }
 0x32b   :  { %v491_v57 = vadd.f32 %v5141_v26, %v478_v13  ;;  %v451_v0 = vmul.f32 0.5, %v450_v16 }
 0x32c   :  { %v443_v31 = vmul.f32 %v4563_v46, %v442_v58 }
 0x32d   :  { %v5420_v62 = vpack.c.bf16 %v491_v57, %v490_v56  ;;  %v452_v32 = vsub.f32 1.5, %v451_v0 }
 0x32e   :  { %v447_v27 = vsel %vm446_vm7, %v4563_v46, %v443_v31 }
 0x32f   :  { %v5423_v48 = vpop.f32.mrf.mxu2  ;;  %3963 = vmatmul.msk.bf16.gmra.mxu3 %vm198_vm4, %v5420_v62  ;;  %3985 = vmatmul.msk.bf16.gmra.mxu1 %vm198_vm4, %v5420_v62  ;;  %v453_v41 = vmul.f32 %v4565_v49, %v452_v32  ;;  %v468_v43 = vmul.f32 %v447_v27, %v5378_v59 }
 0x331   :  { %v457_v28 = vsel %vm456_vm5, %v4565_v49, %v453_v41  ;;  %v481_v30 = vmul.f32 %v5122_v11, %v468_v43 }
 0x332   :  { %v469_v7 = vmul.f32 %v457_v28, %v5339_v34 }
 0x333   :  { %v494_v46 = vadd.f32 %v5141_v26, %v481_v30 }
 0x334   :  { %v482_v8 = vmul.f32 %v5122_v11, %v469_v7 }
 0x336   :  { %v495_v18 = vadd.f32 %v5141_v26, %v482_v8 }
 0x337   :  { %v5433_v9 = vpop.f32.mrf.mxu2 }
 0x338   :  { %v5452_v47 = vpack.c.bf16 %v495_v18, %v494_v46 }
 0x33f   :  { %3964 = vmatmul.msk.bf16.gmra.mxu3 %vm198_vm4, %v5438_v25  ;;  %3986 = vmatmul.msk.bf16.gmra.mxu1 %vm198_vm4, %v5438_v25  ;;  %v1017_v24 = vpop.f32.mrf.mxu2 }
 0x340   :  { %v1087_v39 = vsel %vm1086_vm8, %v1017_v24, -inf }
 0x341   :  { %1088 = vmax.xlane.f32.xlu1 %v1087_v39 }
 0x347   :  { %v1019_v37 = vpop.f32.mrf.mxu2 }
 0x348   :  { %v1090_v20 = vsel %vm1086_vm8, %v1019_v37, -inf }
 0x349   :  { %1091 = vmax.xlane.f32.xlu2 %v1090_v20 }
 0x34f   :  { %3965 = vmatmul.msk.bf16.gmra.mxu3 %vm198_vm4, %v5452_v47  ;;  %3987 = vmatmul.msk.bf16.gmra.mxu1 %vm198_vm4, %v5452_v47  ;;  %v1022_v34 = vpop.f32.mrf.mxu2 }
 0x350   :  { %v1093_v59 = vsel %vm1086_vm8, %v1022_v34, -inf }
 0x351   :  { %1094 = vmax.xlane.f32.xlu0 %v1093_v59 }
 0x357   :  { %v1024_v11 = vpop.f32.mrf.mxu2 }
 0x358   :  { %v1096_v38 = vsel %vm1086_vm8, %v1024_v11, -inf }
 0x359   :  { %1097 = vmax.xlane.f32.xlu1 %v1096_v38 }
 0x3ac   :  { %v920_v49 = vpop.f32.mrf.mxu1 }
 0x3b2   :  { %v5460_v13 = vpop.f32.mrf.mxu3 }
 0x3b4   :  { %v1089_v26 = vpop.xlane.xlu1 %1088  ;;  %v922_v23 = vpop.f32.mrf.mxu1 }
 0x3b5   :  { %v1111_v21 = vsub.f32 %v1017_v24, %v1089_v26  ;;  %v962_v18 = vpack.c.bf16 %v922_v23, %v922_v23 }
 0x3b7   :  { %v1119_v56 = vmul.f32 1.442695, %v1111_v21  ;;  %v961_v21 = vpack.c.bf16 %v920_v49, %v920_v49 }
 0x3b9   :  { %4566 = vpow2.f32 %v1119_v56 }
 0x3ba   :  { %v5462_v57 = vpop.f32.mrf.mxu3 }
 0x3bb   :  { %v950_v49 = vpack.c.bf16 %v5462_v57, %v5462_v57  ;;  %v939_v57 = vpack.c.bf16 %v5403_v10, %v5403_v10  ;;  %v4440_v10 = vld [vmem:[%s6365_s7 + $0x20] sm:$0xff] }
 0x3bc   :  { %v925_v55 = vpop.f32.mrf.mxu1  ;;  %v1092_v29 = vpop.xlane.xlu2 %1091 }
 0x3bd   :  { %v1112_v61 = vsub.f32 %v1019_v37, %v1092_v29  ;;  %v963_v37 = vpack.c.bf16 %v925_v55, %v925_v55 }
 0x3bf   :  { %v5464_v4 = vpop.eup %4566  ;;  %v1121_v40 = vmul.f32 1.442695, %v1112_v61  ;;  %v1254_v56 = vunpack.c.l.b16 %v963_v37  ;;  %v1253_v61 = vunpack.c.l.b16 %v962_v18  ;;  %v1031_v37 = vunpack.c.l.b16 %v939_v57 }
 0x3c0   :  { %v1135_v16 = vsel %vm1086_vm8, %v5464_v4, 0.0  ;;  %v941_v18 = vpack.c.bf16 %v5423_v48, %v5423_v48  ;;  %v4447_v48 = vld [vmem:[%s6366_s8 + $0x38] sm:$0xff] }
 0x3c1   :  { %4568 = vpow2.f32 %v1121_v40  ;;  %1136 = vadd.xlane.f32.xlu2 %v1135_v16  ;;  %1394 = vmatpush.bf16.msrb.mxu2 %v4447_v48 }
 0x3c2   :  { %v854_v45 = vpop.f32.mrf.mxu3 }
 0x3c4   :  { %v1095_v44 = vpop.xlane.xlu0 %1094  ;;  %v927_v22 = vpop.f32.mrf.mxu1 }
 0x3c5   :  { %v1113_v0 = vsub.f32 %v1022_v34, %v1095_v44  ;;  %v964_v7 = vpack.c.bf16 %v927_v22, %v927_v22  ;;  %v1252_v22 = vunpack.c.l.b16 %v961_v21  ;;  %v4446_v21 = vld [vmem:[%s6366_s8 + $0x30] sm:$0xff] }
 0x3c6   :  { %1395 = vmatpush.bf16.msrb.mxu2 %v4446_v21 }
 0x3c7   :  { %v5468_v2 = vpop.eup %4568  ;;  %v1123_v58 = vmul.f32 1.442695, %v1113_v0  ;;  %v1255_v59 = vunpack.c.l.b16 %v964_v7  ;;  %v951_v0 = vpack.c.bf16 %v854_v45, %v854_v45 }
 0x3c8   :  { %v1138_v52 = vsel %vm1086_vm8, %v5468_v2, 0.0 }
 0x3c9   :  { %4570 = vpow2.f32 %v1123_v58  ;;  %1139 = vadd.xlane.f32.xlu0 %v1138_v52  ;;  %v1259_v55 = vpack.c.b16 %v1255_v59, %v1254_v56  ;;  %v1033_v59 = vunpack.c.l.b16 %v941_v18 }
 0x3ca   :  { %v856_v32 = vpop.f32.mrf.mxu3 }
 0x3cb   :  { %v952_v40 = vpack.c.bf16 %v856_v32, %v856_v32  ;;  %v949_v32 = vpack.c.bf16 %v5460_v13, %v5460_v13 }
 0x3cc   :  { %v1098_v35 = vpop.xlane.xlu1 %1097  ;;  %v930_v31 = vpop.f32.mrf.mxu1 }
 0x3cd   :  { %v1114_v19 = vsub.f32 %v1024_v11, %v1098_v35  ;;  %v965_v39 = vpack.c.bf16 %v930_v31, %v930_v31  ;;  %v1046_v58 = vunpack.c.l.b16 %v952_v40  ;;  %v1258_v35 = vpack.c.b16 %v1253_v61, %v1252_v22  ;;  %v4444_v22 = vld [vmem:[%s6366_s8 + $0x20] sm:$0xff] }
 0x3ce   :  { %v1045_v31 = vunpack.c.l.b16 %v951_v0  ;;  %v1043_v45 = vunpack.c.l.b16 %v949_v32 }
 0x3cf   :  { %v5472_v41 = vpop.eup %4570  ;;  %v1125_v27 = vmul.f32 1.442695, %v1114_v19  ;;  %v1256_v20 = vunpack.c.l.b16 %v965_v39  ;;  %v940_v39 = vpack.c.bf16 %v5411_v53, %v5411_v53  ;;  %v4441_v53 = vld [vmem:[%s6365_s7 + $0x28] sm:$0xff] }
 0x3d0   :  { %v1141_v24 = vsel %vm1086_vm8, %v5472_v41, 0.0  ;;  %v1050_v19 = vpack.c.b16 %v1046_v58, %v1045_v31 }
 0x3d1   :  { %4572 = vpow2.f32 %v1125_v27  ;;  %1142 = vadd.xlane.f32.xlu1 %v1141_v24  ;;  %v1044_v27 = vunpack.c.l.b16 %v950_v49  ;;  %v1032_v13 = vunpack.c.l.b16 %v940_v39 }
 0x3d2   :  { %v859_v28 = vpop.f32.mrf.mxu3  ;;  %v1062_v24 = vsel %vm992_vm12, %v1050_v19, 0 }
 0x3d3   :  { %v953_v11 = vpack.c.bf16 %v859_v28, %v859_v28  ;;  %v1049_v28 = vpack.c.b16 %v1044_v27, %v1043_v45 }
 0x3d4   :  { %v932_v43 = vpop.f32.mrf.mxu1 }
 0x3d5   :  { %v966_v30 = vpack.c.bf16 %v932_v43, %v932_v43  ;;  %v1047_v16 = vunpack.c.l.b16 %v953_v11  ;;  %v4443_v43 = vld [vmem:[%s6365_s7 + $0x38] sm:$0xff]  ;;  %v1059_v7 = vsel %vm992_vm12, %v1049_v28, 0 }
 0x3d7   :  { %v5476_v8 = vpop.eup %4572  ;;  %v1257_v46 = vunpack.c.l.b16 %v966_v30  ;;  %v4442_v30 = vld [vmem:[%s6365_s7 + $0x30] sm:$0xff] }
 0x3d8   :  { %v1144_v34 = vsel %vm1086_vm8, %v5476_v8, 0.0 }
 0x3d9   :  { %1145 = vadd.xlane.f32.xlu2 %v1144_v34  ;;  %v1260_v38 = vpack.c.b16 %v1257_v46, %v1256_v20  ;;  %v1035_v20 = vpack.c.b16 %v1032_v13, %v1031_v37  ;;  %v942_v46 = vpack.c.bf16 %v5433_v9, %v5433_v9  ;;  %v4439_v13 = vld [vmem:[%s6368_s10] sm:$0xff] }
 0x3da   :  { %v861_v26 = vpop.f32.mrf.mxu3 }
 0x3db   :  { %v954_v29 = vpack.c.bf16 %v861_v26, %v861_v26  ;;  %1275 = vmatpush.bf16.msrb.mxu3 %v1260_v38  ;;  %v1034_v34 = vunpack.c.l.b16 %v942_v46 }
 0x3dd   :  { %v1048_v44 = vunpack.c.l.b16 %v954_v29  ;;  %v1036_v11 = vpack.c.b16 %v1034_v34, %v1033_v59  ;;  %v4445_v29 = vld [vmem:[%s6366_s8 + $0x28] sm:$0xff] }
 0x3de   :  { %1396 = vmatpush.bf16.msrb.mxu2 %v4445_v29 }
 0x3df   :  { %v1051_v23 = vpack.c.b16 %v1048_v44, %v1047_v16  ;;  %1276 = vmatpush.bf16.msrb.mxu3 %v1259_v55 }
 0x3e1   :  { %v1065_v52 = vsel %vm992_vm12, %v1051_v23, 0 }
 0x3e2   :  { %1072 = vmatpush.bf16.xpose.msra.mxu0 %v1065_v52  ;;  %1397 = vmatpush.bf16.msrb.mxu2 %v4444_v22 }
 0x3e3   :  { %1277 = vmatpush.bf16.msrb.mxu3 %v1258_v35 }
 0x3ea   :  { %1073 = vmatpush.bf16.xpose.msra.mxu0 %v1062_v24 }
 0x3f2   :  { %1074 = vmatpush.bf16.xpose.msra.mxu0 %v1059_v7 }
 0x3f9   :  { %3990 = vmatmul.msk.bf16.vlgmr.msra.gmra.mxu0 %vm992_vm12, %v1035_v20 }
 0x3fa   :  { %1332 = vmatpush.bf16.msrb.mxu0 %v4443_v43 }
 0x3fe   :  { %1333 = vmatpush.bf16.msrb.mxu0 %v4442_v30 }
 0x402   :  { %1334 = vmatpush.bf16.msrb.mxu0 %v4441_v53 }
 0x406   :  { %1335 = vmatpush.bf16.msrb.mxu0 %v4440_v10 }
 0x409   :  { %3991 = vmatmul.msk.bf16.gmra.mxu0 %vm992_vm12, %v1036_v11 }
 0x419   :  { %4020 = vmatmul.msk.bf16.vlgmr.msrb.gmra.mxu0 %vm198_vm4, %v5255_v17 }
 0x429   :  { %4021 = vmatmul.msk.bf16.gmra.mxu0 %vm198_vm4, %v5302_v33 }
 0x434   :  { %v1137_v38 = vpop.xlane.xlu2 %1136 }
 0x435   :  { %4574 = vrcp.f32 %v1137_v38 }
 0x439   :  { %4022 = vmatmul.msk.bf16.gmra.mxu0 %vm198_vm4, %v5356_v36 }
 0x43b   :  { %v4575_v26 = vpop.eup %4574 }
 0x43c   :  { %v1140_v9 = vpop.xlane.xlu0 %1139  ;;  %v1167_v56 = vmul.f32 %v4575_v26, %v5464_v4 }
 0x43d   :  { %4576 = vrcp.f32 %v1140_v9 }
 0x43e   :  { %v1175_v40 = vpack.c.bf16 %v1167_v56, %v1167_v56 }
 0x440   :  { %v1187_v0 = vunpack.c.l.b16 %v1175_v40 }
 0x443   :  { %v4577_v61 = vpop.eup %4576 }
 0x444   :  { %v1168_v16 = vmul.f32 %v4577_v61, %v5468_v2  ;;  %v1143_v44 = vpop.xlane.xlu1 %1142 }
 0x445   :  { %4578 = vrcp.f32 %v1143_v44 }
 0x446   :  { %v1176_v55 = vpack.c.bf16 %v1168_v16, %v1168_v16 }
 0x448   :  { %v1188_v23 = vunpack.c.l.b16 %v1176_v55 }
 0x449   :  { %4023 = vmatmul.msk.bf16.gmra.mxu0 %vm198_vm4, %v5388_v3 }
 0x44a   :  { %v1191_v4 = vpack.c.b16 %v1188_v23, %v1187_v0 }
 0x44b   :  { %v4579_v52 = vpop.eup %4578 }
 0x44c   :  { %3992 = vmatmul.msk.bf16.vlgmr.msra.gmra.mxu2 %vm1086_vm8, %v1191_v4  ;;  %v1146_v58 = vpop.xlane.xlu2 %1145  ;;  %v1169_v2 = vmul.f32 %v4579_v52, %v5472_v41 }
 0x44d   :  { %4580 = vrcp.f32 %v1146_v58  ;;  %1932 = vmatpush.bf16.msra.mxu2 %v4439_v13 }
 0x44e   :  { %v1177_v49 = vpack.c.bf16 %v1169_v2, %v1169_v2 }
 0x450   :  { %v1189_v32 = vunpack.c.l.b16 %v1177_v49 }
 0x453   :  { %v4581_v35 = vpop.eup %4580 }
 0x454   :  { %v1170_v31 = vmul.f32 %v4581_v35, %v5476_v8 }
 0x456   :  { %v1178_v19 = vpack.c.bf16 %v1170_v31, %v1170_v31 }
 0x458   :  { %v1190_v27 = vunpack.c.l.b16 %v1178_v19 }
 0x45a   :  { %v1192_v24 = vpack.c.b16 %v1190_v27, %v1189_v32 }
 0x45c   :  { %3993 = vmatmul.msk.bf16.gmra.mxu2 %vm1086_vm8, %v1192_v24 }
 0x46c   :  { %4048 = vmatmul.msk.bf16.vlgmr.msrb.gmra.mxu2 %vm198_vm4, %v5212_v14 }
 0x476   :  { %v1076_v45 = vpop.f32.mrf.mxu0 }
 0x477   :  { %v1099_v28 = vsel %vm1086_vm8, %v1076_v45, -inf }
 0x478   :  { %1100 = vmax.xlane.f32.xlu0 %v1099_v28 }
 0x47c   :  { %4049 = vmatmul.msk.bf16.gmra.mxu2 %vm198_vm4, %v5160_v63 }
 0x47e   :  { %v1078_v41 = vpop.f32.mrf.mxu0 }
 0x47f   :  { %v1102_v8 = vsel %vm1086_vm8, %v1078_v41, -inf }
 0x480   :  { %1103 = vmax.xlane.f32.xlu1 %v1102_v8 }
 0x486   :  { %v1081_v39 = vpop.f32.mrf.mxu0 }
 0x487   :  { %v1105_v43 = vsel %vm1086_vm8, %v1081_v39, -inf }
 0x488   :  { %1106 = vmax.xlane.f32.xlu2 %v1105_v43 }
 0x48c   :  { %4050 = vmatmul.msk.bf16.gmra.mxu2 %vm198_vm4, %v5205_v12 }
 0x48e   :  { %v1083_v57 = vpop.f32.mrf.mxu0 }
 0x48f   :  { %v1108_v7 = vsel %vm1086_vm8, %v1083_v57, -inf }
 0x490   :  { %1109 = vmax.xlane.f32.xlu0 %v1108_v7 }
 0x496   :  { %v1337_v28 = vpop.f32.mrf.mxu0 }
 0x49c   :  { %4051 = vmatmul.msk.bf16.gmra.mxu2 %vm198_vm4, %v5420_v62 }
 0x4ac   :  { %4052 = vmatmul.msk.bf16.gmra.mxu2 %vm198_vm4, %v5438_v25 }
 0x4bc   :  { %4053 = vmatmul.msk.bf16.gmra.mxu2 %vm198_vm4, %v5452_v47 }
 0x4cf   :  { %v1226_v30 = vpop.f32.mrf.mxu2 }
 0x4d7   :  { %v1228_v37 = vpop.f32.mrf.mxu2 }
 0x4d8   :  { %v1289_v20 = vpack.c.bf16 %v1228_v37, %v1226_v30 }
 0x4da   :  { %4106 = vmatmul.msk.bf16.vlgmr.msra.gmra.mxu2 %vm992_vm12, %v1289_v20  ;;  %v1339_v20 = vpop.f32.mrf.mxu0 }
 0x4df   :  { %v1231_v53 = vpop.f32.mrf.mxu2 }
 0x4e7   :  { %v1233_v10 = vpop.f32.mrf.mxu2 }
 0x4e8   :  { %v1290_v46 = vpack.c.bf16 %v1233_v10, %v1231_v53 }
 0x4ea   :  { %4107 = vmatmul.msk.bf16.gmra.mxu2 %vm992_vm12, %v1290_v46 }
 0x4eb   :  { %v1101_v18 = vpop.xlane.xlu0 %1100 }
 0x4ec   :  { %v1115_v34 = vsub.f32 %v1076_v45, %v1101_v18 }
 0x4ee   :  { %v1127_v59 = vmul.f32 1.442695, %v1115_v34 }
 0x4ef   :  { %v1399_v11 = vpop.f32.mrf.mxu2 }
 0x4f0   :  { %4582 = vpow2.f32 %v1127_v59  ;;  %v1509_v37 = vpack.c.bf16 %v1399_v11, %v1399_v11  ;;  %v1502_v59 = vpack.c.bf16 %v1339_v20, %v1339_v20 }
 0x4f2   :  { %v1549_v18 = vunpack.c.l.b16 %v1509_v37 }
 0x4f3   :  { %v1104_v38 = vpop.xlane.xlu1 %1103 }
 0x4f4   :  { %v1116_v9 = vsub.f32 %v1078_v41, %v1104_v38  ;;  %v1501_v38 = vpack.c.bf16 %v1337_v28, %v1337_v28 }
 0x4f6   :  { %v5556_v48 = vpop.eup %4582  ;;  %v1129_v26 = vmul.f32 1.442695, %v1116_v9 }
 0x4f7   :  { %v1401_v21 = vpop.f32.mrf.mxu2  ;;  %v1147_v56 = vsel %vm1086_vm8, %v5556_v48, 0.0 }
 0x4f8   :  { %4584 = vpow2.f32 %v1129_v26  ;;  %1148 = vadd.xlane.f32.xlu1 %v1147_v56  ;;  %v1510_v13 = vpack.c.bf16 %v1401_v21, %v1401_v21  ;;  %v1342_v26 = vpop.f32.mrf.mxu0 }
 0x4fa   :  { %v1550_v53 = vunpack.c.l.b16 %v1510_v13 }
 0x4fb   :  { %v1107_v29 = vpop.xlane.xlu2 %1106 }
 0x4fc   :  { %v1117_v61 = vsub.f32 %v1081_v39, %v1107_v29  ;;  %v1555_v34 = vpack.c.b16 %v1550_v53, %v1549_v18  ;;  %v1538_v29 = vunpack.c.l.b16 %v1502_v59 }
 0x4fe   :  { %v5560_v40 = vpop.eup %4584  ;;  %v1131_v16 = vmul.f32 1.442695, %v1117_v61  ;;  %v1565_v9 = vsel %vm992_vm12, %v1555_v34, 0  ;;  %v1537_v61 = vunpack.c.l.b16 %v1501_v38 }
 0x4ff   :  { %v1404_v44 = vpop.f32.mrf.mxu2  ;;  %v1150_v55 = vsel %vm1086_vm8, %v5560_v40, 0.0 }
 0x500   :  { %4586 = vpow2.f32 %v1131_v16  ;;  %1151 = vadd.xlane.f32.xlu2 %v1150_v55  ;;  %v1511_v41 = vpack.c.bf16 %v1404_v44, %v1404_v44  ;;  %v1541_v21 = vpack.c.b16 %v1538_v29, %v1537_v61  ;;  %v1344_v16 = vpop.f32.mrf.mxu0  ;;  %v1503_v55 = vpack.c.bf16 %v1342_v26, %v1342_v26 }
 0x501   :  { %v1504_v44 = vpack.c.bf16 %v1344_v16, %v1344_v16  ;;  %v4451_v16 = vld [vmem:[%s6367_s9 + $0x38] sm:$0xff] }
 0x502   :  { %v1551_v7 = vunpack.c.l.b16 %v1511_v41  ;;  %1466 = vmatpush.bf16.msra.mxu3 %v4451_v16 }
 0x503   :  { %v1110_v22 = vpop.xlane.xlu0 %1109 }
 0x504   :  { %v1118_v0 = vsub.f32 %v1083_v57, %v1110_v22 }
 0x506   :  { %v5564_v23 = vpop.eup %4586  ;;  %v1133_v4 = vmul.f32 1.442695, %v1118_v0  ;;  %v1540_v0 = vunpack.c.l.b16 %v1504_v44 }
 0x507   :  { %v1406_v58 = vpop.f32.mrf.mxu2  ;;  %v1153_v52 = vsel %vm1086_vm8, %v5564_v23, 0.0 }
 0x508   :  { %4588 = vpow2.f32 %v1133_v4  ;;  %1154 = vadd.xlane.f32.xlu0 %v1153_v52  ;;  %v1512_v27 = vpack.c.bf16 %v1406_v58, %v1406_v58  ;;  %v1539_v4 = vunpack.c.l.b16 %v1503_v55 }
 0x50a   :  { %v1552_v39 = vunpack.c.l.b16 %v1512_v27  ;;  %v1542_v58 = vpack.c.b16 %v1540_v0, %v1539_v4  ;;  %v1347_v27 = vpop.f32.mrf.mxu0  ;;  %v4449_v4 = vld [vmem:[%s6367_s9 + $0x28] sm:$0xff] }
 0x50b   :  { %v1505_v18 = vpack.c.bf16 %v1347_v27, %v1347_v27 }
 0x50c   :  { %v1556_v30 = vpack.c.b16 %v1552_v39, %v1551_v7 }
 0x50e   :  { %v5568_v2 = vpop.eup %4588  ;;  %v1568_v10 = vsel %vm992_vm12, %v1556_v30, 0 }
 0x50f   :  { %v1409_v35 = vpop.f32.mrf.mxu2  ;;  %v1156_v31 = vsel %vm1086_vm8, %v5568_v2, 0.0 }
 0x510   :  { %1157 = vadd.xlane.f32.xlu1 %v1156_v31  ;;  %v1513_v49 = vpack.c.bf16 %v1409_v35, %v1409_v35 }
 0x512   :  { %v1553_v24 = vunpack.c.l.b16 %v1513_v49  ;;  %v1349_v13 = vpop.f32.mrf.mxu0 }
 0x517   :  { %v1411_v19 = vpop.f32.mrf.mxu2 }
 0x518   :  { %v1514_v32 = vpack.c.bf16 %v1411_v19, %v1411_v19 }
 0x51a   :  { %v1554_v45 = vunpack.c.l.b16 %v1514_v32  ;;  %v1352_v59 = vpop.f32.mrf.mxu0 }
 0x51b   :  { %v1507_v29 = vpack.c.bf16 %v1352_v59, %v1352_v59  ;;  %v4455_v59 = vld [vmem:[%s6365_s7 + $0x50] sm:$0xff] }
 0x51c   :  { %v1557_v8 = vpack.c.b16 %v1554_v45, %v1553_v24 }
 0x51e   :  { %v1571_v43 = vsel %vm992_vm12, %v1557_v8, 0 }
 0x51f   :  { %v1414_v57 = vpop.f32.mrf.mxu2  ;;  %1578 = vmatpush.bf16.xpose.msra.mxu1 %v1571_v43 }
 0x520   :  { %v1515_v7 = vpack.c.bf16 %v1414_v57, %v1414_v57 }
 0x522   :  { %v1608_v20 = vunpack.c.l.b16 %v1515_v7 }
 0x527   :  { %v1416_v46 = vpop.f32.mrf.mxu2  ;;  %1579 = vmatpush.bf16.xpose.msra.mxu1 %v1568_v10  ;;  %v1506_v10 = vpack.c.bf16 %v1349_v13, %v1349_v13 }
 0x528   :  { %v1516_v39 = vpack.c.bf16 %v1416_v46, %v1416_v46  ;;  %v1354_v46 = vpop.f32.mrf.mxu0 }
 0x529   :  { %v1597_v38 = vunpack.c.l.b16 %v1506_v10 }
 0x52a   :  { %v1609_v30 = vunpack.c.l.b16 %v1516_v39 }
 0x52c   :  { %v1614_v53 = vpack.c.b16 %v1609_v30, %v1608_v20 }
 0x52e   :  { %v1624_v34 = vsel %vm992_vm12, %v1614_v53, 0 }
 0x52f   :  { %v1419_v56 = vpop.f32.mrf.mxu2  ;;  %1580 = vmatpush.bf16.xpose.msra.mxu1 %v1565_v9  ;;  %v1596_v9 = vunpack.c.l.b16 %v1505_v18 }
 0x530   :  { %v1517_v24 = vpack.c.bf16 %v1419_v56, %v1419_v56  ;;  %v1508_v56 = vpack.c.bf16 %v1354_v46, %v1354_v46 }
 0x531   :  { %v1600_v26 = vpack.c.b16 %v1597_v38, %v1596_v9  ;;  %v4454_v38 = vld [vmem:[%s6365_s7 + $0x48] sm:$0xff]  ;;  %v4453_v9 = vld [vmem:[%s6365_s7 + $0x40] sm:$0xff] }
 0x532   :  { %v1610_v8 = vunpack.c.l.b16 %v1517_v24  ;;  %v1599_v61 = vunpack.c.l.b16 %v1508_v56 }
 0x536   :  { %4084 = vmatmul.msk.bf16.vlgmr.msra.gmra.mxu1 %vm992_vm12, %v1541_v21  ;;  %v1598_v21 = vunpack.c.l.b16 %v1507_v29 }
 0x537   :  { %v1421_v11 = vpop.f32.mrf.mxu2 }
 0x538   :  { %v1518_v49 = vpack.c.bf16 %v1421_v11, %v1421_v11  ;;  %v1601_v55 = vpack.c.b16 %v1599_v61, %v1598_v21 }
 0x53a   :  { %v1611_v28 = vunpack.c.l.b16 %v1518_v49 }
 0x53c   :  { %v1615_v43 = vpack.c.b16 %v1611_v28, %v1610_v8 }
 0x53e   :  { %v1627_v37 = vsel %vm992_vm12, %v1615_v43, 0 }
 0x53f   :  { %v1424_v22 = vpop.f32.mrf.mxu2 }
 0x540   :  { %v1519_v52 = vpack.c.bf16 %v1424_v22, %v1424_v22  ;;  %v4450_v22 = vld [vmem:[%s6367_s9 + $0x30] sm:$0xff] }
 0x541   :  { %1467 = vmatpush.bf16.msra.mxu3 %v4450_v22 }
 0x542   :  { %v1612_v19 = vunpack.c.l.b16 %v1519_v52 }
 0x545   :  { %1468 = vmatpush.bf16.msra.mxu3 %v4449_v4 }
 0x546   :  { %4085 = vmatmul.msk.bf16.gmra.mxu1 %vm992_vm12, %v1542_v58 }
 0x547   :  { %v1426_v35 = vpop.f32.mrf.mxu2 }
 0x548   :  { %v1520_v31 = vpack.c.bf16 %v1426_v35, %v1426_v35 }
 0x54a   :  { %v1613_v32 = vunpack.c.l.b16 %v1520_v31 }
 0x54c   :  { %v1616_v45 = vpack.c.b16 %v1613_v32, %v1612_v19  ;;  %v4448_v19 = vld [vmem:[%s6367_s9 + $0x20] sm:$0xff] }
 0x54d   :  { %1469 = vmatpush.bf16.msra.mxu3 %v4448_v19 }
 0x54e   :  { %v1630_v41 = vsel %vm992_vm12, %v1616_v45, 0 }
 0x54f   :  { %1637 = vmatpush.bf16.xpose.msra.mxu0 %v1630_v41 }
 0x557   :  { %1638 = vmatpush.bf16.xpose.msra.mxu0 %v1627_v37 }
 0x55f   :  { %1639 = vmatpush.bf16.xpose.msra.mxu0 %v1624_v34  ;;  %v4456_v34 = vld [vmem:[%s6365_s7 + $0x58] sm:$0xff] }
 0x566   :  { %4086 = vmatmul.msk.bf16.vlgmr.msra.gmra.mxu0 %vm992_vm12, %v1600_v26 }
 0x56b   :  { %v1149_v57 = vpop.xlane.xlu1 %1148 }
 0x56c   :  { %4590 = vrcp.f32 %v1149_v57 }
 0x572   :  { %v4591_v44 = vpop.eup %4590 }
 0x573   :  { %v1152_v11 = vpop.xlane.xlu2 %1151  ;;  %v1171_v0 = vmul.f32 %v4591_v44, %v5556_v48 }
 0x574   :  { %4592 = vrcp.f32 %v1152_v11 }
 0x575   :  { %v1179_v52 = vpack.c.bf16 %v1171_v0, %v1171_v0 }
 0x576   :  { %4087 = vmatmul.msk.bf16.gmra.mxu0 %vm992_vm12, %v1601_v55 }
 0x577   :  { %v1240_v32 = vunpack.c.l.b16 %v1179_v52 }
 0x57a   :  { %v4593_v58 = vpop.eup %4592 }
 0x57b   :  { %v1172_v35 = vmul.f32 %v4593_v58, %v5560_v40  ;;  %v1155_v31 = vpop.xlane.xlu0 %1154 }
 0x57c   :  { %4594 = vrcp.f32 %v1155_v31 }
 0x57d   :  { %v1180_v49 = vpack.c.bf16 %v1172_v35, %v1172_v35 }
 0x57f   :  { %v1241_v27 = vunpack.c.l.b16 %v1180_v49 }
 0x581   :  { %v1244_v48 = vpack.c.b16 %v1241_v27, %v1240_v32 }
 0x582   :  { %v4595_v45 = vpop.eup %4594 }
 0x583   :  { %v1158_v24 = vpop.xlane.xlu1 %1157  ;;  %3994 = vmatmul.msk.bf16.vlgmr.msrb.gmra.mxu3 %vm1086_vm8, %v1244_v48  ;;  %v1173_v28 = vmul.f32 %v4595_v45, %v5564_v23 }
 0x584   :  { %4596 = vrcp.f32 %v1158_v24  ;;  %1991 = vmatpush.bf16.msrb.mxu3 %v4456_v34 }
 0x585   :  { %v1181_v8 = vpack.c.bf16 %v1173_v28, %v1173_v28 }
 0x587   :  { %v1242_v43 = vunpack.c.l.b16 %v1181_v8 }
 0x588   :  { %1992 = vmatpush.bf16.msrb.mxu3 %v4455_v59 }
 0x58a   :  { %v4597_v40 = vpop.eup %4596 }
 0x58b   :  { %v1174_v41 = vmul.f32 %v4597_v40, %v5568_v2 }
 0x58c   :  { %1993 = vmatpush.bf16.msrb.mxu3 %v4454_v38 }
 0x58d   :  { %v1182_v39 = vpack.c.bf16 %v1174_v41, %v1174_v41 }
 0x58f   :  { %v1243_v7 = vunpack.c.l.b16 %v1182_v39 }
 0x590   :  { %1994 = vmatpush.bf16.msrb.mxu3 %v4453_v9 }
 0x591   :  { %v1245_v13 = vpack.c.b16 %v1243_v7, %v1242_v43 }
 0x593   :  { %3995 = vmatmul.msk.bf16.gmra.mxu3 %vm1086_vm8, %v1245_v13 }
 0x5a3   :  { %4078 = vmatmul.msk.bf16.vlgmr.msra.gmra.mxu3 %vm198_vm4, %v5212_v14 }
 0x5b3   :  { %4079 = vmatmul.msk.bf16.gmra.mxu3 %vm198_vm4, %v5160_v63  ;;  %v1582_v30 = vpop.f32.mrf.mxu1 }
 0x5b4   :  { %v1651_v37 = vsel %vm1086_vm8, %v1582_v30, -inf }
 0x5b5   :  { %1652 = vmax.xlane.f32.xlu2 %v1651_v37 }
 0x5bb   :  { %v1584_v23 = vpop.f32.mrf.mxu1 }
 0x5bc   :  { %v1654_v2 = vsel %vm1086_vm8, %v1584_v23, -inf }
 0x5bd   :  { %1655 = vmax.xlane.f32.xlu0 %v1654_v2 }
 0x5c3   :  { %4080 = vmatmul.msk.bf16.gmra.mxu3 %vm198_vm4, %v5205_v12  ;;  %v1587_v20 = vpop.f32.mrf.mxu1 }
 0x5c4   :  { %v1657_v53 = vsel %vm1086_vm8, %v1587_v20, -inf }
 0x5c5   :  { %1658 = vmax.xlane.f32.xlu1 %v1657_v53 }
 0x5cb   :  { %v5609_v10 = vpop.f32.mrf.mxu1 }
 0x5cc   :  { %v1660_v18 = vsel %vm1086_vm8, %v5609_v10, -inf }
 0x5cd   :  { %1661 = vmax.xlane.f32.xlu2 %v1660_v18 }
 0x5d3   :  { %4081 = vmatmul.msk.bf16.gmra.mxu3 %vm198_vm4, %v5420_v62 }
 0x5e3   :  { %4082 = vmatmul.msk.bf16.gmra.mxu3 %vm198_vm4, %v5438_v25  ;;  %v5629_v26 = vpop.f32.mrf.mxu0 }
 0x5e4   :  { %v1663_v46 = vsel %vm1086_vm8, %v5629_v26, -inf }
 0x5e5   :  { %1664 = vmax.xlane.f32.xlu0 %v1663_v46 }
 0x5eb   :  { %v5633_v57 = vpop.f32.mrf.mxu0 }
 0x5ec   :  { %v1666_v56 = vsel %vm1086_vm8, %v5633_v57, -inf }
 0x5ed   :  { %1667 = vmax.xlane.f32.xlu1 %v1666_v56 }
 0x5f3   :  { %4083 = vmatmul.msk.bf16.gmra.mxu3 %vm198_vm4, %v5452_v47  ;;  %v5639_v29 = vpop.f32.mrf.mxu0 }
 0x5f4   :  { %v1669_v61 = vsel %vm1086_vm8, %v5639_v29, -inf }
 0x5f5   :  { %1670 = vmax.xlane.f32.xlu2 %v1669_v61 }
 0x5fb   :  { %v5643_v21 = vpop.f32.mrf.mxu0 }
 0x5fc   :  { %v1672_v11 = vsel %vm1086_vm8, %v5643_v21, -inf }
 0x5fd   :  { %1673 = vmax.xlane.f32.xlu0 %v1672_v11 }
 0x603   :  { %4134 = vmatmul.msk.bf16.vlgmr.msrb.gmra.mxu3 %vm198_vm4, %v5255_v17 }
 0x606   :  { %v1279_v16 = vpop.f32.mrf.mxu3 }
 0x60e   :  { %v1281_v44 = vpop.f32.mrf.mxu3 }
 0x60f   :  { %v1291_v55 = vpack.c.bf16 %v1281_v44, %v1279_v16 }
 0x611   :  { %4108 = vmatmul.msk.bf16.gmra.mxu2 %vm992_vm12, %v1291_v55 }
 0x613   :  { %4135 = vmatmul.msk.bf16.gmra.mxu3 %vm198_vm4, %v5302_v33 }
 0x616   :  { %v1284_v22 = vpop.f32.mrf.mxu3 }
 0x61e   :  { %v1286_v0 = vpop.f32.mrf.mxu3 }
 0x61f   :  { %v1292_v4 = vpack.c.bf16 %v1286_v0, %v1284_v22 }
 0x621   :  { %4109 = vmatmul.msk.bf16.gmra.mxu2 %vm992_vm12, %v1292_v4 }
 0x623   :  { %4136 = vmatmul.msk.bf16.gmra.mxu3 %vm198_vm4, %v5356_v36 }
 0x626   :  { %v1471_v58 = vpop.f32.mrf.mxu3 }
 0x627   :  { %v1521_v16 = vpack.c.bf16 %v1471_v58, %v1471_v58 }
 0x628   :  { %v1653_v52 = vpop.xlane.xlu2 %1652 }
 0x629   :  { %v1675_v35 = vsub.f32 %v1582_v30, %v1653_v52  ;;  %v1763_v52 = vunpack.c.l.b16 %v1521_v16 }
 0x62b   :  { %v1683_v31 = vmul.f32 1.442695, %v1675_v35 }
 0x62d   :  { %4598 = vpow2.f32 %v1683_v31 }
 0x62e   :  { %v1473_v49 = vpop.f32.mrf.mxu3 }
 0x62f   :  { %v1522_v56 = vpack.c.bf16 %v1473_v49, %v1473_v49 }
 0x630   :  { %v1656_v19 = vpop.xlane.xlu0 %1655 }
 0x631   :  { %v1676_v32 = vsub.f32 %v1584_v23, %v1656_v19  ;;  %v1764_v22 = vunpack.c.l.b16 %v1522_v56 }
 0x633   :  { %v5655_v27 = vpop.eup %4598  ;;  %v1685_v48 = vmul.f32 1.442695, %v1676_v32  ;;  %4137 = vmatmul.msk.bf16.gmra.mxu3 %vm198_vm4, %v5388_v3  ;;  %v1769_v19 = vpack.c.b16 %v1764_v22, %v1763_v52 }
 0x634   :  { %v1699_v24 = vsel %vm1086_vm8, %v5655_v27, 0.0 }
 0x635   :  { %4600 = vpow2.f32 %v1685_v48  ;;  %1700 = vadd.xlane.f32.xlu1 %v1699_v24 }
 0x636   :  { %v1476_v45 = vpop.f32.mrf.mxu3 }
 0x638   :  { %v1659_v28 = vpop.xlane.xlu1 %1658 }
 0x639   :  { %v1677_v40 = vsub.f32 %v1587_v20, %v1659_v28 }
 0x63b   :  { %v5661_v41 = vpop.eup %4600  ;;  %v1687_v8 = vmul.f32 1.442695, %v1677_v40 }
 0x63c   :  { %v1702_v39 = vsel %vm1086_vm8, %v5661_v41, 0.0 }
 0x63d   :  { %4602 = vpow2.f32 %v1687_v8  ;;  %1703 = vadd.xlane.f32.xlu2 %v1702_v39 }
 0x63e   :  { %v1478_v43 = vpop.f32.mrf.mxu3 }
 0x63f   :  { %v1524_v59 = vpack.c.bf16 %v1478_v43, %v1478_v43 }
 0x640   :  { %v1662_v7 = vpop.xlane.xlu2 %1661 }
 0x641   :  { %v1678_v13 = vsub.f32 %v5609_v10, %v1662_v7  ;;  %v1523_v10 = vpack.c.bf16 %v1476_v45, %v1476_v45  ;;  %v1766_v61 = vunpack.c.l.b16 %v1524_v59 }
 0x643   :  { %v5666_v30 = vpop.eup %4602  ;;  %v1689_v37 = vmul.f32 1.442695, %v1678_v13  ;;  %v1765_v44 = vunpack.c.l.b16 %v1523_v10 }
 0x644   :  { %v1705_v23 = vsel %vm1086_vm8, %v5666_v30, 0.0 }
 0x645   :  { %4604 = vpow2.f32 %v1689_v37  ;;  %1706 = vadd.xlane.f32.xlu0 %v1705_v23  ;;  %v1770_v0 = vpack.c.b16 %v1766_v61, %v1765_v44 }
 0x646   :  { %v1481_v2 = vpop.f32.mrf.mxu3 }
 0x647   :  { %v1525_v18 = vpack.c.bf16 %v1481_v2, %v1481_v2 }
 0x649   :  { %v1767_v9 = vunpack.c.l.b16 %v1525_v18 }
 0x64b   :  { %v5670_v20 = vpop.eup %4604 }
 0x64c   :  { %v1708_v53 = vsel %vm1086_vm8, %v5670_v20, 0.0 }
 0x64d   :  { %1709 = vadd.xlane.f32.xlu1 %v1708_v53 }
 0x64e   :  { %v1483_v34 = vpop.f32.mrf.mxu3 }
 0x64f   :  { %v1526_v38 = vpack.c.bf16 %v1483_v34, %v1483_v34 }
 0x651   :  { %v1768_v46 = vunpack.c.l.b16 %v1526_v38 }
 0x653   :  { %v1771_v11 = vpack.c.b16 %v1768_v46, %v1767_v9 }
 0x655   :  { %1786 = vmatpush.bf16.msrb.mxu1 %v1771_v11 }
 0x656   :  { %v1486_v55 = vpop.f32.mrf.mxu3 }
 0x657   :  { %v1527_v16 = vpack.c.bf16 %v1486_v55, %v1486_v55 }
 0x658   :  { %v1665_v4 = vpop.xlane.xlu0 %1664 }
 0x659   :  { %v1679_v35 = vsub.f32 %v5629_v26, %v1665_v4  ;;  %1787 = vmatpush.bf16.msrb.mxu1 %v1770_v0  ;;  %v1816_v4 = vunpack.c.l.b16 %v1527_v16 }
 0x65b   :  { %v1691_v31 = vmul.f32 1.442695, %v1679_v35 }
 0x65d   :  { %4606 = vpow2.f32 %v1691_v31  ;;  %1788 = vmatpush.bf16.msrb.mxu1 %v1769_v19 }
 0x65e   :  { %v1488_v32 = vpop.f32.mrf.mxu3 }
 0x65f   :  { %v1528_v56 = vpack.c.bf16 %v1488_v32, %v1488_v32 }
 0x660   :  { %v1668_v48 = vpop.xlane.xlu1 %1667 }
 0x661   :  { %v1680_v49 = vsub.f32 %v5633_v57, %v1668_v48  ;;  %v1817_v22 = vunpack.c.l.b16 %v1528_v56 }
 0x663   :  { %v5676_v24 = vpop.eup %4606  ;;  %v1693_v58 = vmul.f32 1.442695, %v1680_v49  ;;  %v1822_v52 = vpack.c.b16 %v1817_v22, %v1816_v4 }
 0x664   :  { %v1711_v45 = vsel %vm1086_vm8, %v5676_v24, 0.0 }
 0x665   :  { %4608 = vpow2.f32 %v1693_v58  ;;  %1712 = vadd.xlane.f32.xlu2 %v1711_v45 }
 0x666   :  { %v1491_v28 = vpop.f32.mrf.mxu3 }
 0x668   :  { %v1671_v40 = vpop.xlane.xlu2 %1670 }
 0x669   :  { %v1681_v26 = vsub.f32 %v5639_v29, %v1671_v40 }
 0x66b   :  { %v5681_v8 = vpop.eup %4608  ;;  %v1695_v39 = vmul.f32 1.442695, %v1681_v26 }
 0x66c   :  { %v1714_v43 = vsel %vm1086_vm8, %v5681_v8, 0.0 }
 0x66d   :  { %4610 = vpow2.f32 %v1695_v39  ;;  %1715 = vadd.xlane.f32.xlu0 %v1714_v43 }
 0x66e   :  { %v1493_v57 = vpop.f32.mrf.mxu3 }
 0x66f   :  { %v1530_v38 = vpack.c.bf16 %v1493_v57, %v1493_v57 }
 0x670   :  { %v1674_v7 = vpop.xlane.xlu0 %1673 }
 0x671   :  { %v1682_v13 = vsub.f32 %v5643_v21, %v1674_v7  ;;  %v1529_v21 = vpack.c.bf16 %v1491_v28, %v1491_v28  ;;  %v1819_v61 = vunpack.c.l.b16 %v1530_v38 }
 0x673   :  { %v5686_v37 = vpop.eup %4610  ;;  %v1697_v23 = vmul.f32 1.442695, %v1682_v13  ;;  %v1818_v44 = vunpack.c.l.b16 %v1529_v21 }
 0x674   :  { %v1717_v2 = vsel %vm1086_vm8, %v5686_v37, 0.0 }
 0x675   :  { %4612 = vpow2.f32 %v1697_v23  ;;  %1718 = vadd.xlane.f32.xlu1 %v1717_v2  ;;  %v1823_v0 = vpack.c.b16 %v1819_v61, %v1818_v44 }
 0x676   :  { %v1496_v29 = vpop.f32.mrf.mxu3 }
 0x677   :  { %v1531_v34 = vpack.c.bf16 %v1496_v29, %v1496_v29 }
 0x679   :  { %v1820_v9 = vunpack.c.l.b16 %v1531_v34 }
 0x67b   :  { %v5690_v53 = vpop.eup %4612 }
 0x67c   :  { %v1720_v18 = vsel %vm1086_vm8, %v5690_v53, 0.0 }
 0x67d   :  { %1721 = vadd.xlane.f32.xlu2 %v1720_v18 }
 0x67e   :  { %v1498_v59 = vpop.f32.mrf.mxu3 }
 0x67f   :  { %v1532_v10 = vpack.c.bf16 %v1498_v59, %v1498_v59  ;;  %v4460_v59 = vld [vmem:[%s6366_s8 + $0x58] sm:$0xff] }
 0x681   :  { %v1821_v46 = vunpack.c.l.b16 %v1532_v10  ;;  %v4458_v10 = vld [vmem:[%s6366_s8 + $0x48] sm:$0xff] }
 0x683   :  { %v1824_v11 = vpack.c.b16 %v1821_v46, %v1820_v9 }
 0x685   :  { %1839 = vmatpush.bf16.msrb.mxu0 %v1824_v11  ;;  %v4457_v11 = vld [vmem:[%s6366_s8 + $0x40] sm:$0xff] }
 0x689   :  { %1840 = vmatpush.bf16.msrb.mxu0 %v1823_v0 }
 0x68d   :  { %1841 = vmatpush.bf16.msrb.mxu0 %v1822_v52 }
 0x691   :  { %2053 = vmatpush.bf16.msra.mxu0 %v4460_v59 }
 0x6a8   :  { %v1701_v35 = vpop.xlane.xlu1 %1700 }
 0x6a9   :  { %4614 = vrcp.f32 %v1701_v35 }
 0x6af   :  { %v4615_v19 = vpop.eup %4614 }
 0x6b0   :  { %v1704_v31 = vpop.xlane.xlu2 %1703  ;;  %v1731_v48 = vmul.f32 %v4615_v19, %v5655_v27 }
 0x6b1   :  { %4616 = vrcp.f32 %v1704_v31 }
 0x6b2   :  { %v1739_v32 = vpack.c.bf16 %v1731_v48, %v1731_v48 }
 0x6b4   :  { %v1751_v28 = vunpack.c.l.b16 %v1739_v32 }
 0x6b7   :  { %v4617_v49 = vpop.eup %4616 }
 0x6b8   :  { %v1732_v58 = vmul.f32 %v4617_v49, %v5661_v41  ;;  %v1707_v55 = vpop.xlane.xlu0 %1706 }
 0x6b9   :  { %4618 = vrcp.f32 %v1707_v55 }
 0x6ba   :  { %v1740_v45 = vpack.c.bf16 %v1732_v58, %v1732_v58 }
 0x6bc   :  { %v1752_v40 = vunpack.c.l.b16 %v1740_v45 }
 0x6be   :  { %v1755_v26 = vpack.c.b16 %v1752_v40, %v1751_v28  ;;  %v4464_v40 = vld [vmem:[%s6367_s9 + $0x58] sm:$0xff] }
 0x6bf   :  { %v4619_v43 = vpop.eup %4618 }
 0x6c0   :  { %v1710_v39 = vpop.xlane.xlu1 %1709  ;;  %4088 = vmatmul.msk.bf16.vlgmr.msrb.gmra.mxu1 %vm1086_vm8, %v1755_v26  ;;  %v1733_v57 = vmul.f32 %v4619_v43, %v5666_v30  ;;  %v4459_v30 = vld [vmem:[%s6366_s8 + $0x50] sm:$0xff]  ;;  %v4462_v43 = vld [vmem:[%s6367_s9 + $0x48] sm:$0xff] }
 0x6c1   :  { %4620 = vrcp.f32 %v1710_v39  ;;  %2054 = vmatpush.bf16.msra.mxu0 %v4459_v30  ;;  %v4463_v39 = vld [vmem:[%s6367_s9 + $0x50] sm:$0xff] }
 0x6c2   :  { %v1741_v13 = vpack.c.bf16 %v1733_v57, %v1733_v57 }
 0x6c4   :  { %v1753_v2 = vunpack.c.l.b16 %v1741_v13  ;;  %v4461_v13 = vld [vmem:[%s6367_s9 + $0x40] sm:$0xff] }
 0x6c5   :  { %2055 = vmatpush.bf16.msra.mxu0 %v4458_v10 }
 0x6c7   :  { %v4621_v7 = vpop.eup %4620 }
 0x6c8   :  { %v1734_v27 = vmul.f32 %v4621_v7, %v5670_v20 }
 0x6c9   :  { %2056 = vmatpush.bf16.msra.mxu0 %v4457_v11 }
 0x6ca   :  { %v1742_v23 = vpack.c.bf16 %v1734_v27, %v1734_v27 }
 0x6cc   :  { %v1754_v41 = vunpack.c.l.b16 %v1742_v23 }
 0x6ce   :  { %v1756_v29 = vpack.c.b16 %v1754_v41, %v1753_v2 }
 0x6d0   :  { %4089 = vmatmul.msk.bf16.gmra.mxu1 %vm1086_vm8, %v1756_v29 }
 0x6d8   :  { %v1713_v18 = vpop.xlane.xlu2 %1712 }
 0x6d9   :  { %4622 = vrcp.f32 %v1713_v18 }
 0x6df   :  { %v4623_v38 = vpop.eup %4622 }
 0x6e0   :  { %v1716_v34 = vpop.xlane.xlu0 %1715  ;;  %v1735_v20 = vmul.f32 %v4623_v38, %v5676_v24  ;;  %v1996_v38 = vpop.f32.mrf.mxu3 }
 0x6e1   :  { %4624 = vrcp.f32 %v1716_v34 }
 0x6e2   :  { %v1743_v9 = vpack.c.bf16 %v1735_v20, %v1735_v20 }
 0x6e4   :  { %v1804_v16 = vunpack.c.l.b16 %v1743_v9 }
 0x6e7   :  { %v4625_v21 = vpop.eup %4624 }
 0x6e8   :  { %v1736_v46 = vmul.f32 %v4625_v21, %v5681_v8  ;;  %v1719_v56 = vpop.xlane.xlu1 %1718  ;;  %v1998_v11 = vpop.f32.mrf.mxu3 }
 0x6e9   :  { %4626 = vrcp.f32 %v1719_v56 }
 0x6ea   :  { %v1744_v61 = vpack.c.bf16 %v1736_v46, %v1736_v46 }
 0x6ec   :  { %v1805_v44 = vunpack.c.l.b16 %v1744_v61 }
 0x6ee   :  { %v1808_v24 = vpack.c.b16 %v1805_v44, %v1804_v16 }
 0x6ef   :  { %v4627_v0 = vpop.eup %4626 }
 0x6f0   :  { %4090 = vmatmul.msk.bf16.vlgmr.msrb.gmra.mxu0 %vm1086_vm8, %v1808_v24  ;;  %v1722_v22 = vpop.xlane.xlu2 %1721  ;;  %v1737_v4 = vmul.f32 %v4627_v0, %v5686_v37  ;;  %v4452_v37 = vld [vmem:[%s6368_s10 + $0x8] sm:$0xff] }
 0x6f1   :  { %4628 = vrcp.f32 %v1722_v22  ;;  %1885 = vmatpush.bf16.msra.mxu1 %v4452_v37  ;;  %v2161_v37 = vpack.c.bf16 %v1998_v11, %v1998_v11 }
 0x6f2   :  { %v1745_v52 = vpack.c.bf16 %v1737_v4, %v1737_v4 }
 0x6f4   :  { %v1806_v19 = vunpack.c.l.b16 %v1745_v52 }
 0x6f5   :  { %2125 = vmatpush.bf16.msrb.mxu1 %v4464_v40 }
 0x6f7   :  { %v4629_v8 = vpop.eup %4628 }
 0x6f8   :  { %v1738_v35 = vmul.f32 %v4629_v8, %v5690_v53 }
 0x6f9   :  { %2126 = vmatpush.bf16.msrb.mxu1 %v4463_v39 }
 0x6fa   :  { %v1746_v31 = vpack.c.bf16 %v1738_v35, %v1738_v35 }
 0x6fc   :  { %v1807_v48 = vunpack.c.l.b16 %v1746_v31  ;;  %v2001_v31 = vpop.f32.mrf.mxu3 }
 0x6fd   :  { %2127 = vmatpush.bf16.msrb.mxu1 %v4462_v43 }
 0x6fe   :  { %v1809_v49 = vpack.c.b16 %v1807_v48, %v1806_v19 }
 0x700   :  { %4091 = vmatmul.msk.bf16.gmra.mxu0 %vm1086_vm8, %v1809_v49 }
 0x701   :  { %2128 = vmatpush.bf16.msrb.mxu1 %v4461_v13  ;;  %v2162_v13 = vpack.c.bf16 %v2001_v31, %v2001_v31 }
 0x710   :  { %4162 = vmatmul.msk.bf16.vlgmr.msra.gmra.mxu0 %vm198_vm4, %v5212_v14 }
 0x720   :  { %4163 = vmatmul.msk.bf16.gmra.mxu0 %vm198_vm4, %v5160_v63 }
 0x730   :  { %4164 = vmatmul.msk.bf16.gmra.mxu0 %vm198_vm4, %v5205_v12 }
 0x73d   :  { %v1790_v53 = vpop.f32.mrf.mxu1 }
 0x740   :  { %4165 = vmatmul.msk.bf16.gmra.mxu0 %vm198_vm4, %v5420_v62 }
 0x745   :  { %v1792_v32 = vpop.f32.mrf.mxu1 }
 0x746   :  { %v1853_v58 = vpack.c.bf16 %v1792_v32, %v1790_v53  ;;  %v2160_v53 = vpack.c.bf16 %v1996_v38, %v1996_v38 }
 0x748   :  { %4098 = vmatmul.msk.bf16.vlgmr.msra.gmra.mxu1 %vm992_vm12, %v1853_v58  ;;  %v2196_v40 = vunpack.c.l.b16 %v2160_v53  ;;  %v4477_v53 = vld [vmem:[%s6367_s9 + $0x78] sm:$0xff] }
 0x74d   :  { %v1795_v55 = vpop.f32.mrf.mxu1 }
 0x750   :  { %4166 = vmatmul.msk.bf16.gmra.mxu0 %vm198_vm4, %v5438_v25 }
 0x755   :  { %v1797_v45 = vpop.f32.mrf.mxu1 }
 0x756   :  { %v1854_v28 = vpack.c.bf16 %v1797_v45, %v1795_v55  ;;  %v2197_v55 = vunpack.c.l.b16 %v2161_v37  ;;  %v2003_v45 = vpop.f32.mrf.mxu3 }
 0x758   :  { %4099 = vmatmul.msk.bf16.gmra.mxu1 %vm992_vm12, %v1854_v28 }
 0x75e   :  { %v2006_v43 = vpop.f32.mrf.mxu3 }
 0x760   :  { %4167 = vmatmul.msk.bf16.gmra.mxu0 %vm198_vm4, %v5452_v47 }
 0x76d   :  { %v1843_v26 = vpop.f32.mrf.mxu0 }
 0x775   :  { %v1845_v57 = vpop.f32.mrf.mxu0 }
 0x776   :  { %v1855_v7 = vpack.c.bf16 %v1845_v57, %v1843_v26  ;;  %v2200_v26 = vpack.c.b16 %v2197_v55, %v2196_v40  ;;  %v4476_v40 = vld [vmem:[%s6367_s9 + $0x70] sm:$0xff] }
 0x778   :  { %4100 = vmatmul.msk.bf16.gmra.mxu1 %vm992_vm12, %v1855_v7  ;;  %v2163_v7 = vpack.c.bf16 %v2003_v45, %v2003_v45 }
 0x77d   :  { %v1848_v27 = vpop.f32.mrf.mxu0 }
 0x785   :  { %v1850_v23 = vpop.f32.mrf.mxu0 }
 0x786   :  { %v1856_v2 = vpack.c.bf16 %v1850_v23, %v1848_v27  ;;  %v2199_v23 = vunpack.c.l.b16 %v2163_v7 }
 0x788   :  { %4101 = vmatmul.msk.bf16.gmra.mxu1 %vm992_vm12, %v1856_v2  ;;  %v2198_v2 = vunpack.c.l.b16 %v2162_v13 }
 0x78d   :  { %v2058_v41 = vpop.f32.mrf.mxu0 }
 0x78e   :  { %v2168_v8 = vpack.c.bf16 %v2058_v41, %v2058_v41  ;;  %v2201_v41 = vpack.c.b16 %v2199_v23, %v2198_v2  ;;  %v4474_v23 = vld [vmem:[%s6367_s9 + $0x60] sm:$0xff] }
 0x790   :  { %v2208_v48 = vunpack.c.l.b16 %v2168_v8 }
 0x795   :  { %v2060_v29 = vpop.f32.mrf.mxu0 }
 0x796   :  { %v2169_v0 = vpack.c.bf16 %v2060_v29, %v2060_v29  ;;  %v2008_v29 = vpop.f32.mrf.mxu3 }
 0x798   :  { %4192 = vmatmul.msk.bf16.vlgmr.msrb.gmra.mxu1 %vm198_vm4, %v5212_v14  ;;  %v2209_v52 = vunpack.c.l.b16 %v2169_v0 }
 0x79a   :  { %v2214_v49 = vpack.c.b16 %v2209_v52, %v2208_v48 }
 0x79c   :  { %v2224_v32 = vsel %vm992_vm12, %v2214_v49, 0  ;;  %v2165_v49 = vpack.c.bf16 %v2008_v29, %v2008_v29 }
 0x79d   :  { %v2063_v18 = vpop.f32.mrf.mxu0 }
 0x79e   :  { %v2170_v56 = vpack.c.bf16 %v2063_v18, %v2063_v18  ;;  %v2256_v55 = vunpack.c.l.b16 %v2165_v49 }
 0x7a0   :  { %v2210_v22 = vunpack.c.l.b16 %v2170_v56 }
 0x7a5   :  { %v2065_v34 = vpop.f32.mrf.mxu0 }
 0x7a6   :  { %v2171_v21 = vpack.c.bf16 %v2065_v34, %v2065_v34 }
 0x7a8   :  { %4193 = vmatmul.msk.bf16.gmra.mxu1 %vm198_vm4, %v5160_v63  ;;  %v2211_v16 = vunpack.c.l.b16 %v2171_v21 }
 0x7aa   :  { %v2215_v4 = vpack.c.b16 %v2211_v16, %v2210_v22 }
 0x7ac   :  { %v2227_v35 = vsel %vm992_vm12, %v2215_v4, 0 }
 0x7ad   :  { %v2068_v59 = vpop.f32.mrf.mxu0 }
 0x7ae   :  { %v2172_v30 = vpack.c.bf16 %v2068_v59, %v2068_v59 }
 0x7b0   :  { %v2212_v9 = vunpack.c.l.b16 %v2172_v30 }
 0x7b5   :  { %v2070_v20 = vpop.f32.mrf.mxu0 }
 0x7b6   :  { %v2173_v10 = vpack.c.bf16 %v2070_v20, %v2070_v20 }
 0x7b8   :  { %v2213_v46 = vunpack.c.l.b16 %v2173_v10  ;;  %4194 = vmatmul.msk.bf16.gmra.mxu1 %vm198_vm4, %v5205_v12 }
 0x7ba   :  { %v2216_v61 = vpack.c.b16 %v2213_v46, %v2212_v9 }
 0x7bc   :  { %v2230_v44 = vsel %vm992_vm12, %v2216_v61, 0  ;;  %v2011_v61 = vpop.f32.mrf.mxu3 }
 0x7bd   :  { %v2073_v24 = vpop.f32.mrf.mxu0  ;;  %2237 = vmatpush.bf16.xpose.msrb.mxu2 %v2230_v44 }
 0x7be   :  { %v2174_v0 = vpack.c.bf16 %v2073_v24, %v2073_v24 }
 0x7c4   :  { %v2013_v31 = vpop.f32.mrf.mxu3 }
 0x7c5   :  { %v2075_v19 = vpop.f32.mrf.mxu0  ;;  %2238 = vmatpush.bf16.xpose.msrb.mxu2 %v2227_v35  ;;  %v5760_v28 = vpop.f32.mrf.mxu1  ;;  %v2267_v35 = vunpack.c.l.b16 %v2174_v0  ;;  %v2167_v37 = vpack.c.bf16 %v2013_v31, %v2013_v31 }
 0x7c6   :  { %v2175_v44 = vpack.c.bf16 %v2075_v19, %v2075_v19  ;;  %v2166_v19 = vpack.c.bf16 %v2011_v61, %v2011_v61 }
 0x7c7   :  { %v2258_v45 = vunpack.c.l.b16 %v2167_v37 }
 0x7c8   :  { %4195 = vmatmul.msk.bf16.gmra.mxu1 %vm198_vm4, %v5420_v62  ;;  %v2268_v4 = vunpack.c.l.b16 %v2175_v44 }
 0x7ca   :  { %v2273_v48 = vpack.c.b16 %v2268_v4, %v2267_v35 }
 0x7cc   :  { %v2283_v24 = vsel %vm992_vm12, %v2273_v48, 0  ;;  %v5807_v48 = vpop.f32.mrf.mxu2 }
 0x7cd   :  { %v2078_v58 = vpop.f32.mrf.mxu0  ;;  %2239 = vmatpush.bf16.xpose.msrb.mxu2 %v2224_v32  ;;  %v5765_v57 = vpop.f32.mrf.mxu1  ;;  %v2164_v32 = vpack.c.bf16 %v2006_v43, %v2006_v43  ;;  %v4475_v43 = vld [vmem:[%s6367_s9 + $0x68] sm:$0xff] }
 0x7ce   :  { %v2176_v21 = vpack.c.bf16 %v2078_v58, %v2078_v58 }
 0x7d0   :  { %v2269_v16 = vunpack.c.l.b16 %v2176_v21 }
 0x7d4   :  { %4198 = vmatmul.msk.bf16.vlgmr.msrb.gmra.mxu2 %vm992_vm12, %v2200_v26  ;;  %v2255_v26 = vunpack.c.l.b16 %v2164_v32 }
 0x7d5   :  { %v2080_v39 = vpop.f32.mrf.mxu0  ;;  %v5767_v18 = vpop.f32.mrf.mxu1 }
 0x7d6   :  { %v2177_v30 = vpack.c.bf16 %v2080_v39, %v2080_v39  ;;  %v2257_v39 = vunpack.c.l.b16 %v2166_v19  ;;  %v2259_v7 = vpack.c.b16 %v2256_v55, %v2255_v26 }
 0x7d8   :  { %4196 = vmatmul.msk.bf16.gmra.mxu1 %vm198_vm4, %v5438_v25  ;;  %v2270_v46 = vunpack.c.l.b16 %v2177_v30  ;;  %v2260_v13 = vpack.c.b16 %v2258_v45, %v2257_v39 }
 0x7da   :  { %v2274_v22 = vpack.c.b16 %v2270_v46, %v2269_v16 }
 0x7dc   :  { %v2286_v8 = vsel %vm992_vm12, %v2274_v22, 0 }
 0x7dd   :  { %v2083_v27 = vpop.f32.mrf.mxu0  ;;  %v5773_v11 = vpop.f32.mrf.mxu1 }
 0x7de   :  { %v2178_v34 = vpack.c.bf16 %v2083_v27, %v2083_v27 }
 0x7e0   :  { %v2271_v20 = vunpack.c.l.b16 %v2178_v34 }
 0x7e4   :  { %4199 = vmatmul.msk.bf16.gmra.mxu2 %vm992_vm12, %v2201_v41 }
 0x7e5   :  { %v2085_v59 = vpop.f32.mrf.mxu0 }
 0x7e6   :  { %v2179_v38 = vpack.c.bf16 %v2085_v59, %v2085_v59 }
 0x7e8   :  { %v2272_v10 = vunpack.c.l.b16 %v2179_v38  ;;  %4197 = vmatmul.msk.bf16.gmra.mxu1 %vm198_vm4, %v5452_v47 }
 0x7ea   :  { %v2275_v9 = vpack.c.b16 %v2272_v10, %v2271_v20 }
 0x7ec   :  { %v2289_v56 = vsel %vm992_vm12, %v2275_v9, 0 }
 0x7ed   :  { %2296 = vmatpush.bf16.xpose.msra.mxu1 %v2289_v56  ;;  %4507 = vmatpush.bf16.xpose.msra.mxu3 %v2289_v56 }
 0x7f5   :  { %v5776_v52 = vpop.f32.mrf.mxu1  ;;  %2297 = vmatpush.bf16.xpose.msra.mxu1 %v2286_v8  ;;  %4508 = vmatpush.bf16.xpose.msra.mxu3 %v2286_v8 }
 0x7fd   :  { %v5782_v58 = vpop.f32.mrf.mxu1  ;;  %2298 = vmatpush.bf16.xpose.msra.mxu1 %v2283_v24  ;;  %4509 = vmatpush.bf16.xpose.msra.mxu3 %v2283_v24 }
 0x804   :  { %4200 = vmatmul.msk.bf16.vlgmr.msra.gmra.mxu1 %vm992_vm12, %v2259_v7  ;;  %4201 = vmatmul.msk.bf16.vlgmr.msra.gmra.mxu3 %vm992_vm12, %v2260_v13 }
 0x805   :  { %2745 = vmatpush.bf16.msrb.mxu1 %v4477_v53  ;;  %v5792_v27 = vpop.f32.mrf.mxu1  ;;  %v5809_v53 = vpop.f32.mrf.mxu2 }
 0x809   :  { %2746 = vmatpush.bf16.msrb.mxu1 %v4476_v40 }
 0x80d   :  { %2747 = vmatpush.bf16.msrb.mxu1 %v4475_v43  ;;  %v5797_v2 = vpop.f32.mrf.mxu1  ;;  %v5813_v19 = vpop.f32.mrf.mxu2 }
 0x811   :  { %2748 = vmatpush.bf16.msrb.mxu1 %v4474_v23 }
 0x814   :  { %4298 = vmatmul.msk.bf16.vlgmr.msrb.gmra.mxu1 %vm198_vm4, %v5212_v14 }
 0x815   :  { %v2130_v41 = vpop.f32.mrf.mxu1  ;;  %v5817_v45 = vpop.f32.mrf.mxu2 }
 0x816   :  { %v2180_v22 = vpack.c.bf16 %v2130_v41, %v2130_v41 }
 0x818   :  { %v2422_v31 = vunpack.c.l.b16 %v2180_v22 }
 0x81d   :  { %v2132_v29 = vpop.f32.mrf.mxu1  ;;  %v5819_v13 = vpop.f32.mrf.mxu2 }
 0x81e   :  { %v2181_v61 = vpack.c.bf16 %v2132_v29, %v2132_v29 }
 0x820   :  { %v2423_v8 = vunpack.c.l.b16 %v2181_v61 }
 0x822   :  { %v2428_v49 = vpack.c.b16 %v2423_v8, %v2422_v31 }
 0x824   :  { %4299 = vmatmul.msk.bf16.gmra.mxu1 %vm198_vm4, %v5160_v63 }
 0x825   :  { %v2135_v34 = vpop.f32.mrf.mxu1 }
 0x826   :  { %v2182_v9 = vpack.c.bf16 %v2135_v34, %v2135_v34 }
 0x828   :  { %v2424_v0 = vunpack.c.l.b16 %v2182_v9  ;;  %v5821_v9 = vpop.f32.mrf.mxu2 }
 0x82d   :  { %v2137_v59 = vpop.f32.mrf.mxu1 }
 0x82e   :  { %v2183_v10 = vpack.c.bf16 %v2137_v59, %v2137_v59 }
 0x830   :  { %v2425_v16 = vunpack.c.l.b16 %v2183_v10 }
 0x832   :  { %v2429_v35 = vpack.c.b16 %v2425_v16, %v2424_v0  ;;  %v5824_v16 = vpop.f32.mrf.mxu2 }
 0x834   :  { %4300 = vmatmul.msk.bf16.gmra.mxu1 %vm198_vm4, %v5205_v12 }
 0x835   :  { %v2140_v38 = vpop.f32.mrf.mxu1 }
 0x836   :  { %v2184_v30 = vpack.c.bf16 %v2140_v38, %v2140_v38 }
 0x838   :  { %v2426_v46 = vunpack.c.l.b16 %v2184_v30 }
 0x83a   :  { %v5828_v8 = vpop.f32.mrf.mxu2 }
 0x83d   :  { %v2142_v20 = vpop.f32.mrf.mxu1 }
 0x83e   :  { %v2185_v21 = vpack.c.bf16 %v2142_v20, %v2142_v20 }
 0x840   :  { %v2427_v56 = vunpack.c.l.b16 %v2185_v21 }
 0x842   :  { %v2430_v44 = vpack.c.b16 %v2427_v56, %v2426_v46 }
 0x844   :  { %2445 = vmatpush.bf16.msra.mxu2 %v2430_v44  ;;  %4301 = vmatmul.msk.bf16.gmra.mxu1 %vm198_vm4, %v5420_v62 }
 0x845   :  { %v2145_v4 = vpop.f32.mrf.mxu1 }
 0x846   :  { %v2186_v38 = vpack.c.bf16 %v2145_v4, %v2145_v4 }
 0x848   :  { %2446 = vmatpush.bf16.msra.mxu2 %v2429_v35  ;;  %v2475_v21 = vunpack.c.l.b16 %v2186_v38 }
 0x84c   :  { %2447 = vmatpush.bf16.msra.mxu2 %v2428_v49 }
 0x84d   :  { %v2147_v37 = vpop.f32.mrf.mxu1 }
 0x84e   :  { %v2187_v29 = vpack.c.bf16 %v2147_v37, %v2147_v37 }
 0x850   :  { %v2476_v20 = vunpack.c.l.b16 %v2187_v29 }
 0x852   :  { %v2481_v46 = vpack.c.b16 %v2476_v20, %v2475_v21 }
 0x854   :  { %4302 = vmatmul.msk.bf16.gmra.mxu1 %vm198_vm4, %v5438_v25 }
 0x855   :  { %v2150_v32 = vpop.f32.mrf.mxu1 }
 0x856   :  { %v2188_v43 = vpack.c.bf16 %v2150_v32, %v2150_v32 }
 0x857   :  { %v2241_v37 = vpop.f32.mrf.mxu2 }
 0x858   :  { %v2477_v30 = vunpack.c.l.b16 %v2188_v43 }
 0x85d   :  { %v2152_v24 = vpop.f32.mrf.mxu1 }
 0x85e   :  { %v2189_v39 = vpack.c.bf16 %v2152_v24, %v2152_v24  ;;  %v2310_v24 = vsel %vm1086_vm8, %v2241_v37, -inf }
 0x85f   :  { %v2243_v21 = vpop.f32.mrf.mxu2 }
 0x860   :  { %v2478_v34 = vunpack.c.l.b16 %v2189_v39 }
 0x862   :  { %v2482_v10 = vpack.c.b16 %v2478_v34, %v2477_v30 }
 0x864   :  { %4303 = vmatmul.msk.bf16.gmra.mxu1 %vm198_vm4, %v5452_v47 }
 0x865   :  { %v2155_v55 = vpop.f32.mrf.mxu1 }
 0x866   :  { %v2190_v40 = vpack.c.bf16 %v2155_v55, %v2155_v55 }
 0x868   :  { %v2479_v23 = vunpack.c.l.b16 %v2190_v40 }
 0x86d   :  { %v2157_v26 = vpop.f32.mrf.mxu1 }
 0x86e   :  { %v2191_v7 = vpack.c.bf16 %v2157_v26, %v2157_v26 }
 0x870   :  { %v2480_v41 = vunpack.c.l.b16 %v2191_v7 }
 0x872   :  { %v2483_v59 = vpack.c.b16 %v2480_v41, %v2479_v23 }
 0x874   :  { %2498 = vmatpush.bf16.msrb.mxu3 %v2483_v59 }
 0x878   :  { %2499 = vmatpush.bf16.msrb.mxu3 %v2482_v10 }
 0x87c   :  { %2500 = vmatpush.bf16.msrb.mxu3 %v2481_v46 }
 0x881   :  { %v2300_v56 = vpop.f32.mrf.mxu1 }
 0x882   :  { %v2322_v61 = vsel %vm1086_vm8, %v2300_v56, -inf }
 0x883   :  { %2323 = vmax.xlane.f32.xlu0 %v2322_v61 }
 0x887   :  { %v2305_v44 = vpop.f32.mrf.mxu3 }
 0x888   :  { %v2328_v22 = vsel %vm1086_vm8, %v2305_v44, -inf }
 0x889   :  { %2329 = vmax.xlane.f32.xlu2 %v2328_v22  ;;  %v2302_v0 = vpop.f32.mrf.mxu1 }
 0x88a   :  { %v2325_v4 = vsel %vm1086_vm8, %v2302_v0, -inf }
 0x88b   :  { %2326 = vmax.xlane.f32.xlu1 %v2325_v4 }
 0x88f   :  { %v2307_v35 = vpop.f32.mrf.mxu3 }
 0x890   :  { %v2331_v31 = vsel %vm1086_vm8, %v2307_v35, -inf }
 0x891   :  { %2332 = vmax.xlane.f32.xlu0 %v2331_v31  ;;  %v2750_v49 = vpop.f32.mrf.mxu1 }
 0x892   :  { %v2800_v32 = vpack.c.bf16 %v2750_v49, %v2750_v49 }
 0x894   :  { %v5832_v26 = vunpack.c.l.b16 %v2800_v32 }
 0x899   :  { %2311 = vmax.xlane.f32.xlu0 %v2310_v24  ;;  %v2752_v55 = vpop.f32.mrf.mxu1 }
 0x89a   :  { %v2801_v40 = vpack.c.bf16 %v2752_v55, %v2752_v55 }
 0x89c   :  { %v5834_v39 = vunpack.c.l.b16 %v2801_v40 }
 0x89e   :  { %v3048_v7 = vpack.c.b16 %v5834_v39, %v5832_v26 }
 0x8f6   :  { %v2324_v43 = vpop.xlane.xlu0 %2323 }
 0x8f7   :  { %v2338_v23 = vsub.f32 %v2300_v56, %v2324_v43  ;;  %v2313_v56 = vsel %vm1086_vm8, %v2243_v21, -inf }
 0x8f9   :  { %v2350_v41 = vmul.f32 1.442695, %v2338_v23 }
 0x8fb   :  { %4630 = vpow2.f32 %v2350_v41 }
 0x8fc   :  { %v2330_v29 = vpop.xlane.xlu2 %2329 }
 0x8fd   :  { %v2340_v38 = vsub.f32 %v2305_v44, %v2330_v29 }
 0x8fe   :  { %v2327_v34 = vpop.xlane.xlu1 %2326 }
 0x8ff   :  { %v2339_v59 = vsub.f32 %v2302_v0, %v2327_v34  ;;  %v2354_v46 = vmul.f32 1.442695, %v2340_v38  ;;  %v2246_v0 = vpop.f32.mrf.mxu2 }
 0x901   :  { %v4631_v30 = vpop.eup %4630  ;;  %v2352_v20 = vmul.f32 1.442695, %v2339_v59 }
 0x902   :  { %v2370_v10 = vsel %vm1086_vm8, %v4631_v30, 0.0 }
 0x903   :  { %4632 = vpow2.f32 %v2352_v20  ;;  %2371 = vadd.xlane.f32.xlu1 %v2370_v10  ;;  %v4473_v10 = vld [vmem:[%s6366_s8 + $0x78] sm:$0xff] }
 0x904   :  { %v2333_v61 = vpop.xlane.xlu0 %2332  ;;  %4634 = vpow2.f32 %v2354_v46  ;;  %2673 = vmatpush.bf16.msra.mxu3 %v4473_v10 }
 0x905   :  { %v2341_v22 = vsub.f32 %v2307_v35, %v2333_v61  ;;  %v2316_v35 = vsel %vm1086_vm8, %v2246_v0, -inf }
 0x907   :  { %v2356_v4 = vmul.f32 1.442695, %v2341_v22  ;;  %v2248_v29 = vpop.f32.mrf.mxu2  ;;  %v4472_v22 = vld [vmem:[%s6366_s8 + $0x70] sm:$0xff] }
 0x908   :  { %2674 = vmatpush.bf16.msra.mxu3 %v4472_v22 }
 0x909   :  { %v4633_v31 = vpop.eup %4632  ;;  %4636 = vpow2.f32 %v2356_v4 }
 0x90a   :  { %v2373_v49 = vsel %vm1086_vm8, %v4633_v31, 0.0  ;;  %v4635_v24 = vpop.eup %4634 }
 0x90b   :  { %2314 = vmax.xlane.f32.xlu1 %v2313_v56  ;;  %2374 = vadd.xlane.f32.xlu2 %v2373_v49  ;;  %v2376_v23 = vsel %vm1086_vm8, %v4635_v24, 0.0  ;;  %v4471_v49 = vld [vmem:[%s6366_s8 + $0x68] sm:$0xff] }
 0x90c   :  { %v2312_v44 = vpop.xlane.xlu0 %2311  ;;  %2675 = vmatpush.bf16.msra.mxu3 %v4471_v49 }
 0x90d   :  { %v2334_v32 = vsub.f32 %v2241_v37, %v2312_v44  ;;  %v2319_v37 = vsel %vm1086_vm8, %v2248_v29, -inf }
 0x90f   :  { %v4637_v55 = vpop.eup %4636  ;;  %v2342_v40 = vmul.f32 1.442695, %v2334_v32 }
 0x910   :  { %v2379_v43 = vsel %vm1086_vm8, %v4637_v55, 0.0 }
 0x911   :  { %4638 = vpow2.f32 %v2342_v40  ;;  %2380 = vadd.xlane.f32.xlu0 %v2379_v43 }
 0x913   :  { %2317 = vmax.xlane.f32.xlu1 %v2316_v35  ;;  %2377 = vadd.xlane.f32.xlu2 %v2376_v23 }
 0x917   :  { %v5844_v41 = vpop.eup %4638 }
 0x918   :  { %v2358_v34 = vsel %vm1086_vm8, %v5844_v41, 0.0 }
 0x919   :  { %2359 = vadd.xlane.f32.xlu0 %v2358_v34 }
 0x91b   :  { %2320 = vmax.xlane.f32.xlu2 %v2319_v37 }
 0x976   :  { %v2372_v59 = vpop.xlane.xlu1 %2371 }
 0x977   :  { %4640 = vrcp.f32 %v2372_v59 }
 0x97d   :  { %v4641_v46 = vpop.eup %4640 }
 0x97e   :  { %v2375_v38 = vpop.xlane.xlu2 %2374  ;;  %v2315_v20 = vpop.xlane.xlu1 %2314  ;;  %v2394_v56 = vmul.f32 %v4641_v46, %v4631_v30  ;;  %v4470_v30 = vld [vmem:[%s6366_s8 + $0x60] sm:$0xff] }
 0x97f   :  { %4642 = vrcp.f32 %v2375_v38  ;;  %v2335_v61 = vsub.f32 %v2243_v21, %v2315_v20  ;;  %2676 = vmatpush.bf16.msra.mxu3 %v4470_v30 }
 0x980   :  { %v2402_v40 = vpack.c.bf16 %v2394_v56, %v2394_v56 }
 0x981   :  { %v2344_v4 = vmul.f32 1.442695, %v2335_v61 }
 0x982   :  { %v2463_v38 = vunpack.c.l.b16 %v2402_v40 }
 0x983   :  { %4644 = vpow2.f32 %v2344_v4 }
 0x984   :  { %v2381_v32 = vpop.xlane.xlu0 %2380 }
 0x985   :  { %v4643_v44 = vpop.eup %4642 }
 0x986   :  { %v2395_v43 = vmul.f32 %v4643_v44, %v4633_v31  ;;  %v2378_v35 = vpop.xlane.xlu2 %2377  ;;  %v2318_v23 = vpop.xlane.xlu1 %2317 }
 0x987   :  { %4646 = vrcp.f32 %v2378_v35  ;;  %v2336_v21 = vsub.f32 %v2246_v0, %v2318_v23 }
 0x988   :  { %v2403_v34 = vpack.c.bf16 %v2395_v43, %v2395_v43  ;;  %4648 = vrcp.f32 %v2381_v32 }
 0x989   :  { %v4645_v37 = vpop.eup %4644  ;;  %v2346_v59 = vmul.f32 1.442695, %v2336_v21 }
 0x98a   :  { %v2464_v20 = vunpack.c.l.b16 %v2403_v34  ;;  %v2361_v10 = vsel %vm1086_vm8, %v4645_v37, 0.0 }
 0x98b   :  { %4650 = vpow2.f32 %v2346_v59  ;;  %2362 = vadd.xlane.f32.xlu1 %v2361_v10 }
 0x98c   :  { %v2467_v31 = vpack.c.b16 %v2464_v20, %v2463_v38 }
 0x98d   :  { %v4647_v46 = vpop.eup %4646 }
 0x98e   :  { %v2321_v61 = vpop.xlane.xlu2 %2320  ;;  %4204 = vmatmul.msk.bf16.vlgmr.msrb.gmra.mxu3 %vm1086_vm8, %v2467_v31  ;;  %v4649_v0 = vpop.eup %4648  ;;  %v2396_v4 = vmul.f32 %v4647_v46, %v4635_v24  ;;  %v4466_v46 = vld [vmem:[%s6365_s7 + $0x60] sm:$0xff] }
 0x98f   :  { %v2337_v22 = vsub.f32 %v2248_v29, %v2321_v61  ;;  %v2397_v44 = vmul.f32 %v4649_v0, %v4637_v55  ;;  %v2360_v24 = vpop.xlane.xlu0 %2359 }
 0x990   :  { %v2404_v40 = vpack.c.bf16 %v2396_v4, %v2396_v4 }
 0x991   :  { %v4651_v56 = vpop.eup %4650  ;;  %v2348_v49 = vmul.f32 1.442695, %v2337_v22  ;;  %v2405_v43 = vpack.c.bf16 %v2397_v44, %v2397_v44 }
 0x992   :  { %v2364_v32 = vsel %vm1086_vm8, %v4651_v56, 0.0  ;;  %v2465_v35 = vunpack.c.l.b16 %v2404_v40 }
 0x993   :  { %4652 = vpow2.f32 %v2348_v49  ;;  %2365 = vadd.xlane.f32.xlu2 %v2364_v32  ;;  %v2466_v21 = vunpack.c.l.b16 %v2405_v43 }
 0x994   :  { %4654 = vrcp.f32 %v2360_v24 }
 0x995   :  { %v2468_v30 = vpack.c.b16 %v2466_v21, %v2465_v35 }
 0x999   :  { %v4653_v23 = vpop.eup %4652 }
 0x99a   :  { %v2367_v34 = vsel %vm1086_vm8, %v4653_v23, 0.0 }
 0x99b   :  { %2368 = vadd.xlane.f32.xlu0 %v2367_v34 }
 0x99e   :  { %4205 = vmatmul.msk.bf16.gmra.mxu3 %vm1086_vm8, %v2468_v30 }
 0x9ae   :  { %4268 = vmatmul.msk.bf16.vlgmr.msra.gmra.mxu3 %vm198_vm4, %v5212_v14  ;;  %v4469_v14 = vld [vmem:[%s6365_s7 + $0x78] sm:$0xff] }
 0x9af   :  { %2611 = vmatpush.bf16.msrb.mxu2 %v4469_v14 }
 0x9be   :  { %4269 = vmatmul.msk.bf16.gmra.mxu3 %vm198_vm4, %v5160_v63  ;;  %v4655_v63 = vpop.eup %4654 }
 0x9ce   :  { %4270 = vmatmul.msk.bf16.gmra.mxu3 %vm198_vm4, %v5205_v12  ;;  %v4468_v12 = vld [vmem:[%s6365_s7 + $0x70] sm:$0xff] }
 0x9cf   :  { %2612 = vmatpush.bf16.msrb.mxu2 %v4468_v12 }
 0x9de   :  { %4271 = vmatmul.msk.bf16.gmra.mxu3 %vm198_vm4, %v5420_v62  ;;  %v2390_v62 = vmul.f32 %v4655_v63, %v5844_v41 }
 0x9ee   :  { %4272 = vmatmul.msk.bf16.gmra.mxu3 %vm198_vm4, %v5438_v25  ;;  %v4467_v25 = vld [vmem:[%s6365_s7 + $0x68] sm:$0xff]  ;;  %s3898_s7 = sshll.u32 %s6371_s13, 4  ;;  %s3899_s7 = int_to_ptr.hbm [resolvable:$true] %s3898_s7 }
 0x9ef   :  { %2613 = vmatpush.bf16.msrb.mxu2 %v4467_v25 }
 0x9f3   :  { %2614 = vmatpush.bf16.msrb.mxu2 %v4466_v46 }
 0x9fe   :  { %v2363_v55 = vpop.xlane.xlu1 %2362  ;;  %4273 = vmatmul.msk.bf16.gmra.mxu3 %vm198_vm4, %v5452_v47  ;;  %v2398_v47 = vpack.c.bf16 %v2390_v62, %v2390_v62 }
 0x9ff   :  { %4656 = vrcp.f32 %v2363_v55  ;;  %v5903_v55 = vpop.f32.mrf.mxu1 }
 0xa00   :  { %v2410_v10 = vunpack.c.l.b16 %v2398_v47 }
 0xa05   :  { %v4657_v29 = vpop.eup %4656 }
 0xa06   :  { %v2391_v59 = vmul.f32 %v4657_v29, %v4645_v37  ;;  %v2366_v38 = vpop.xlane.xlu2 %2365 }
 0xa07   :  { %4658 = vrcp.f32 %v2366_v38  ;;  %v5910_v63 = vpop.f32.mrf.mxu1 }
 0xa08   :  { %v2399_v20 = vpack.c.bf16 %v2391_v59, %v2391_v59 }
 0xa0a   :  { %v2411_v31 = vunpack.c.l.b16 %v2399_v20 }
 0xa0c   :  { %v2414_v61 = vpack.c.b16 %v2411_v31, %v2410_v10 }
 0xa0d   :  { %v4659_v0 = vpop.eup %4658 }
 0xa0e   :  { %v2369_v41 = vpop.xlane.xlu0 %2368  ;;  %4202 = vmatmul.msk.bf16.vlgmr.msra.gmra.mxu2 %vm1086_vm8, %v2414_v61  ;;  %v2392_v37 = vmul.f32 %v4659_v0, %v4651_v56 }
 0xa0f   :  { %4660 = vrcp.f32 %v2369_v41 }
 0xa10   :  { %v2400_v49 = vpack.c.bf16 %v2392_v37, %v2392_v37 }
 0xa11   :  { %v5892_v22 = vpop.f32.mrf.mxu3 }
 0xa12   :  { %v2412_v43 = vunpack.c.l.b16 %v2400_v49 }
 0xa15   :  { %v4661_v4 = vpop.eup %4660 }
 0xa16   :  { %v2393_v44 = vmul.f32 %v4661_v4, %v4653_v23  ;;  %v4465_v23 = vld [vmem:[%s6368_s10 + $0x10] sm:$0xff] }
 0xa17   :  { %2544 = vmatpush.bf16.msrb.mxu0 %v4465_v23 }
 0xa18   :  { %v2401_v32 = vpack.c.bf16 %v2393_v44, %v2393_v44 }
 0xa19   :  { %v5894_v40 = vpop.f32.mrf.mxu3 }
 0xa1a   :  { %v2413_v35 = vunpack.c.l.b16 %v2401_v32 }
 0xa1c   :  { %v2415_v21 = vpack.c.b16 %v2413_v35, %v2412_v43 }
 0xa1e   :  { %4203 = vmatmul.msk.bf16.gmra.mxu2 %vm1086_vm8, %v2415_v21 }
 0xa21   :  { %v5897_v34 = vpop.f32.mrf.mxu3 }
 0xa29   :  { %v5899_v30 = vpop.f32.mrf.mxu3 }
 0xa2a   :  { %v2515_v26 = vpack.c.bf16 %v5899_v30, %v5897_v34 }
 0xa2e   :  { %4240 = vmatmul.msk.bf16.vlgmr.msrb.gmra.mxu2 %vm198_vm4, %v5255_v17  ;;  %v2760_v17 = vpop.f32.mrf.mxu1 }
 0xa31   :  { %v2678_v24 = vpop.f32.mrf.mxu3 }
 0xa32   :  { %v2788_v49 = vpack.c.bf16 %v2678_v24, %v2678_v24 }
 0xa34   :  { %v2828_v35 = vunpack.c.l.b16 %v2788_v49 }
 0xa36   :  { %v2762_v29 = vpop.f32.mrf.mxu1 }
 0xa37   :  { %v2805_v49 = vpack.c.bf16 %v2762_v29, %v2762_v29 }
 0xa39   :  { %v2680_v56 = vpop.f32.mrf.mxu3 }
 0xa3a   :  { %v2789_v37 = vpack.c.bf16 %v2680_v56, %v2680_v56 }
 0xa3c   :  { %v2829_v44 = vunpack.c.l.b16 %v2789_v37 }
 0xa3e   :  { %4241 = vmatmul.msk.bf16.gmra.mxu2 %vm198_vm4, %v5302_v33  ;;  %v5917_v0 = vpop.f32.mrf.mxu1  ;;  %v2834_v21 = vpack.c.b16 %v2829_v44, %v2828_v35  ;;  %v2804_v35 = vpack.c.bf16 %v2760_v17, %v2760_v17 }
 0xa41   :  { %v2683_v14 = vpop.f32.mrf.mxu3 }
 0xa42   :  { %v2790_v10 = vpack.c.bf16 %v2683_v14, %v2683_v14 }
 0xa46   :  { %v2767_v23 = vpop.f32.mrf.mxu1 }
 0xa49   :  { %v2685_v12 = vpop.f32.mrf.mxu3 }
 0xa4a   :  { %v2791_v38 = vpack.c.bf16 %v2685_v12, %v2685_v12 }
 0xa4c   :  { %v2831_v46 = vunpack.c.l.b16 %v2791_v38 }
 0xa4e   :  { %4242 = vmatmul.msk.bf16.gmra.mxu2 %vm198_vm4, %v5356_v36  ;;  %v2830_v36 = vunpack.c.l.b16 %v2790_v10  ;;  %v2770_v12 = vpop.f32.mrf.mxu1 }
 0xa50   :  { %v2835_v4 = vpack.c.b16 %v2831_v46, %v2830_v36 }
 0xa51   :  { %v2688_v62 = vpop.f32.mrf.mxu3 }
 0xa52   :  { %v2792_v25 = vpack.c.bf16 %v2688_v62, %v2688_v62  ;;  %v2847_v32 = vsel %vm992_vm12, %v2835_v4, 0 }
 0xa54   :  { %v2832_v33 = vunpack.c.l.b16 %v2792_v25 }
 0xa56   :  { %v2772_v25 = vpop.f32.mrf.mxu1 }
 0xa59   :  { %v2690_v47 = vpop.f32.mrf.mxu3 }
 0xa5a   :  { %v2793_v59 = vpack.c.bf16 %v2690_v47, %v2690_v47 }
 0xa5c   :  { %v2833_v20 = vunpack.c.l.b16 %v2793_v59 }
 0xa5e   :  { %v2836_v31 = vpack.c.b16 %v2833_v20, %v2832_v33  ;;  %4243 = vmatmul.msk.bf16.gmra.mxu2 %vm198_vm4, %v5388_v3  ;;  %v2844_v3 = vsel %vm992_vm12, %v2834_v21, 0  ;;  %v2775_v24 = vpop.f32.mrf.mxu1 }
 0xa5f   :  { %v2810_v29 = vpack.c.bf16 %v2775_v24, %v2775_v24 }
 0xa60   :  { %v2850_v61 = vsel %vm992_vm12, %v2836_v31, 0 }
 0xa61   :  { %v2693_v41 = vpop.f32.mrf.mxu3  ;;  %2857 = vmatpush.bf16.xpose.msra.mxu0 %v2850_v61 }
 0xa66   :  { %v2777_v21 = vpop.f32.mrf.mxu1 }
 0xa69   :  { %v2695_v43 = vpop.f32.mrf.mxu3  ;;  %2858 = vmatpush.bf16.xpose.msra.mxu0 %v2847_v32 }
 0xa6a   :  { %v2795_v44 = vpack.c.bf16 %v2695_v43, %v2695_v43 }
 0xa71   :  { %v2698_v14 = vpop.f32.mrf.mxu3  ;;  %2859 = vmatpush.bf16.xpose.msra.mxu0 %v2844_v3  ;;  %v2794_v3 = vpack.c.bf16 %v2693_v41, %v2693_v41  ;;  %v2809_v41 = vpack.c.bf16 %v2772_v25, %v2772_v25  ;;  %v2806_v25 = vpack.c.bf16 %v5917_v0, %v5917_v0  ;;  %v2514_v0 = vpack.c.bf16 %v5894_v40, %v5892_v22 }
 0xa72   :  { %v2796_v31 = vpack.c.bf16 %v2698_v14, %v2698_v14 }
 0xa73   :  { %v2887_v43 = vunpack.c.l.b16 %v2794_v3 }
 0xa74   :  { %v2889_v4 = vunpack.c.l.b16 %v2796_v31 }
 0xa79   :  { %v2700_v62 = vpop.f32.mrf.mxu3 }
 0xa7a   :  { %v2797_v33 = vpack.c.bf16 %v2700_v62, %v2700_v62  ;;  %v3047_v62 = vunpack.c.l.b16 %v2805_v49 }
 0xa7c   :  { %v2890_v61 = vunpack.c.l.b16 %v2797_v33  ;;  %v3046_v33 = vunpack.c.l.b16 %v2804_v35 }
 0xa7e   :  { %v2894_v32 = vpack.c.b16 %v2890_v61, %v2889_v4  ;;  %v3050_v31 = vpack.c.b16 %v3047_v62, %v3046_v33  ;;  %v3099_v4 = vunpack.c.l.b16 %v2810_v29 }
 0xa80   :  { %v2906_v14 = vsel %vm992_vm12, %v2894_v32, 0 }
 0xa81   :  { %v2703_v47 = vpop.f32.mrf.mxu3 }
 0xa82   :  { %v2798_v59 = vpack.c.bf16 %v2703_v47, %v2703_v47  ;;  %v2803_v47 = vpack.c.bf16 %v5910_v63, %v5910_v63 }
 0xa84   :  { %v2891_v20 = vunpack.c.l.b16 %v2798_v59  ;;  %v2811_v59 = vpack.c.bf16 %v2777_v21, %v2777_v21  ;;  %v3045_v17 = vunpack.c.l.b16 %v2803_v47 }
 0xa89   :  { %v2705_v56 = vpop.f32.mrf.mxu3 }
 0xa8a   :  { %v2799_v38 = vpack.c.bf16 %v2705_v56, %v2705_v56  ;;  %v2888_v56 = vunpack.c.l.b16 %v2795_v44  ;;  %v2807_v44 = vpack.c.bf16 %v2767_v23, %v2767_v23 }
 0xa8c   :  { %v2892_v10 = vunpack.c.l.b16 %v2799_v38  ;;  %v2802_v38 = vpack.c.bf16 %v5903_v55, %v5903_v55  ;;  %v2893_v61 = vpack.c.b16 %v2888_v56, %v2887_v43  ;;  %v3098_v55 = vunpack.c.l.b16 %v2809_v41 }
 0xa8d   :  { %v3096_v21 = vunpack.c.l.b16 %v2807_v44 }
 0xa8e   :  { %v2895_v46 = vpack.c.b16 %v2892_v10, %v2891_v20  ;;  %v3044_v63 = vunpack.c.l.b16 %v2802_v38  ;;  %v2903_v35 = vsel %vm992_vm12, %v2893_v61, 0 }
 0xa90   :  { %v2909_v36 = vsel %vm992_vm12, %v2895_v46, 0  ;;  %v3100_v46 = vunpack.c.l.b16 %v2811_v59  ;;  %v3049_v49 = vpack.c.b16 %v3045_v17, %v3044_v63 }
 0xa91   :  { %v2449_v37 = vpop.f32.mrf.mxu2  ;;  %2916 = vmatpush.bf16.xpose.msra.mxu2 %v2909_v36  ;;  %v2808_v36 = vpack.c.bf16 %v2770_v12, %v2770_v12  ;;  %v3095_v12 = vunpack.c.l.b16 %v2806_v25 }
 0xa92   :  { %v3103_v32 = vpack.c.b16 %v3100_v46, %v3099_v4 }
 0xa93   :  { %v3101_v23 = vpack.c.b16 %v3096_v21, %v3095_v12 }
 0xa99   :  { %v2451_v20 = vpop.f32.mrf.mxu2  ;;  %2917 = vmatpush.bf16.xpose.msra.mxu2 %v2906_v14 }
 0xa9a   :  { %v2512_v10 = vpack.c.bf16 %v2451_v20, %v2449_v37  ;;  %v3097_v37 = vunpack.c.l.b16 %v2808_v36 }
 0xa9c   :  { %4212 = vmatmul.msk.bf16.vlgmr.msrb.gmra.mxu0 %vm992_vm12, %v2512_v10  ;;  %v3102_v3 = vpack.c.b16 %v3098_v55, %v3097_v37 }
 0xa9d   :  { %3065 = vmatpush.bf16.msrb.mxu0 %v3050_v31 }
 0xaa1   :  { %3066 = vmatpush.bf16.msrb.mxu0 %v3049_v49  ;;  %v2454_v24 = vpop.f32.mrf.mxu2  ;;  %2918 = vmatpush.bf16.xpose.msra.mxu2 %v2903_v35 }
 0xaa5   :  { %3067 = vmatpush.bf16.msrb.mxu0 %v3048_v7 }
 0xaa9   :  { %3118 = vmatpush.bf16.msrb.mxu2 %v3103_v32  ;;  %v2456_v47 = vpop.f32.mrf.mxu2 }
 0xaaa   :  { %v2513_v62 = vpack.c.bf16 %v2456_v47, %v2454_v24  ;;  %v1935_v24 = vadd.f32 %v5807_v48, %v5760_v28  ;;  %v1950_v48 = vadd.f32 %v5824_v16, %v5792_v27 }
 0xaac   :  { %4213 = vmatmul.msk.bf16.gmra.mxu0 %vm992_vm12, %v2513_v62  ;;  %v1945_v62 = vadd.f32 %v5819_v13, %v5776_v52 }
 0xaad   :  { %3119 = vmatpush.bf16.msrb.mxu2 %v3102_v3  ;;  %v1940_v3 = vadd.f32 %v5813_v19, %v5767_v18 }
 0xab1   :  { %3120 = vmatpush.bf16.msrb.mxu2 %v3101_v23  ;;  %v2616_v59 = vpop.f32.mrf.mxu2 }
 0xab2   :  { %v2780_v33 = vpack.c.bf16 %v2616_v59, %v2616_v59 }
 0xab4   :  { %v2816_v29 = vunpack.c.l.b16 %v2780_v33 }
 0xab9   :  { %v2618_v56 = vpop.f32.mrf.mxu2 }
 0xaba   :  { %v2781_v7 = vpack.c.bf16 %v2618_v56, %v2618_v56 }
 0xabc   :  { %4214 = vmatmul.msk.bf16.gmra.mxu0 %vm992_vm12, %v2514_v0  ;;  %v2817_v20 = vunpack.c.l.b16 %v2781_v7 }
 0xabe   :  { %v2820_v17 = vpack.c.b16 %v2817_v20, %v2816_v29 }
 0xac1   :  { %v2621_v14 = vpop.f32.mrf.mxu2 }
 0xac2   :  { %v2782_v30 = vpack.c.bf16 %v2621_v14, %v2621_v14 }
 0xac4   :  { %v2818_v63 = vunpack.c.l.b16 %v2782_v30 }
 0xac9   :  { %v2623_v38 = vpop.f32.mrf.mxu2 }
 0xaca   :  { %v2783_v34 = vpack.c.bf16 %v2623_v38, %v2623_v38 }
 0xacc   :  { %4215 = vmatmul.msk.bf16.gmra.mxu0 %vm992_vm12, %v2515_v26  ;;  %v2819_v61 = vunpack.c.l.b16 %v2783_v34 }
 0xace   :  { %v2821_v49 = vpack.c.b16 %v2819_v61, %v2818_v63 }
 0xad1   :  { %v2626_v39 = vpop.f32.mrf.mxu2 }
 0xad2   :  { %v2784_v43 = vpack.c.bf16 %v2626_v39, %v2626_v39 }
 0xad4   :  { %v2875_v41 = vunpack.c.l.b16 %v2784_v43 }
 0xad9   :  { %v2628_v10 = vpop.f32.mrf.mxu2 }
 0xada   :  { %v2785_v31 = vpack.c.bf16 %v2628_v10, %v2628_v10 }
 0xadc   :  { %v2876_v22 = vunpack.c.l.b16 %v2785_v31  ;;  %4304 = vmatmul.msk.bf16.vlgmr.msra.gmra.mxu0 %vm992_vm12, %v2820_v17 }
 0xade   :  { %v2879_v40 = vpack.c.b16 %v2876_v22, %v2875_v41 }
 0xae0   :  { %4306 = vmatmul.msk.bf16.vlgmr.msra.gmra.mxu2 %vm992_vm12, %v2879_v40 }
 0xae1   :  { %v2631_v46 = vpop.f32.mrf.mxu2 }
 0xae2   :  { %v2786_v36 = vpack.c.bf16 %v2631_v46, %v2631_v46 }
 0xae4   :  { %v2877_v55 = vunpack.c.l.b16 %v2786_v36 }
 0xae9   :  { %v2633_v4 = vpop.f32.mrf.mxu2 }
 0xaea   :  { %v2787_v44 = vpack.c.bf16 %v2633_v4, %v2633_v4 }
 0xaec   :  { %v2878_v32 = vunpack.c.l.b16 %v2787_v44  ;;  %4305 = vmatmul.msk.bf16.gmra.mxu0 %vm992_vm12, %v2821_v49 }
 0xaee   :  { %v2880_v35 = vpack.c.b16 %v2878_v32, %v2877_v55 }
 0xaf0   :  { %4307 = vmatmul.msk.bf16.gmra.mxu2 %vm992_vm12, %v2880_v35 }
 0xb19   :  { %v2546_v25 = vpop.f32.mrf.mxu0 }
 0xb1a   :  { %v5947_v37 = vadd.f32 %v2546_v25, %v1935_v24 }
 0xb21   :  { %v5949_v21 = vpop.f32.mrf.mxu0 }
 0xb29   :  { %v2551_v12 = vpop.f32.mrf.mxu0 }
 0xb2a   :  { %v5953_v23 = vadd.f32 %v2551_v12, %v1940_v3 }
 0xb31   :  { %v5955_v47 = vpop.f32.mrf.mxu0 }
 0xb39   :  { %v2556_v59 = vpop.f32.mrf.mxu0 }
 0xb3a   :  { %v5959_v56 = vadd.f32 %v2556_v59, %v1945_v62 }
 0xb41   :  { %v5961_v28 = vpop.f32.mrf.mxu0 }
 0xb49   :  { %v2561_v0 = vpop.f32.mrf.mxu0 }
 0xb4a   :  { %v5965_v14 = vadd.f32 %v2561_v0, %v1950_v48 }
 0xb51   :  { %v5967_v18 = vpop.f32.mrf.mxu0 }
 0xb59   :  { %v2861_v19 = vpop.f32.mrf.mxu0 }
 0xb5a   :  { %v2930_v38 = vsel %vm1086_vm8, %v2861_v19, -inf }
 0xb5b   :  { %2931 = vmax.xlane.f32.xlu1 %v2930_v38 }
 0xb61   :  { %v2863_v26 = vpop.f32.mrf.mxu0 }
 0xb62   :  { %v2933_v52 = vsel %vm1086_vm8, %v2863_v26, -inf }
 0xb63   :  { %v2920_v13 = vpop.f32.mrf.mxu2  ;;  %2934 = vmax.xlane.f32.xlu2 %v2933_v52 }
 0xb64   :  { %v2942_v7 = vsel %vm1086_vm8, %v2920_v13, -inf }
 0xb69   :  { %v2866_v39 = vpop.f32.mrf.mxu0 }
 0xb6a   :  { %v2936_v33 = vsel %vm1086_vm8, %v2866_v39, -inf }
 0xb6b   :  { %v2922_v27 = vpop.f32.mrf.mxu2  ;;  %2943 = vmax.xlane.f32.xlu2 %v2942_v7  ;;  %2937 = vmax.xlane.f32.xlu0 %v2936_v33 }
 0xb6c   :  { %v2945_v20 = vsel %vm1086_vm8, %v2922_v27, -inf }
 0xb71   :  { %v2868_v16 = vpop.f32.mrf.mxu0 }
 0xb72   :  { %v2939_v29 = vsel %vm1086_vm8, %v2868_v16, -inf }
 0xb73   :  { %v2925_v43 = vpop.f32.mrf.mxu2  ;;  %2946 = vmax.xlane.f32.xlu0 %v2945_v20  ;;  %2940 = vmax.xlane.f32.xlu1 %v2939_v29 }
 0xb74   :  { %v2948_v10 = vsel %vm1086_vm8, %v2925_v43, -inf }
 0xb7b   :  { %v2927_v17 = vpop.f32.mrf.mxu2  ;;  %2949 = vmax.xlane.f32.xlu1 %v2948_v10 }
 0xb7c   :  { %v2951_v31 = vsel %vm1086_vm8, %v2927_v17, -inf }
 0xb7d   :  { %2952 = vmax.xlane.f32.xlu2 %v2951_v31 }
 0xbce   :  { %v2932_v41 = vpop.xlane.xlu1 %2931 }
 0xbcf   :  { %v2954_v22 = vsub.f32 %v2861_v19, %v2932_v41 }
 0xbd1   :  { %v2962_v40 = vmul.f32 1.442695, %v2954_v22 }
 0xbd3   :  { %4662 = vpow2.f32 %v2962_v40 }
 0xbd6   :  { %v2935_v46 = vpop.xlane.xlu2 %2934 }
 0xbd7   :  { %v2955_v34 = vsub.f32 %v2863_v26, %v2935_v46 }
 0xbd9   :  { %v4663_v30 = vpop.eup %4662  ;;  %v2964_v61 = vmul.f32 1.442695, %v2955_v34 }
 0xbda   :  { %v2978_v63 = vsel %vm1086_vm8, %v4663_v30, 0.0 }
 0xbdb   :  { %4664 = vpow2.f32 %v2964_v61  ;;  %2979 = vadd.xlane.f32.xlu0 %v2978_v63 }
 0xbde   :  { %v2944_v36 = vpop.xlane.xlu2 %2943  ;;  %v2938_v4 = vpop.xlane.xlu0 %2937 }
 0xbdf   :  { %v2958_v49 = vsub.f32 %v2920_v13, %v2944_v36  ;;  %v2956_v44 = vsub.f32 %v2866_v39, %v2938_v4 }
 0xbe1   :  { %v4665_v55 = vpop.eup %4664  ;;  %v2970_v32 = vmul.f32 1.442695, %v2958_v49  ;;  %v2966_v35 = vmul.f32 1.442695, %v2956_v44 }
 0xbe2   :  { %v2981_v24 = vsel %vm1086_vm8, %v4665_v55, 0.0 }
 0xbe3   :  { %4666 = vpow2.f32 %v2970_v32  ;;  %2982 = vadd.xlane.f32.xlu1 %v2981_v24 }
 0xbe4   :  { %4668 = vpow2.f32 %v2966_v35 }
 0xbe6   :  { %v2947_v25 = vpop.xlane.xlu0 %2946  ;;  %v2941_v3 = vpop.xlane.xlu1 %2940 }
 0xbe7   :  { %v2959_v12 = vsub.f32 %v2922_v27, %v2947_v25  ;;  %v2957_v62 = vsub.f32 %v2868_v16, %v2941_v3 }
 0xbe9   :  { %v4667_v59 = vpop.eup %4666  ;;  %v2972_v48 = vmul.f32 1.442695, %v2959_v12  ;;  %v2968_v0 = vmul.f32 1.442695, %v2957_v62  ;;  %v4478_v12 = vld [vmem:[%s6368_s10 + $0x18] sm:$0xff] }
 0xbea   :  { %v4669_v19 = vpop.eup %4668  ;;  %v2990_v38 = vsel %vm1086_vm8, %v4667_v59, 0.0  ;;  %3164 = vmatpush.bf16.msrb.mxu3 %v4478_v12 }
 0xbeb   :  { %4670 = vpow2.f32 %v2972_v48  ;;  %v2984_v26 = vsel %vm1086_vm8, %v4669_v19, 0.0  ;;  %2991 = vadd.xlane.f32.xlu1 %v2990_v38 }
 0xbec   :  { %4672 = vpow2.f32 %v2968_v0  ;;  %2985 = vadd.xlane.f32.xlu2 %v2984_v26 }
 0xbee   :  { %v2950_v52 = vpop.xlane.xlu1 %2949 }
 0xbef   :  { %v2960_v13 = vsub.f32 %v2925_v43, %v2950_v52 }
 0xbf0   :  { %v2953_v39 = vpop.xlane.xlu2 %2952 }
 0xbf1   :  { %v4671_v7 = vpop.eup %4670  ;;  %v2974_v33 = vmul.f32 1.442695, %v2960_v13  ;;  %v2961_v20 = vsub.f32 %v2927_v17, %v2953_v39 }
 0xbf2   :  { %v4673_v27 = vpop.eup %4672  ;;  %v2993_v16 = vsel %vm1086_vm8, %v4671_v7, 0.0 }
 0xbf3   :  { %4674 = vpow2.f32 %v2974_v33  ;;  %v2976_v29 = vmul.f32 1.442695, %v2961_v20  ;;  %v2987_v10 = vsel %vm1086_vm8, %v4673_v27, 0.0 }
 0xbf4   :  { %2994 = vadd.xlane.f32.xlu2 %v2993_v16  ;;  %2988 = vadd.xlane.f32.xlu0 %v2987_v10 }
 0xbf5   :  { %4676 = vpow2.f32 %v2976_v29 }
 0xbf9   :  { %v4675_v31 = vpop.eup %4674 }
 0xbfa   :  { %v2996_v41 = vsel %vm1086_vm8, %v4675_v31, 0.0 }
 0xbfb   :  { %v4677_v22 = vpop.eup %4676 }
 0xbfc   :  { %2997 = vadd.xlane.f32.xlu0 %v2996_v41  ;;  %v2999_v43 = vsel %vm1086_vm8, %v4677_v22, 0.0 }
 0xbfd   :  { %3000 = vadd.xlane.f32.xlu1 %v2999_v43 }
 0xc4e   :  { %v2980_v40 = vpop.xlane.xlu0 %2979 }
 0xc4f   :  { %4678 = vrcp.f32 %v2980_v40 }
 0xc55   :  { %v4679_v46 = vpop.eup %4678 }
 0xc56   :  { %v2983_v17 = vpop.xlane.xlu1 %2982  ;;  %v3010_v34 = vmul.f32 %v4679_v46, %v4663_v30 }
 0xc57   :  { %4680 = vrcp.f32 %v2983_v17 }
 0xc58   :  { %v3018_v63 = vpack.c.bf16 %v3010_v34, %v3010_v34 }
 0xc5a   :  { %v3030_v32 = vunpack.c.l.b16 %v3018_v63 }
 0xc5d   :  { %v4681_v61 = vpop.eup %4680 }
 0xc5e   :  { %v3011_v36 = vmul.f32 %v4681_v61, %v4665_v55  ;;  %v2992_v49 = vpop.xlane.xlu1 %2991 }
 0xc5f   :  { %v2986_v4 = vpop.xlane.xlu2 %2985  ;;  %4682 = vrcp.f32 %v2992_v49 }
 0xc60   :  { %v3019_v44 = vpack.c.bf16 %v3011_v36, %v3011_v36  ;;  %4684 = vrcp.f32 %v2986_v4 }
 0xc62   :  { %v3031_v35 = vunpack.c.l.b16 %v3019_v44 }
 0xc64   :  { %v3034_v24 = vpack.c.b16 %v3031_v35, %v3030_v32 }
 0xc65   :  { %v4683_v30 = vpop.eup %4682 }
 0xc66   :  { %4308 = vmatmul.msk.bf16.vlgmr.msrb.gmra.mxu0 %vm1086_vm8, %v3034_v24  ;;  %v4685_v62 = vpop.eup %4684  ;;  %v3014_v55 = vmul.f32 %v4683_v30, %v4667_v59 }
 0xc67   :  { %v2995_v25 = vpop.xlane.xlu2 %2994  ;;  %v2989_v3 = vpop.xlane.xlu0 %2988  ;;  %v3012_v48 = vmul.f32 %v4685_v62, %v4669_v19 }
 0xc68   :  { %4686 = vrcp.f32 %v2995_v25  ;;  %v3022_v26 = vpack.c.bf16 %v3014_v55, %v3014_v55 }
 0xc69   :  { %4688 = vrcp.f32 %v2989_v3  ;;  %v3020_v39 = vpack.c.bf16 %v3012_v48, %v3012_v48 }
 0xc6a   :  { %v3083_v10 = vunpack.c.l.b16 %v3022_v26  ;;  %v1937_v26 = vadd.f32 %v5809_v53, %v5765_v57 }
 0xc6b   :  { %v3032_v43 = vunpack.c.l.b16 %v3020_v39 }
 0xc6e   :  { %v4687_v0 = vpop.eup %4686 }
 0xc6f   :  { %v4689_v38 = vpop.eup %4688  ;;  %v3015_v52 = vmul.f32 %v4687_v0, %v4671_v7  ;;  %v2998_v13 = vpop.xlane.xlu0 %2997  ;;  %v4520_v0 = vld [vmem:[%s6361_s3 + $0x2] ss:$0 sm:$0xff] }
 0xc70   :  { %v3013_v33 = vmul.f32 %v4689_v38, %v4673_v27  ;;  %v3001_v20 = vpop.xlane.xlu1 %3000 }
 0xc71   :  { %v3023_v16 = vpack.c.bf16 %v3015_v52, %v3015_v52  ;;  %4690 = vrcp.f32 %v3001_v20 }
 0xc72   :  { %v3021_v29 = vpack.c.bf16 %v3013_v33, %v3013_v33  ;;  %4692 = vrcp.f32 %v2998_v13  ;;  %v2567_v13 = vadd.f32 %v5949_v21, %v1937_v26  ;;  %v1942_v21 = vadd.f32 %v5817_v45, %v5773_v11 }
 0xc73   :  { %v3084_v41 = vunpack.c.l.b16 %v3023_v16 }
 0xc74   :  { %v3033_v40 = vunpack.c.l.b16 %v3021_v29 }
 0xc75   :  { %v3087_v17 = vpack.c.b16 %v3084_v41, %v3083_v10  ;;  %v2569_v41 = vadd.f32 %v5955_v47, %v1942_v21  ;;  %v1947_v47 = vadd.f32 %v5821_v9, %v5782_v58 }
 0xc76   :  { %v3035_v46 = vpack.c.b16 %v3033_v40, %v3032_v43 }
 0xc77   :  { %v4691_v59 = vpop.eup %4690  ;;  %4310 = vmatmul.msk.bf16.vlgmr.msrb.gmra.mxu2 %vm1086_vm8, %v3087_v17 }
 0xc78   :  { %v4693_v19 = vpop.eup %4692  ;;  %4309 = vmatmul.msk.bf16.gmra.mxu0 %vm1086_vm8, %v3035_v46  ;;  %v3017_v7 = vmul.f32 %v4691_v59, %v4677_v22 }
 0xc79   :  { %v3016_v34 = vmul.f32 %v4693_v19, %v4675_v31  ;;  %v2571_v19 = vadd.f32 %v5961_v28, %v1947_v47  ;;  %v1952_v28 = vadd.f32 %v5828_v8, %v5797_v2 }
 0xc7a   :  { %v3025_v27 = vpack.c.bf16 %v3017_v7, %v3017_v7 }
 0xc7b   :  { %v3024_v61 = vpack.c.bf16 %v3016_v34, %v3016_v34 }
 0xc7c   :  { %v3086_v63 = vunpack.c.l.b16 %v3025_v27 }
 0xc7d   :  { %v3085_v36 = vunpack.c.l.b16 %v3024_v61 }
 0xc7f   :  { %v3088_v4 = vpack.c.b16 %v3086_v63, %v3085_v36  ;;  %v2573_v36 = vadd.f32 %v5967_v18, %v1952_v28  ;;  %v4332_v28 = vld [vmem:[%s6369_s11 + $0x10] sm:$0xf] }
 0xc87   :  { %4311 = vmatmul.msk.bf16.gmra.mxu2 %vm1086_vm8, %v3088_v4 }
 0xce3   :  { %v3069_v49 = vpop.f32.mrf.mxu0 }
 0xceb   :  { %v3071_v44 = vpop.f32.mrf.mxu0 }
 0xcec   :  { %v3132_v32 = vpack.c.bf16 %v3071_v44, %v3069_v49 }
 0xcee   :  { %4318 = vmatmul.msk.bf16.vlgmr.msrb.gmra.mxu3 %vm992_vm12, %v3132_v32 }
 0xcf5   :  { %v3074_v35 = vpop.f32.mrf.mxu0 }
 0xcfa   :  { %v3122_v24 = vpop.f32.mrf.mxu2 }
 0xcfd   :  { %v3076_v25 = vpop.f32.mrf.mxu0 }
 0xcfe   :  { %v3133_v3 = vpack.c.bf16 %v3076_v25, %v3074_v35 }
 0xd00   :  { %4319 = vmatmul.msk.bf16.gmra.mxu3 %vm992_vm12, %v3133_v3 }
 0xd02   :  { %v3124_v22 = vpop.f32.mrf.mxu2 }
 0xd03   :  { %v3134_v31 = vpack.c.bf16 %v3124_v22, %v3122_v24 }
 0xd0a   :  { %v3127_v12 = vpop.f32.mrf.mxu2 }
 0xd10   :  { %4320 = vmatmul.msk.bf16.gmra.mxu3 %vm992_vm12, %v3134_v31 }
 0xd12   :  { %v3129_v30 = vpop.f32.mrf.mxu2 }
 0xd13   :  { %v3135_v62 = vpack.c.bf16 %v3129_v30, %v3127_v12 }
 0xd20   :  { %4321 = vmatmul.msk.bf16.gmra.mxu3 %vm992_vm12, %v3135_v62 }
 0xd71   :  { %v3166_v55 = vpop.f32.mrf.mxu3 }
 0xd72   :  { %v3186_v48 = vadd.f32 %v3166_v55, %v5947_v37 }
 0xd74   :  { %v3194_v38 = vadd.f32 %v3186_v48, %v4925_v42 }
 0xd76   :  { %v6003_v52 = vadd.f32 %v4520_v0, %v3194_v38 }
 0xd78   :  { %v3214_v39 = vsel %vm198_vm4, %v6003_v52, 0.0 }
 0xd79   :  { %3215 = vadd.xlane.f32.xlu2 %v3214_v39  ;;  %v3168_v33 = vpop.f32.mrf.mxu3 }
 0xd7a   :  { %v3187_v20 = vadd.f32 %v3168_v33, %v2567_v13 }
 0xd7c   :  { %v3195_v37 = vadd.f32 %v3187_v20, %v4937_v51 }
 0xd7e   :  { %v6009_v16 = vadd.f32 %v4520_v0, %v3195_v37 }
 0xd80   :  { %v3217_v42 = vsel %vm198_vm4, %v6009_v16, 0.0 }
 0xd81   :  { %3218 = vadd.xlane.f32.xlu0 %v3217_v42 }
 0xd83   :  { %v3171_v29 = vpop.f32.mrf.mxu3 }
 0xd84   :  { %v3188_v57 = vadd.f32 %v3171_v29, %v5953_v23 }
 0xd86   :  { %v3196_v53 = vadd.f32 %v3188_v57, %v4942_v54 }
 0xd88   :  { %v6017_v10 = vadd.f32 %v4520_v0, %v3196_v53 }
 0xd8a   :  { %v3220_v51 = vsel %vm198_vm4, %v6017_v10, 0.0 }
 0xd8b   :  { %3221 = vadd.xlane.f32.xlu1 %v3220_v51  ;;  %v3173_v43 = vpop.f32.mrf.mxu3 }
 0xd8c   :  { %v3189_v40 = vadd.f32 %v3173_v43, %v2569_v41 }
 0xd8e   :  { %v3197_v17 = vadd.f32 %v3189_v40, %v4971_v15 }
 0xd90   :  { %v6023_v46 = vadd.f32 %v4520_v0, %v3197_v17 }
 0xd92   :  { %v3223_v54 = vsel %vm198_vm4, %v6023_v46, 0.0 }
 0xd93   :  { %3224 = vadd.xlane.f32.xlu2 %v3223_v54  ;;  %v3176_v23 = vpop.f32.mrf.mxu3 }
 0xd94   :  { %v3190_v11 = vadd.f32 %v3176_v23, %v5959_v56  ;;  %v4348_v23 = vld [vmem:[%s6369_s11 + $0x30] sm:$0xf] }
 0xd96   :  { %v3198_v45 = vadd.f32 %v3190_v11, %v5030_v60  ;;  %v4486_v11 = vld [vmem:[%s6369_s11 + $0x34] sm:$0xf0] }
 0xd97   :  { %v4349_v47 = vor.u32 %v4486_v11, %v4348_v23 }
 0xd98   :  { %v6031_v59 = vadd.f32 %v4520_v0, %v3198_v45  ;;  %v4485_v45 = vld [vmem:[%s6369_s11 + $0x34] sm:$0xf] }
 0xd99   :  { %3482 = vmatpush.bf16.msra.mxu0 %v4349_v47  ;;  %v6165_v47 = vld [vmem:[%s6360_s2 + $0x4] ss:$0 sm:$0xff] }
 0xd9a   :  { %v3226_v15 = vsel %vm198_vm4, %v6031_v59, 0.0 }
 0xd9b   :  { %3227 = vadd.xlane.f32.xlu0 %v3226_v15  ;;  %v3178_v7 = vpop.f32.mrf.mxu3 }
 0xd9c   :  { %v3191_v34 = vadd.f32 %v3178_v7, %v2571_v19  ;;  %v4350_v19 = vld [vmem:[%s6369_s11 + $0x38] sm:$0xf0]  ;;  %v4340_v7 = vld [vmem:[%s6369_s11 + $0x20] sm:$0xf] }
 0xd9d   :  { %v4353_v15 = vor.u32 %v4485_v45, %v4350_v19 }
 0xd9e   :  { %v3199_v27 = vadd.f32 %v3191_v34, %v5042_v5  ;;  %v4484_v34 = vld [vmem:[%s6369_s11 + $0x24] sm:$0xf0] }
 0xd9f   :  { %3511 = vmatpush.bf16.msra.mxu1 %v4353_v15 }
 0xda0   :  { %v6037_v61 = vadd.f32 %v4520_v0, %v3199_v27  ;;  %v4483_v27 = vld [vmem:[%s6369_s11 + $0x24] sm:$0xf] }
 0xda2   :  { %v3229_v60 = vsel %vm198_vm4, %v6037_v61, 0.0 }
 0xda3   :  { %3230 = vadd.xlane.f32.xlu1 %v3229_v60  ;;  %v3181_v56 = vpop.f32.mrf.mxu3  ;;  %v4341_v60 = vor.u32 %v4484_v34, %v4340_v7 }
 0xda4   :  { %v3192_v58 = vadd.f32 %v3181_v56, %v5965_v14  ;;  %v4342_v56 = vld [vmem:[%s6369_s11 + $0x28] sm:$0xf0] }
 0xda5   :  { %3483 = vmatpush.bf16.msra.mxu0 %v4341_v60 }
 0xda6   :  { %v3200_v9 = vadd.f32 %v3192_v58, %v5090_v50  ;;  %v4345_v58 = vor.u32 %v4483_v27, %v4342_v56 }
 0xda8   :  { %v6045_v63 = vadd.f32 %v4520_v0, %v3200_v9  ;;  %3512 = vmatpush.bf16.msra.mxu1 %v4345_v58  ;;  %v6172_v58 = vld [vmem:[%s6360_s2 + $0x5] ss:$0 sm:$0xff] }
 0xdaa   :  { %v3232_v5 = vsel %vm198_vm4, %v6045_v63, 0.0 }
 0xdab   :  { %3233 = vadd.xlane.f32.xlu1 %v3232_v5  ;;  %v3183_v4 = vpop.f32.mrf.mxu3  ;;  %v4481_v5 = vld [vmem:[%s6369_s11 + $0x14] sm:$0xf] }
 0xdac   :  { %v3193_v49 = vadd.f32 %v3183_v4, %v2573_v36  ;;  %v4482_v36 = vld [vmem:[%s6369_s11 + $0x14] sm:$0xf0] }
 0xdae   :  { %v3201_v44 = vadd.f32 %v3193_v49, %v5045_v6  ;;  %v4333_v49 = vor.u32 %v4482_v36, %v4332_v28 }
 0xdb0   :  { %v6051_v32 = vadd.f32 %v4520_v0, %v3201_v44  ;;  %v4334_v44 = vld [vmem:[%s6369_s11 + $0x18] sm:$0xf0]  ;;  %3484 = vmatpush.bf16.msra.mxu0 %v4333_v49 }
 0xdb2   :  { %v3235_v22 = vsel %vm198_vm4, %v6051_v32, 0.0 }
 0xdec   :  { %v3216_v14 = vpop.xlane.xlu2 %3215 }
 0xded   :  { %v3238_v50 = vmul.f32 %v3216_v14, %v4953_v1  ;;  %v4337_v14 = vor.u32 %v4481_v5, %v4334_v44 }
 0xdef   :  { %v6055_v35 = vsub.f32 %v6003_v52, %v3238_v50  ;;  %3513 = vmatpush.bf16.msra.mxu1 %v4337_v14 }
 0xdf1   :  { %v3254_v2 = vmul.f32 %v6055_v35, %v6055_v35 }
 0xdf3   :  { %v3262_v8 = vsel %vm198_vm4, %v3254_v2, 0.0  ;;  %v4324_v2 = vld [vmem:[%s6369_s11] sm:$0xf] }
 0xdf4   :  { %v3219_v18 = vpop.xlane.xlu0 %3218  ;;  %3263 = vadd.xlane.f32.xlu2 %v3262_v8  ;;  %v4480_v8 = vld [vmem:[%s6369_s11 + $0x4] sm:$0xf0] }
 0xdf5   :  { %v3239_v24 = vmul.f32 %v3219_v18, %v4953_v1  ;;  %v4479_v18 = vld [vmem:[%s6369_s11 + $0x4] sm:$0xf] }
 0xdf7   :  { %v6062_v25 = vsub.f32 %v6009_v16, %v3239_v24  ;;  %v4325_v24 = vor.u32 %v4480_v8, %v4324_v2 }
 0xdf9   :  { %v3255_v6 = vmul.f32 %v6062_v25, %v6062_v25  ;;  %3485 = vmatpush.bf16.msra.mxu0 %v4325_v24 }
 0xdfb   :  { %v3265_v3 = vsel %vm198_vm4, %v3255_v6, 0.0  ;;  %v4326_v6 = vld [vmem:[%s6369_s11 + $0x8] sm:$0xf0] }
 0xdfc   :  { %3266 = vadd.xlane.f32.xlu0 %v3265_v3  ;;  %3236 = vadd.xlane.f32.xlu2 %v3235_v22  ;;  %v4329_v3 = vor.u32 %v4479_v18, %v4326_v6 }
 0xdfe   :  { %v3222_v31 = vpop.xlane.xlu1 %3221  ;;  %3514 = vmatpush.bf16.msra.mxu1 %v4329_v3 }
 0xdff   :  { %v3240_v12 = vmul.f32 %v3222_v31, %v4953_v1 }
 0xe01   :  { %v6071_v30 = vsub.f32 %v6017_v10, %v3240_v12 }
 0xe03   :  { %v3256_v62 = vmul.f32 %v6071_v30, %v6071_v30 }
 0xe05   :  { %v3268_v55 = vsel %vm198_vm4, %v3256_v62, 0.0 }
 0xe06   :  { %v3225_v48 = vpop.xlane.xlu2 %3224  ;;  %3269 = vadd.xlane.f32.xlu0 %v3268_v55 }
 0xe07   :  { %v3241_v0 = vmul.f32 %v3225_v48, %v4953_v1 }
 0xe09   :  { %v6078_v38 = vsub.f32 %v6023_v46, %v3241_v0 }
 0xe0b   :  { %v3257_v26 = vmul.f32 %v6078_v38, %v6078_v38 }
 0xe0d   :  { %v3271_v13 = vsel %vm198_vm4, %v3257_v26, 0.0 }
 0xe0e   :  { %v3228_v39 = vpop.xlane.xlu0 %3227  ;;  %3272 = vadd.xlane.f32.xlu1 %v3271_v13 }
 0xe0f   :  { %v3242_v33 = vmul.f32 %v3228_v39, %v4953_v1 }
 0xe11   :  { %v6085_v20 = vsub.f32 %v6031_v59, %v3242_v33 }
 0xe13   :  { %v3258_v37 = vmul.f32 %v6085_v20, %v6085_v20 }
 0xe15   :  { %v3274_v42 = vsel %vm198_vm4, %v3258_v37, 0.0 }
 0xe16   :  { %v3231_v29 = vpop.xlane.xlu1 %3230  ;;  %3275 = vadd.xlane.f32.xlu2 %v3274_v42 }
 0xe17   :  { %v3243_v57 = vmul.f32 %v3231_v29, %v4953_v1 }
 0xe19   :  { %v6092_v53 = vsub.f32 %v6037_v61, %v3243_v57 }
 0xe1b   :  { %v3259_v21 = vmul.f32 %v6092_v53, %v6092_v53 }
 0xe1d   :  { %v3277_v41 = vsel %vm198_vm4, %v3259_v21, 0.0 }
 0xe1e   :  { %3278 = vadd.xlane.f32.xlu0 %v3277_v41  ;;  %v3234_v51 = vpop.xlane.xlu1 %3233 }
 0xe1f   :  { %v3244_v43 = vmul.f32 %v3234_v51, %v4953_v1 }
 0xe21   :  { %v6099_v40 = vsub.f32 %v6045_v63, %v3244_v43 }
 0xe23   :  { %v3260_v17 = vmul.f32 %v6099_v40, %v6099_v40 }
 0xe25   :  { %v3280_v54 = vsel %vm198_vm4, %v3260_v17, 0.0 }
 0xe26   :  { %3281 = vadd.xlane.f32.xlu1 %v3280_v54 }
 0xe67   :  { %v3264_v9 = vpop.xlane.xlu2 %3263 }
 0xe68   :  { %v3286_v4 = vmul.f32 %v3264_v9, %v4953_v1 }
 0xe6a   :  { %v3294_v50 = vadd.f32 1e-05, %v3286_v4 }
 0xe6c   :  { %4694 = vrsqrt.f32 %v3294_v50  ;;  %vm3308_vm9 = vweird.f32 %v3294_v50 }
 0xe6f   :  { %v3267_v22 = vpop.xlane.xlu0 %3266  ;;  %v3237_v31 = vpop.xlane.xlu2 %3236 }
 0xe70   :  { %v3287_v12 = vmul.f32 %v3267_v22, %v4953_v1  ;;  %v3245_v62 = vmul.f32 %v3237_v31, %v4953_v1 }
 0xe72   :  { %v4695_v55 = vpop.eup %4694  ;;  %v3295_v48 = vadd.f32 1e-05, %v3287_v12  ;;  %v6156_v0 = vsub.f32 %v6051_v32, %v3245_v62 }
 0xe73   :  { %v3303_v26 = vmul.f32 %v4695_v55, %v3294_v50  ;;  %vm3309_vm12 = vweird.f32 %v4695_v55 }
 0xe74   :  { %4696 = vrsqrt.f32 %v3295_v48  ;;  %v3261_v13 = vmul.f32 %v6156_v0, %v6156_v0  ;;  %vm3310_vm10 = vmor %vm3308_vm9, %vm3309_vm12  ;;  %vm3318_vm13 = vweird.f32 %v3295_v48 }
 0xe75   :  { %v3304_v39 = vmul.f32 %v4695_v55, %v3303_v26 }
 0xe76   :  { %v3283_v33 = vsel %vm198_vm4, %v3261_v13, 0.0 }
 0xe77   :  { %v3305_v37 = vmul.f32 0.5, %v3304_v39  ;;  %3284 = vadd.xlane.f32.xlu2 %v3283_v33 }
 0xe79   :  { %v3306_v42 = vsub.f32 1.5, %v3305_v37  ;;  %v3270_v29 = vpop.xlane.xlu0 %3269 }
 0xe7a   :  { %v4697_v57 = vpop.eup %4696  ;;  %v3288_v21 = vmul.f32 %v3270_v29, %v4953_v1 }
 0xe7b   :  { %v3307_v41 = vmul.f32 %v4695_v55, %v3306_v42  ;;  %v3313_v51 = vmul.f32 %v4697_v57, %v3295_v48  ;;  %vm3319_vm11 = vweird.f32 %v4697_v57 }
 0xe7c   :  { %v3296_v43 = vadd.f32 1e-05, %v3288_v21  ;;  %vm3320_vm14 = vmor %vm3318_vm13, %vm3319_vm11 }
 0xe7d   :  { %v3314_v17 = vmul.f32 %v4697_v57, %v3313_v51  ;;  %v3311_v54 = vsel %vm3310_vm10, %v4695_v55, %v3307_v41 }
 0xe7e   :  { %4698 = vrsqrt.f32 %v3296_v43  ;;  %v3382_v19 = vmul.f32 %v3311_v54, %v6055_v35  ;;  %vm3328_vm0 = vweird.f32 %v3296_v43 }
 0xe7f   :  { %v3315_v23 = vmul.f32 0.5, %v3314_v17 }
 0xe80   :  { %v3391_v9 = vmul.f32 %v6165_v47, %v3382_v19 }
 0xe81   :  { %v3316_v11 = vsub.f32 1.5, %v3315_v23  ;;  %v3273_v45 = vpop.xlane.xlu1 %3272 }
 0xe82   :  { %v3289_v15 = vmul.f32 %v3273_v45, %v4953_v1  ;;  %v3400_v49 = vadd.f32 %v6172_v58, %v3391_v9 }
 0xe83   :  { %v3317_v7 = vmul.f32 %v4697_v57, %v3316_v11 }
 0xe84   :  { %v4699_v34 = vpop.eup %4698  ;;  %v3297_v27 = vadd.f32 1e-05, %v3289_v15 }
 0xe85   :  { %v3321_v60 = vsel %vm3320_vm14, %v4697_v57, %v3317_v7  ;;  %v3323_v56 = vmul.f32 %v4699_v34, %v3296_v43  ;;  %vm3329_vm15 = vweird.f32 %v4699_v34 }
 0xe86   :  { %v3383_v28 = vmul.f32 %v3321_v60, %v6062_v25  ;;  %4700 = vrsqrt.f32 %v3297_v27  ;;  %vm3330_vm1 = vmor %vm3328_vm0, %vm3329_vm15  ;;  %vm3338_vm3 = vweird.f32 %v3297_v27 }
 0xe87   :  { %v3324_v35 = vmul.f32 %v4699_v34, %v3323_v56 }
 0xe88   :  { %v3392_v36 = vmul.f32 %v6165_v47, %v3383_v28 }
 0xe89   :  { %v3325_v5 = vmul.f32 0.5, %v3324_v35  ;;  %v3276_v4 = vpop.xlane.xlu2 %3275 }
 0xe8a   :  { %v3401_v44 = vadd.f32 %v6172_v58, %v3392_v36  ;;  %v3290_v14 = vmul.f32 %v3276_v4, %v4953_v1 }
 0xe8b   :  { %v3326_v50 = vsub.f32 1.5, %v3325_v5 }
 0xe8c   :  { %v4701_v2 = vpop.eup %4700  ;;  %v3408_v8 = vpack.c.bf16 %v3401_v44, %v3400_v49  ;;  %v3298_v18 = vadd.f32 1e-05, %v3290_v14 }
 0xe8d   :  { %v3327_v24 = vmul.f32 %v4699_v34, %v3326_v50  ;;  %v3333_v6 = vmul.f32 %v4701_v2, %v3297_v27  ;;  %vm3339_vm2 = vweird.f32 %v4701_v2 }
 0xe8e   :  { %4702 = vrsqrt.f32 %v3298_v18  ;;  %4354 = vmatmul.msk.bf16.vlgmr.msra.gmra.mxu0 %vm198_vm4, %v3408_v8  ;;  %4358 = vmatmul.msk.bf16.vlgmr.msra.gmra.mxu1 %vm198_vm4, %v3408_v8  ;;  %vm3340_vm5 = vmor %vm3338_vm3, %vm3339_vm2  ;;  %vm3348_vm7 = vweird.f32 %v3298_v18  ;;  %v4494_v8 = vld [vmem:[%s6370_s12 + $0x38] sm:$0xff] }
 0xe8f   :  { %v3334_v25 = vmul.f32 %v4701_v2, %v3333_v6  ;;  %v3331_v3 = vsel %vm3330_vm1, %v4699_v34, %v3327_v24  ;;  %3818 = vmatpush.bf16.msra.mxu2 %v4494_v8 }
 0xe90   :  { %v3384_v48 = vmul.f32 %v3331_v3, %v6071_v30 }
 0xe91   :  { %v3335_v22 = vmul.f32 0.5, %v3334_v25  ;;  %v3279_v31 = vpop.xlane.xlu0 %3278  ;;  %v4493_v25 = vld [vmem:[%s6370_s12 + $0x30] sm:$0xff] }
 0xe92   :  { %v3291_v12 = vmul.f32 %v3279_v31, %v4953_v1  ;;  %v3393_v29 = vmul.f32 %v6165_v47, %v3384_v48 }
 0xe93   :  { %v3336_v62 = vsub.f32 1.5, %v3335_v22  ;;  %3819 = vmatpush.bf16.msra.mxu2 %v4493_v25 }
 0xe94   :  { %v4703_v55 = vpop.eup %4702  ;;  %v3299_v26 = vadd.f32 1e-05, %v3291_v12  ;;  %v3402_v43 = vadd.f32 %v6172_v58, %v3393_v29  ;;  %v4492_v12 = vld [vmem:[%s6370_s12 + $0x28] sm:$0xff] }
 0xe95   :  { %v3337_v13 = vmul.f32 %v4701_v2, %v3336_v62  ;;  %v3343_v39 = vmul.f32 %v4703_v55, %v3298_v18  ;;  %vm3349_vm6 = vweird.f32 %v4703_v55  ;;  %v4502_v18 = vld [vmem:[%s6370_s12 + $0x78] sm:$0xff]  ;;  %v4500_v62 = vld [vmem:[%s6370_s12 + $0x68] sm:$0xff] }
 0xe96   :  { %4704 = vrsqrt.f32 %v3299_v26  ;;  %vm3350_vm8 = vmor %vm3348_vm7, %vm3349_vm6  ;;  %vm3358_vm9 = vweird.f32 %v3299_v26  ;;  %3847 = vmatpush.bf16.msra.mxu3 %v4502_v18 }
 0xe97   :  { %v3341_v33 = vsel %vm3340_vm5, %v4701_v2, %v3337_v13  ;;  %v3344_v37 = vmul.f32 %v4703_v55, %v3343_v39  ;;  %3820 = vmatpush.bf16.msra.mxu2 %v4492_v12  ;;  %v4491_v39 = vld [vmem:[%s6370_s12 + $0x20] sm:$0xff] }
 0xe98   :  { %v3385_v42 = vmul.f32 %v3341_v33, %v6078_v38  ;;  %v4499_v33 = vld [vmem:[%s6370_s12 + $0x60] sm:$0xff] }
 0xe99   :  { %v3345_v57 = vmul.f32 0.5, %v3344_v37 }
 0xe9a   :  { %v3394_v21 = vmul.f32 %v6165_v47, %v3385_v42 }
 0xe9b   :  { %v3346_v41 = vsub.f32 1.5, %v3345_v57  ;;  %3821 = vmatpush.bf16.msra.mxu2 %v4491_v39 }
 0xe9c   :  { %v4705_v51 = vpop.eup %4704  ;;  %v3403_v30 = vadd.f32 %v6172_v58, %v3394_v21  ;;  %v4498_v21 = vld [vmem:[%s6370_s12 + $0x58] sm:$0xff] }
 0xe9d   :  { %v3347_v17 = vmul.f32 %v4703_v55, %v3346_v41  ;;  %v3353_v54 = vmul.f32 %v4705_v51, %v3299_v26  ;;  %vm3359_vm12 = vweird.f32 %v4705_v51 }
 0xe9e   :  { %v3409_v23 = vpack.c.bf16 %v3403_v30, %v3402_v43  ;;  %vm3360_vm10 = vmor %vm3358_vm9, %vm3359_vm12  ;;  %v4489_v30 = vld [vmem:[%s6370_s12 + $0x10] sm:$0xff] }
 0xe9f   :  { %v3354_v11 = vmul.f32 %v4705_v51, %v3353_v54  ;;  %v3351_v38 = vsel %vm3350_vm8, %v4703_v55, %v3347_v17  ;;  %v4497_v17 = vld [vmem:[%s6370_s12 + $0x50] sm:$0xff] }
 0xea0   :  { %4355 = vmatmul.msk.bf16.gmra.mxu0 %vm198_vm4, %v3409_v23  ;;  %4359 = vmatmul.msk.bf16.gmra.mxu1 %vm198_vm4, %v3409_v23  ;;  %v3386_v15 = vmul.f32 %v3351_v38, %v6085_v20  ;;  %v3282_v20 = vpop.xlane.xlu1 %3281 }
 0xea1   :  { %v3355_v45 = vmul.f32 0.5, %v3354_v11  ;;  %v3292_v36 = vmul.f32 %v3282_v20, %v4953_v1  ;;  %v4496_v11 = vld [vmem:[%s6370_s12 + $0x48] sm:$0xff] }
 0xea2   :  { %v3395_v60 = vmul.f32 %v6165_v47, %v3386_v15 }
 0xea3   :  { %v3356_v19 = vsub.f32 1.5, %v3355_v45  ;;  %v3300_v5 = vadd.f32 1e-05, %v3292_v36 }
 0xea4   :  { %v3404_v9 = vadd.f32 %v6172_v58, %v3395_v60 }
 0xea5   :  { %v3357_v7 = vmul.f32 %v4705_v51, %v3356_v19  ;;  %4706 = vrsqrt.f32 %v3300_v5  ;;  %vm3368_vm13 = vweird.f32 %v3300_v5 }
 0xea7   :  { %v3361_v34 = vsel %vm3360_vm10, %v4705_v51, %v3357_v7  ;;  %v4487_v7 = vld [vmem:[%s6370_s12] sm:$0xff] }
 0xea8   :  { %v3387_v27 = vmul.f32 %v3361_v34, %v6092_v53  ;;  %v4495_v34 = vld [vmem:[%s6370_s12 + $0x40] sm:$0xff] }
 0xeaa   :  { %v3396_v56 = vmul.f32 %v6165_v47, %v3387_v27 }
 0xeab   :  { %v4707_v4 = vpop.eup %4706 }
 0xeac   :  { %v3405_v28 = vadd.f32 %v6172_v58, %v3396_v56  ;;  %v3363_v53 = vmul.f32 %v4707_v4, %v3300_v5  ;;  %vm3369_vm11 = vweird.f32 %v4707_v4 }
 0xead   :  { %vm3370_vm14 = vmor %vm3368_vm13, %vm3369_vm11 }
 0xeae   :  { %v3410_v35 = vpack.c.bf16 %v3405_v28, %v3404_v9  ;;  %v3364_v49 = vmul.f32 %v4707_v4, %v3363_v53 }
 0xeb0   :  { %4356 = vmatmul.msk.bf16.gmra.mxu0 %vm198_vm4, %v3410_v35  ;;  %4360 = vmatmul.msk.bf16.gmra.mxu1 %vm198_vm4, %v3410_v35  ;;  %v3365_v2 = vmul.f32 0.5, %v3364_v49 }
 0xeb2   :  { %v3366_v24 = vsub.f32 1.5, %v3365_v2 }
 0xeb4   :  { %v3367_v3 = vmul.f32 %v4707_v4, %v3366_v24 }
 0xeb6   :  { %v3371_v55 = vsel %vm3370_vm14, %v4707_v4, %v3367_v3 }
 0xeb7   :  { %v3388_v13 = vmul.f32 %v3371_v55, %v6099_v40  ;;  %v4490_v40 = vld [vmem:[%s6370_s12 + $0x18] sm:$0xff] }
 0xeb8   :  { %3822 = vmatpush.bf16.msra.mxu2 %v4490_v40 }
 0xeb9   :  { %v3397_v57 = vmul.f32 %v6165_v47, %v3388_v13 }
 0xebb   :  { %v3406_v51 = vadd.f32 %v6172_v58, %v3397_v57 }
 0xebc   :  { %3823 = vmatpush.bf16.msra.mxu2 %v4489_v30 }
 0xeea   :  { %v3285_v44 = vpop.xlane.xlu2 %3284 }
 0xeeb   :  { %v3293_v14 = vmul.f32 %v3285_v44, %v4953_v1  ;;  %v4501_v1 = vld [vmem:[%s6370_s12 + $0x70] sm:$0xff] }
 0xeec   :  { %3848 = vmatpush.bf16.msra.mxu3 %v4501_v1 }
 0xeed   :  { %v3301_v50 = vadd.f32 1e-05, %v3293_v14 }
 0xeef   :  { %4708 = vrsqrt.f32 %v3301_v50  ;;  %vm3378_vm0 = vweird.f32 %v3301_v50 }
 0xef0   :  { %3849 = vmatpush.bf16.msra.mxu3 %v4500_v62 }
 0xef4   :  { %3850 = vmatpush.bf16.msra.mxu3 %v4499_v33 }
 0xef5   :  { %v4709_v6 = vpop.eup %4708 }
 0xef6   :  { %v3373_v22 = vmul.f32 %v4709_v6, %v3301_v50  ;;  %vm3379_vm15 = vweird.f32 %v4709_v6 }
 0xef7   :  { %vm3380_vm1 = vmor %vm3378_vm0, %vm3379_vm15 }
 0xef8   :  { %v3374_v31 = vmul.f32 %v4709_v6, %v3373_v22  ;;  %3851 = vmatpush.bf16.msra.mxu3 %v4498_v21 }
 0xefa   :  { %v3375_v48 = vmul.f32 0.5, %v3374_v31 }
 0xefc   :  { %v3376_v26 = vsub.f32 1.5, %v3375_v48  ;;  %3852 = vmatpush.bf16.msra.mxu3 %v4497_v17 }
 0xefe   :  { %v3377_v37 = vmul.f32 %v4709_v6, %v3376_v26 }
 0xf00   :  { %v3381_v42 = vsel %vm3380_vm1, %v4709_v6, %v3377_v37  ;;  %3853 = vmatpush.bf16.msra.mxu3 %v4496_v11 }
 0xf01   :  { %v3389_v29 = vmul.f32 %v3381_v42, %v6156_v0  ;;  %v3420_v0 = vld [vmem:[%s6362_s4] sm:$0x3] }
 0xf02   :  { %v6248_v23 = vperm.slane %v3420_v0, 1 }
 0xf03   :  { %v3398_v41 = vmul.f32 %v6165_v47, %v3389_v29  ;;  %v6246_v47 = vperm.slane %v3420_v0, 0 }
 0xf04   :  { %3854 = vmatpush.bf16.msra.mxu3 %v4495_v34 }
 0xf05   :  { %v3407_v43 = vadd.f32 %v6172_v58, %v3398_v41  ;;  %v4488_v58 = vld [vmem:[%s6370_s12 + $0x8] sm:$0xff] }
 0xf06   :  { %3824 = vmatpush.bf16.msra.mxu2 %v4488_v58 }
 0xf07   :  { %v3411_v54 = vpack.c.bf16 %v3407_v43, %v3406_v51 }
 0xf09   :  { %4357 = vmatmul.msk.bf16.gmra.mxu0 %vm198_vm4, %v3411_v54  ;;  %4361 = vmatmul.msk.bf16.gmra.mxu1 %vm198_vm4, %v3411_v54 }
 0xf0a   :  { %3825 = vmatpush.bf16.msra.mxu2 %v4487_v7 }
 0xf0b   :  { %v3487_v38 = vpop.f32.mrf.mxu0  ;;  %v3516_v45 = vpop.f32.mrf.mxu1 }
 0xf0c   :  { %v6259_v19 = vadd.f32 %v3487_v38, %v6246_v47  ;;  %v6262_v15 = vadd.f32 %v3516_v45, %v6248_v23 }
 0xf0e   :  { %v3536_v27 = vmul.f32 %v6259_v19, %v6259_v19  ;;  %v3537_v60 = vmul.f32 %v6262_v15, %v6262_v15 }
 0xf10   :  { %v3552_v56 = vmul.f32 %v3536_v27, %v6259_v19  ;;  %v3553_v9 = vmul.f32 %v3537_v60, %v6262_v15 }
 0xf12   :  { %v3568_v28 = vmul.f32 0.044715, %v3552_v56  ;;  %v3569_v35 = vmul.f32 0.044715, %v3553_v9 }
 0xf13   :  { %v3489_v20 = vpop.f32.mrf.mxu0  ;;  %v3518_v36 = vpop.f32.mrf.mxu1 }
 0xf14   :  { %v3584_v5 = vadd.f32 %v3568_v28, %v6259_v19  ;;  %v3585_v4 = vadd.f32 %v3569_v35, %v6262_v15  ;;  %v3490_v53 = vadd.f32 %v3489_v20, %v6246_v47  ;;  %v3519_v49 = vadd.f32 %v3518_v36, %v6248_v23 }
 0xf16   :  { %v3600_v44 = vmul.f32 0.7978846, %v3584_v5  ;;  %v3601_v14 = vmul.f32 0.7978846, %v3585_v4  ;;  %v3538_v50 = vmul.f32 %v3490_v53, %v3490_v53  ;;  %v3539_v2 = vmul.f32 %v3519_v49, %v3519_v49 }
 0xf18   :  { %v3554_v8 = vmul.f32 %v3538_v50, %v3490_v53  ;;  %v3555_v18 = vmul.f32 %v3539_v2, %v3519_v49  ;;  %4710 = vtanh.f32 %v3600_v44 }
 0xf19   :  { %4712 = vtanh.f32 %v3601_v14 }
 0xf1a   :  { %v3570_v24 = vmul.f32 0.044715, %v3554_v8  ;;  %v3571_v6 = vmul.f32 0.044715, %v3555_v18 }
 0xf1c   :  { %v3586_v25 = vadd.f32 %v3570_v24, %v3490_v53  ;;  %v3587_v1 = vadd.f32 %v3571_v6, %v3519_v49 }
 0xf1d   :  { %v3492_v3 = vpop.f32.mrf.mxu0  ;;  %v3521_v22 = vpop.f32.mrf.mxu1 }
 0xf1e   :  { %v3602_v31 = vmul.f32 0.7978846, %v3586_v25  ;;  %v3603_v12 = vmul.f32 0.7978846, %v3587_v1  ;;  %v6281_v62 = vadd.f32 %v3492_v3, %v6246_v47  ;;  %v6284_v55 = vadd.f32 %v3521_v22, %v6248_v23  ;;  %v4711_v48 = vpop.eup %4710 }
 0xf1f   :  { %v4713_v26 = vpop.eup %4712  ;;  %v3632_v42 = vadd.f32 1.0, %v4711_v48 }
 0xf20   :  { %4714 = vtanh.f32 %v3602_v31  ;;  %v3540_v13 = vmul.f32 %v6281_v62, %v6281_v62  ;;  %v3541_v39 = vmul.f32 %v6284_v55, %v6284_v55  ;;  %v3633_v29 = vadd.f32 1.0, %v4713_v26 }
 0xf21   :  { %4716 = vtanh.f32 %v3603_v12  ;;  %v3648_v58 = vmul.f32 0.5, %v3632_v42 }
 0xf22   :  { %v3556_v33 = vmul.f32 %v3540_v13, %v6281_v62  ;;  %v3557_v37 = vmul.f32 %v3541_v39, %v6284_v55  ;;  %v3649_v11 = vmul.f32 0.5, %v3633_v29 }
 0xf23   :  { %v3664_v35 = vmul.f32 %v3648_v58, %v6259_v19 }
 0xf24   :  { %v3572_v57 = vmul.f32 0.044715, %v3556_v33  ;;  %v3573_v40 = vmul.f32 0.044715, %v3557_v37  ;;  %v3665_v5 = vmul.f32 %v3649_v11, %v6262_v15 }
 0xf25   :  { %v3494_v21 = vpop.f32.mrf.mxu0  ;;  %v3523_v41 = vpop.f32.mrf.mxu1 }
 0xf26   :  { %v4715_v51 = vpop.eup %4714  ;;  %v3588_v43 = vadd.f32 %v3572_v57, %v6281_v62  ;;  %v3589_v0 = vadd.f32 %v3573_v40, %v6284_v55  ;;  %v6295_v30 = vadd.f32 %v3494_v21, %v6246_v47  ;;  %v6298_v17 = vadd.f32 %v3523_v41, %v6248_v23 }
 0xf27   :  { %v4717_v54 = vpop.eup %4716  ;;  %v3634_v38 = vadd.f32 1.0, %v4715_v51 }
 0xf28   :  { %v3635_v45 = vadd.f32 1.0, %v4717_v54  ;;  %v3604_v7 = vmul.f32 0.7978846, %v3588_v43  ;;  %v3605_v34 = vmul.f32 0.7978846, %v3589_v0  ;;  %v3542_v27 = vmul.f32 %v6295_v30, %v6295_v30 }
 0xf29   :  { %v3650_v60 = vmul.f32 0.5, %v3634_v38  ;;  %v3543_v56 = vmul.f32 %v6298_v17, %v6298_v17 }
 0xf2a   :  { %v3651_v9 = vmul.f32 0.5, %v3635_v45  ;;  %v3558_v28 = vmul.f32 %v3542_v27, %v6295_v30  ;;  %4718 = vtanh.f32 %v3604_v7 }
 0xf2b   :  { %v3666_v20 = vmul.f32 %v3650_v60, %v3490_v53  ;;  %v3559_v36 = vmul.f32 %v3543_v56, %v6298_v17  ;;  %4720 = vtanh.f32 %v3605_v34 }
 0xf2c   :  { %v3667_v4 = vmul.f32 %v3651_v9, %v3519_v49  ;;  %v3574_v44 = vmul.f32 0.044715, %v3558_v28 }
 0xf2d   :  { %v3680_v14 = vpack.c.bf16 %v3666_v20, %v3664_v35  ;;  %v3575_v50 = vmul.f32 0.044715, %v3559_v36  ;;  %v3497_v2 = vpop.f32.mrf.mxu0  ;;  %v3526_v8 = vpop.f32.mrf.mxu1 }
 0xf2e   :  { %v3681_v18 = vpack.c.bf16 %v3667_v4, %v3665_v5  ;;  %v3590_v24 = vadd.f32 %v3574_v44, %v6295_v30  ;;  %v6310_v6 = vadd.f32 %v3497_v2, %v6246_v47  ;;  %v6313_v19 = vadd.f32 %v3526_v8, %v6248_v23 }
 0xf2f   :  { %v3591_v53 = vadd.f32 %v3575_v50, %v6298_v17  ;;  %3826 = vmatmul.bf16.vlgmr.msra.gmra.mxu2 %v3680_v14 }
 0xf30   :  { %v3606_v15 = vmul.f32 0.7978846, %v3590_v24  ;;  %v3544_v49 = vmul.f32 %v6310_v6, %v6310_v6  ;;  %v3545_v25 = vmul.f32 %v6313_v19, %v6313_v19  ;;  %3855 = vmatmul.bf16.vlgmr.msra.gmra.mxu3 %v3681_v18  ;;  %v4719_v1 = vpop.eup %4718 }
 0xf31   :  { %v3607_v3 = vmul.f32 0.7978846, %v3591_v53  ;;  %v4721_v22 = vpop.eup %4720  ;;  %v3636_v33 = vadd.f32 1.0, %v4719_v1 }
 0xf32   :  { %4722 = vtanh.f32 %v3606_v15  ;;  %v3560_v31 = vmul.f32 %v3544_v49, %v6310_v6  ;;  %v3561_v12 = vmul.f32 %v3545_v25, %v6313_v19  ;;  %v3637_v37 = vadd.f32 1.0, %v4721_v22 }
 0xf33   :  { %4724 = vtanh.f32 %v3607_v3  ;;  %v3652_v11 = vmul.f32 0.5, %v3636_v33 }
 0xf34   :  { %v3576_v48 = vmul.f32 0.044715, %v3560_v31  ;;  %v3577_v26 = vmul.f32 0.044715, %v3561_v12  ;;  %v3653_v34 = vmul.f32 0.5, %v3637_v37 }
 0xf35   :  { %v3499_v13 = vpop.f32.mrf.mxu0  ;;  %v3528_v39 = vpop.f32.mrf.mxu1  ;;  %v3668_v28 = vmul.f32 %v3652_v11, %v6281_v62 }
 0xf36   :  { %v3592_v42 = vadd.f32 %v3576_v48, %v6310_v6  ;;  %v3593_v29 = vadd.f32 %v3577_v26, %v6313_v19  ;;  %v3500_v57 = vadd.f32 %v3499_v13, %v6246_v47  ;;  %v3529_v40 = vadd.f32 %v3528_v39, %v6248_v23 }
 0xf37   :  { %v3669_v5 = vmul.f32 %v3653_v34, %v6284_v55 }
 0xf38   :  { %v4723_v21 = vpop.eup %4722  ;;  %v3608_v41 = vmul.f32 0.7978846, %v3592_v42  ;;  %v3546_v51 = vmul.f32 %v3500_v57, %v3500_v57  ;;  %v3547_v43 = vmul.f32 %v3529_v40, %v3529_v40  ;;  %v3609_v54 = vmul.f32 0.7978846, %v3593_v29 }
 0xf39   :  { %v4725_v0 = vpop.eup %4724  ;;  %v3638_v58 = vadd.f32 1.0, %v4723_v21 }
 0xf3a   :  { %v3562_v38 = vmul.f32 %v3546_v51, %v3500_v57  ;;  %v3563_v45 = vmul.f32 %v3547_v43, %v3529_v40  ;;  %v3639_v7 = vadd.f32 1.0, %v4725_v0  ;;  %4726 = vtanh.f32 %v3608_v41 }
 0xf3b   :  { %v3654_v27 = vmul.f32 0.5, %v3638_v58  ;;  %4728 = vtanh.f32 %v3609_v54 }
 0xf3c   :  { %v3578_v60 = vmul.f32 0.044715, %v3562_v38  ;;  %v3579_v56 = vmul.f32 0.044715, %v3563_v45  ;;  %v3655_v9 = vmul.f32 0.5, %v3639_v7 }
 0xf3d   :  { %v3670_v35 = vmul.f32 %v3654_v27, %v6295_v30 }
 0xf3e   :  { %v3594_v20 = vadd.f32 %v3578_v60, %v3500_v57  ;;  %v3595_v36 = vadd.f32 %v3579_v56, %v3529_v40  ;;  %v3671_v4 = vmul.f32 %v3655_v9, %v6298_v17 }
 0xf3f   :  { %v3682_v44 = vpack.c.bf16 %v3670_v35, %v3668_v28 }
 0xf40   :  { %v3610_v14 = vmul.f32 0.7978846, %v3594_v20  ;;  %v3611_v50 = vmul.f32 0.7978846, %v3595_v36  ;;  %v3683_v2 = vpack.c.bf16 %v3671_v4, %v3669_v5  ;;  %v4727_v8 = vpop.eup %4726 }
 0xf41   :  { %3831 = vmatmul.bf16.gmra.mxu2 %v3682_v44  ;;  %v4729_v18 = vpop.eup %4728  ;;  %v3640_v24 = vadd.f32 1.0, %v4727_v8 }
 0xf42   :  { %4730 = vtanh.f32 %v3610_v14  ;;  %3860 = vmatmul.bf16.gmra.mxu3 %v3683_v2  ;;  %v3641_v62 = vadd.f32 1.0, %v4729_v18 }
 0xf43   :  { %4732 = vtanh.f32 %v3611_v50  ;;  %v3656_v49 = vmul.f32 0.5, %v3640_v24 }
 0xf44   :  { %v3657_v55 = vmul.f32 0.5, %v3641_v62 }
 0xf45   :  { %v3672_v3 = vmul.f32 %v3656_v49, %v6310_v6 }
 0xf46   :  { %v3673_v31 = vmul.f32 %v3657_v55, %v6313_v19 }
 0xf48   :  { %v4731_v53 = vpop.eup %4730 }
 0xf49   :  { %v4733_v30 = vpop.eup %4732  ;;  %v3642_v15 = vadd.f32 1.0, %v4731_v53 }
 0xf4a   :  { %v3643_v25 = vadd.f32 1.0, %v4733_v30 }
 0xf4b   :  { %v3658_v1 = vmul.f32 0.5, %v3642_v15 }
 0xf4c   :  { %v3659_v17 = vmul.f32 0.5, %v3643_v25  ;;  %v4523_v25 = vld [vmem:[%s6361_s3 + $0x3] ss:$0 sm:$0xff]  ;;  %s4769_s3 = smov [#allocation2]  }
 0xf4d   :  { %v3674_v22 = vmul.f32 %v3658_v1, %v3500_v57  ;;  %s3896_s17 = sshll.u32 %s4769_s3, 4  ;;  %s3897_s17 = int_to_ptr.vmem [resolvable:$true] %s3896_s17 }
 0xf4e   :  { %v3675_v12 = vmul.f32 %v3659_v17, %v3529_v40 }
 0xf4f   :  { %v3684_v48 = vpack.c.bf16 %v3674_v22, %v3672_v3 }
 0xf50   :  { %v3685_v26 = vpack.c.bf16 %v3675_v12, %v3673_v31 }
 0xf51   :  { %3836 = vmatmul.bf16.gmra.mxu2 %v3684_v48 }
 0xf52   :  { %3865 = vmatmul.bf16.gmra.mxu3 %v3685_v26 }
 0xf86   :  { %v3502_v13 = vpop.f32.mrf.mxu0  ;;  %v3531_v39 = vpop.f32.mrf.mxu1 }
 0xf87   :  { %v3503_v33 = vadd.f32 %v3502_v13, %v6246_v47  ;;  %v3532_v37 = vadd.f32 %v3531_v39, %v6248_v23 }
 0xf89   :  { %v3548_v42 = vmul.f32 %v3503_v33, %v3503_v33  ;;  %v3549_v29 = vmul.f32 %v3532_v37, %v3532_v37 }
 0xf8b   :  { %v3564_v21 = vmul.f32 %v3548_v42, %v3503_v33  ;;  %v3565_v41 = vmul.f32 %v3549_v29, %v3532_v37 }
 0xf8d   :  { %v3580_v51 = vmul.f32 0.044715, %v3564_v21  ;;  %v3581_v6 = vmul.f32 0.044715, %v3565_v41 }
 0xf8e   :  { %v3504_v57 = vpop.f32.mrf.mxu0  ;;  %v3533_v43 = vpop.f32.mrf.mxu1 }
 0xf8f   :  { %v3596_v19 = vadd.f32 %v3580_v51, %v3503_v33  ;;  %v3597_v40 = vadd.f32 %v3581_v6, %v3532_v37  ;;  %v3505_v0 = vadd.f32 %v3504_v57, %v6246_v47  ;;  %v3534_v54 = vadd.f32 %v3533_v43, %v6248_v23 }
 0xf91   :  { %v3612_v58 = vmul.f32 0.7978846, %v3596_v19  ;;  %v3550_v11 = vmul.f32 %v3505_v0, %v3505_v0  ;;  %v3551_v38 = vmul.f32 %v3534_v54, %v3534_v54  ;;  %v3613_v45 = vmul.f32 0.7978846, %v3597_v40 }
 0xf93   :  { %v3566_v7 = vmul.f32 %v3550_v11, %v3505_v0  ;;  %v3567_v34 = vmul.f32 %v3551_v38, %v3534_v54  ;;  %4734 = vtanh.f32 %v3612_v58 }
 0xf94   :  { %4736 = vtanh.f32 %v3613_v45 }
 0xf95   :  { %v3582_v27 = vmul.f32 0.044715, %v3566_v7  ;;  %v3583_v60 = vmul.f32 0.044715, %v3567_v34 }
 0xf97   :  { %v3598_v56 = vadd.f32 %v3582_v27, %v3505_v0  ;;  %v3599_v9 = vadd.f32 %v3583_v60, %v3534_v54 }
 0xf99   :  { %v3614_v28 = vmul.f32 0.7978846, %v3598_v56  ;;  %v3615_v35 = vmul.f32 0.7978846, %v3599_v9  ;;  %v4735_v20 = vpop.eup %4734 }
 0xf9a   :  { %v4737_v36 = vpop.eup %4736  ;;  %v3644_v47 = vadd.f32 1.0, %v4735_v20 }
 0xf9b   :  { %4738 = vtanh.f32 %v3614_v28  ;;  %v3645_v23 = vadd.f32 1.0, %v4737_v36 }
 0xf9c   :  { %4740 = vtanh.f32 %v3615_v35  ;;  %v3660_v14 = vmul.f32 0.5, %v3644_v47 }
 0xf9d   :  { %v3661_v2 = vmul.f32 0.5, %v3645_v23 }
 0xf9e   :  { %v3676_v24 = vmul.f32 %v3660_v14, %v3503_v33 }
 0xf9f   :  { %v3677_v53 = vmul.f32 %v3661_v2, %v3532_v37 }
 0xfa1   :  { %v4739_v5 = vpop.eup %4738 }
 0xfa2   :  { %v4741_v4 = vpop.eup %4740  ;;  %v3646_v44 = vadd.f32 1.0, %v4739_v5 }
 0xfa3   :  { %v3647_v50 = vadd.f32 1.0, %v4741_v4 }
 0xfa4   :  { %v3662_v8 = vmul.f32 0.5, %v3646_v44 }
 0xfa5   :  { %v3663_v18 = vmul.f32 0.5, %v3647_v50 }
 0xfa6   :  { %v3678_v62 = vmul.f32 %v3662_v8, %v3505_v0 }
 0xfa7   :  { %v3679_v30 = vmul.f32 %v3663_v18, %v3534_v54 }
 0xfa8   :  { %v3686_v15 = vpack.c.bf16 %v3678_v62, %v3676_v24 }
 0xfa9   :  { %v3687_v49 = vpack.c.bf16 %v3679_v30, %v3677_v53 }
 0xfaa   :  { %3841 = vmatmul.bf16.gmra.mxu2 %v3686_v15 }
 0xfab   :  { %3870 = vmatmul.bf16.gmra.mxu3 %v3687_v49 }
 0xfb2   :  { %v3827_v55 = vpop.f32.mrf.mxu2 }
 0xfb3   :  { %v3828_v1 = vadd.f32 %v4523_v25, %v3827_v55  ;;  %v3856_v17 = vpop.f32.mrf.mxu3 }
 0xfb5   :  { %v3857_v3 = vadd.f32 %v3856_v17, %v3828_v1 }
 0xfb7   :  { %v3876_v22 = vadd.f32 %v3857_v3, %v6003_v52 }
 0xfb9   :  { %3884 = vst.msk [vmem:[#allocation2] sm:$0xff] %vm198_vm4, %v3876_v22 }
 0xfba   :  { %v3829_v31 = vpop.f32.mrf.mxu2 }
 0xfbb   :  { %v3830_v12 = vadd.f32 %v4523_v25, %v3829_v31  ;;  %v3858_v48 = vpop.f32.mrf.mxu3 }
 0xfbd   :  { %v3859_v26 = vadd.f32 %v3858_v48, %v3830_v12 }
 0xfbf   :  { %v3877_v13 = vadd.f32 %v3859_v26, %v6009_v16 }
 0xfc1   :  { %3885 = vst.msk [vmem:[#allocation2 + $0x8] sm:$0xff] %vm198_vm4, %v3877_v13 }
 0xfc4   :  { %v3832_v39 = vpop.f32.mrf.mxu2 }
 0xfc5   :  { %v3833_v33 = vadd.f32 %v4523_v25, %v3832_v39  ;;  %v3861_v37 = vpop.f32.mrf.mxu3 }
 0xfc7   :  { %v3862_v42 = vadd.f32 %v3861_v37, %v3833_v33 }
 0xfc9   :  { %v3878_v29 = vadd.f32 %v3862_v42, %v6017_v10 }
 0xfcb   :  { %3886 = vst.msk [vmem:[#allocation2 + $0x10] sm:$0xff] %vm198_vm4, %v3878_v29 }
 0xfcc   :  { %v3834_v21 = vpop.f32.mrf.mxu2 }
 0xfcd   :  { %v3835_v52 = vadd.f32 %v4523_v25, %v3834_v21  ;;  %v3863_v41 = vpop.f32.mrf.mxu3 }
 0xfcf   :  { %v3864_v51 = vadd.f32 %v3863_v41, %v3835_v52 }
 0xfd1   :  { %v3879_v6 = vadd.f32 %v3864_v51, %v6023_v46 }
 0xfd3   :  { %3887 = vst.msk [vmem:[#allocation2 + $0x18] sm:$0xff] %vm198_vm4, %v3879_v6 }
 0xfd4   :  { %v3837_v57 = vpop.f32.mrf.mxu2 }
 0xfd5   :  { %v3838_v16 = vadd.f32 %v4523_v25, %v3837_v57  ;;  %v3866_v43 = vpop.f32.mrf.mxu3 }
 0xfd7   :  { %v3867_v19 = vadd.f32 %v3866_v43, %v3838_v16 }
 0xfd9   :  { %v3880_v40 = vadd.f32 %v3867_v19, %v6031_v59 }
 0xfdb   :  { %3888 = vst.msk [vmem:[#allocation2 + $0x20] sm:$0xff] %vm198_vm4, %v3880_v40 }
 0xfdc   :  { %v3839_v0 = vpop.f32.mrf.mxu2 }
 0xfdd   :  { %v3840_v10 = vadd.f32 %v4523_v25, %v3839_v0  ;;  %v3868_v54 = vpop.f32.mrf.mxu3 }
 0xfdf   :  { %v3869_v58 = vadd.f32 %v3868_v54, %v3840_v10 }
 0xfe1   :  { %v3881_v11 = vadd.f32 %v3869_v58, %v6037_v61 }
 0xfe3   :  { %3889 = vst.msk [vmem:[#allocation2 + $0x28] sm:$0xff] %vm198_vm4, %v3881_v11 }
0x102d   :  { %v3842_v38 = vpop.f32.mrf.mxu2 }
0x102e   :  { %v3843_v46 = vadd.f32 %v4523_v25, %v3842_v38  ;;  %v3871_v45 = vpop.f32.mrf.mxu3 }
0x1030   :  { %v3872_v7 = vadd.f32 %v3871_v45, %v3843_v46 }
0x1032   :  { %v3882_v34 = vadd.f32 %v3872_v7, %v6045_v63 }
0x1034   :  { %3890 = vst.msk [vmem:[#allocation2 + $0x30] sm:$0xff] %vm198_vm4, %v3882_v34 }
0x1035   :  { %v3844_v27 = vpop.f32.mrf.mxu2 }
0x1036   :  { %v3845_v59 = vadd.f32 %v4523_v25, %v3844_v27  ;;  %v3873_v60 = vpop.f32.mrf.mxu3 }
0x1038   :  { %v3874_v61 = vadd.f32 %v3873_v60, %v3845_v59 }
0x103a   :  { %v3883_v56 = vadd.f32 %v3874_v61, %v6051_v32 }
0x103c   :  { %3891 = vst.msk [vmem:[#allocation2 + $0x38] sm:$0xff] %vm198_vm4, %v3883_v56 }
0x103d   :  { %3904 = dma.vmem_to_hbm [thread:$0]  %s3897_s17, 1024, %s3899_s7, [#allocation3], %s4770_s18, %s4770_s18, %s4771_s19  }
0x103e   :  { %4766 = dma.done.wait [#allocation3], 1024  }
0x103f   :  { %4767 = vsyncadd [#allocation3], 4294966272 }
0x1040   :  { %3909 = vsyncpa [#allocation3], 1 }

</bundles_post_ra>
